<compile_context>
chip_gen: v7x
topology: tpu7x:2x2x1
jax: 0.10.0
libtpu: 0.0.40
codegen_flags: <defaults>
</compile_context>

<pallas_src>
import math

import numpy as np

import jax
import jax.numpy as jnp
from jax.experimental import pallas as pl
from jax.experimental.pallas import tpu as pltpu

BN_EPS = 1e-5
BN_SCALE = 1.0 / math.sqrt(1.0 + BN_EPS)


# ---------------- host-side structured-weight construction -----------------

def _conv_as_dense(w_oihw, bias, *, H, W, stride, pad, scale):
    """Fold Conv2d (+ eval-mode BN scale) into a dense (Cin*H*W, Cout*Ho*Wo)
    matmul acting on CHW-flattened per-sample feature vectors, plus a bias row."""
    w = np.asarray(w_oihw, np.float32) * scale
    b = np.asarray(bias, np.float32) * scale
    Cout, Cin, kh, kw = w.shape
    Ho = (H + 2 * pad - kh) // stride + 1
    Wo = (W + 2 * pad - kw) // stride + 1
    Wm = np.zeros((Cin * H * W, Cout * Ho * Wo), np.float32)
    for co in range(Cout):
        for i in range(Ho):
            for j in range(Wo):
                n = (co * Ho + i) * Wo + j
                for ci in range(Cin):
                    for dy in range(kh):
                        y = stride * i + dy - pad
                        if not (0 <= y < H):
                            continue                      # zero padding
                        for dx in range(kw):
                            x = stride * j + dx - pad
                            if 0 <= x < W:
                                Wm[(ci * H + y) * W + x, n] += w[co, ci, dy, dx]
    brow = np.repeat(b, Ho * Wo).reshape(1, Cout * Ho * Wo)
    return Wm, brow, Ho, Wo


def _convncf_layer0_rank2(w_oihw, bias, *, F, num_fm, scale):
    """ConvNCF conv1 acts on the rank-1 outer product u v^T; the 2x2/stride-2
    conv is applied directly to u and v via a dy-split rank-2 form:
        pre[b, (co,i,j)] = sum_dy (u @ RA[dy])[b,n] * (v @ RB[dy])[b,n] + brow
    RA is a 0/1 row-replication matrix; RB carries the conv weights + BN scale."""
    w = np.asarray(w_oihw, np.float32)          # (num_fm, 1, 2, 2)
    b = np.asarray(bias, np.float32) * scale
    Ho = Wo = F // 2
    N = num_fm * Ho * Wo
    RA = np.zeros((2, F, N), np.float32)
    RB = np.zeros((2, F, N), np.float32)
    for co in range(num_fm):
        for i in range(Ho):
            for j in range(Wo):
                n = (co * Ho + i) * Wo + j
                for dy in range(2):
                    RA[dy, 2 * i + dy, n] = 1.0
                    for dx in range(2):
                        RB[dy, 2 * j + dx, n] = w[co, 0, dy, dx] * scale
    brow = np.repeat(b, Ho * Wo).reshape(1, N)
    return RA, RB, brow


def _pack_slab(pieces, width):
    """Stack 2-D pieces along sublanes at 8-aligned row offsets, pad lanes to
    `width`.  Returns (slab, {name: (row_off, rows, cols)})."""
    offs, row = {}, 0
    for name, arr in pieces:
        r, c = arr.shape
        assert c <= width, (name, arr.shape, width)
        offs[name] = (row, r, c)
        row += -(-r // 8) * 8
    row = max(8, -(-row // 8) * 8)
    slab = np.zeros((row, width), np.float32)
    for name, arr in pieces:
        o, r, c = offs[name]
        slab[o:o + r, :c] = arr
    return slab, offs


def prepare_fused(params, *, num_factor, num_fm):
    """Fold every post-embedding layer into dense matmul weights + bias rows
    (batch-independent) and pack them into two lane-aligned constant slabs."""
    F, Fh = num_factor, num_factor // 2
    pieces = []

    # ----- SeNCF branch: input NCHW (B, 1, 2, F) -----
    W1, b1, H, W = _conv_as_dense(params['se_w1'], params['se_b1'],
                                  H=2, W=F, stride=2, pad=1, scale=BN_SCALE)
    # split by input row: rows 0..F-1 <-> user embedding, F..2F-1 <-> item.
    pieces += [('w1u', W1[:F]), ('w1i', W1[F:]), ('b1', b1)]
    W2, b2, H, W = _conv_as_dense(params['se_w2'], params['se_b2'],
                                  H=H, W=W, stride=1, pad=0, scale=BN_SCALE)
    pieces += [('w2', W2), ('b2', b2)]
    W3, b3, H, W = _conv_as_dense(params['se_w3'], params['se_b3'],
                                  H=H, W=W, stride=1, pad=0, scale=BN_SCALE)
    pieces += [('w3', W3), ('b3', b3)]

    # ----- ConvNCF branch: conv1 on the rank-1 outer product (rank-2 form) --
    RA, RB, bc0 = _convncf_layer0_rank2(params['cv_ws'][0], params['cv_bs'][0],
                                        F=F, num_fm=num_fm, scale=BN_SCALE)
    pieces += [('ra0', RA[0]), ('ra1', RA[1]),
               ('rb0', RB[0]), ('rb1', RB[1]), ('bc0', bc0)]
    n_cv = len(params['cv_ws'])
    H = W = Fh
    for l in range(1, n_cv):
        Wc, bc, H, W = _conv_as_dense(params['cv_ws'][l], params['cv_bs'][l],
                                      H=H, W=W, stride=2, pad=0, scale=BN_SCALE)
        pieces += [('wc%d' % l, Wc), ('bc%d' % l, bc)]

    # ----- predict Linear over concat((SeNCF flat, ConvNCF flat)) -----------
    # Lane-dense: only output column 0 carries the prediction.
    pw = np.asarray(params['pred_w'], np.float32)        # (1, Fh + num_fm)
    p_se = np.zeros((Fh, 128), np.float32)
    p_se[:, 0] = pw[0, :Fh]
    p_cv = np.zeros((num_fm, 128), np.float32)
    p_cv[:, 0] = pw[0, Fh:]
    p_b = np.zeros((1, 128), np.float32)
    p_b[0, 0] = float(np.asarray(params['pred_b'], np.float32)[0])
    pieces += [('p_se', p_se), ('p_cv', p_cv), ('p_b', p_b)]

    # ----- pack into a 128-wide slab + one wider slab for >128-col pieces ---
    wide = [(n, a) for n, a in pieces if a.shape[1] > 128]
    narrow = [(n, a) for n, a in pieces if a.shape[1] <= 128]
    wide_w = 128
    if wide:
        wide_w = -(-max(a.shape[1] for _, a in wide) // 128) * 128
    wide_slab, wide_off = _pack_slab(wide, wide_w)
    nar_slab, nar_off = _pack_slab(narrow, 128)

    layout = {}
    for name, (o, r, c) in wide_off.items():
        layout[name] = ('wide', o, r, c)
    for name, (o, r, c) in nar_off.items():
        layout[name] = ('nar', o, r, c)

    return {'wide': jnp.asarray(wide_slab), 'nar': jnp.asarray(nar_slab),
            'layout': layout, 'n_cv': n_cv}


# ------------------------------ fused kernel --------------------------------

def _full_spec(shape):
    nd = len(shape)
    return pl.BlockSpec(tuple(int(s) for s in shape), lambda i, nd=nd: (0,) * nd)


def _fused_forward_call(emb, prep):
    layout, n_cv = prep['layout'], prep['n_cv']
    B = emb.shape[0] // 4
    hi = jax.lax.Precision.HIGHEST

    def kernel(emb_ref, wide_ref, nar_ref, out_ref):
        refs = {'wide': wide_ref, 'nar': nar_ref}

        def ld(name):                       # free static Ref slice, then load
            which, off, rows, cols = layout[name]
            return refs[which][off:off + rows, 0:cols]

        def mm(a, b):
            return jnp.dot(a, b, precision=hi,
                           preferred_element_type=jnp.float32)

        eu1 = emb_ref[0 * B:1 * B, :]
        ei1 = emb_ref[1 * B:2 * B, :]
        eu2 = emb_ref[2 * B:3 * B, :]
        ei2 = emb_ref[3 * B:4 * B, :]

        # ----- SeNCF branch: 3 x (conv + BN + ReLU) as dense matmuls -------
        x = mm(eu1, ld('w1u')) + mm(ei1, ld('w1i')) + ld('b1')
        x = jnp.maximum(x, 0.0)                               # (B, fm*2*(F/2+1))
        x = jnp.maximum(mm(x, ld('w2')) + ld('b2'), 0.0)      # (B, fm*(F/2))
        x = jnp.maximum(mm(x, ld('w3')) + ld('b3'), 0.0)      # (B, F/2)

        # ----- ConvNCF branch -----------------------------------------------
        # conv1 applied to the rank-1 outer product via the dy-split form.
        y = (mm(eu2, ld('ra0')) * mm(ei2, ld('rb0'))
             + mm(eu2, ld('ra1')) * mm(ei2, ld('rb1')) + ld('bc0'))
        y = jnp.maximum(y, 0.0)                               # (B, fm*(F/2)^2)
        for l in range(1, n_cv):
            y = jnp.maximum(mm(y, ld('wc%d' % l)) + ld('bc%d' % l), 0.0)
        # y: (B, num_fm)

        # ----- concat + predict Linear; lane-dense (B, 128) output ---------
        out_ref[...] = mm(x, ld('p_se')) + mm(y, ld('p_cv')) + ld('p_b')

    operands = (emb, prep['wide'], prep['nar'])
    out = pl.pallas_call(
        kernel,
        out_shape=jax.ShapeDtypeStruct((B, 128), jnp.float32),
        grid=(1,),
        in_specs=[_full_spec(op.shape) for op in operands],
        out_specs=_full_spec((B, 128)),
        compiler_params=pltpu.CompilerParams(
            dimension_semantics=("arbitrary",)),
    )(*operands)
    return out[:, 0]


# ---------------------------- parameter init --------------------------------

def init_params(key, num_user, num_item, num_factor, num_fm):
    std = 0.01
    ks = jax.random.split(key, 12)
    p = {}
    p['emb_u1'] = std * jax.random.normal(ks[0], (num_user, num_factor), jnp.float32)
    p['emb_i1'] = std * jax.random.normal(ks[1], (num_item, num_factor), jnp.float32)
    p['emb_u2'] = std * jax.random.normal(ks[2], (num_user, num_factor), jnp.float32)
    p['emb_i2'] = std * jax.random.normal(ks[3], (num_item, num_factor), jnp.float32)
    # SeNCF convs (OIHW) + biases
    p['se_w1'] = std * jax.random.normal(ks[4], (num_fm, 1, 2, 2), jnp.float32)
    p['se_b1'] = std * jax.random.normal(ks[5], (num_fm,), jnp.float32)
    p['se_w2'] = std * jax.random.normal(ks[6], (num_fm, num_fm, 2, 2), jnp.float32)
    p['se_b2'] = std * jax.random.normal(ks[7], (num_fm,), jnp.float32)
    p['se_w3'] = std * jax.random.normal(ks[8], (1, num_fm, 1, 1), jnp.float32)
    p['se_b3'] = std * jax.random.normal(ks[9], (1,), jnp.float32)
    # ConvNCF: conv1 then convs until spatial size reaches 1 -> log2(num_factor)
    n_cv = int(math.log2(num_factor))
    kk = jax.random.split(ks[10], 2 * n_cv)
    cv_ws, cv_bs = [], []
    for l in range(n_cv):
        cin = 1 if l == 0 else num_fm
        cv_ws.append(std * jax.random.normal(kk[2 * l], (num_fm, cin, 2, 2), jnp.float32))
        cv_bs.append(std * jax.random.normal(kk[2 * l + 1], (num_fm,), jnp.float32))
    p['cv_ws'] = cv_ws
    p['cv_bs'] = cv_bs
    # predict layer: kaiming_uniform(a=1, sigmoid) -> gain=1, bound=sqrt(3/fan_in)
    fan_in = num_fm + num_factor // 2
    bound = math.sqrt(3.0 / fan_in)
    p['pred_w'] = jax.random.uniform(ks[11], (1, fan_in), jnp.float32, -bound, bound)
    p['pred_b'] = jnp.zeros((1,), jnp.float32)
    return p


# ------------------------------- forward ------------------------------------

def seconvncf_forward(params, prep, user, item):
    # Embedding gathers + one concat (pure data movement) stay in XLA; all
    # compute runs inside the single fused Pallas kernel.
    eu1 = jnp.take(params['emb_u1'], user, axis=0)
    ei1 = jnp.take(params['emb_i1'], item, axis=0)
    eu2 = jnp.take(params['emb_u2'], user, axis=0)
    ei2 = jnp.take(params['emb_i2'], item, axis=0)
    emb = jnp.concatenate([eu1, ei1, eu2, ei2], axis=0)   # (4B, F), single DMA
    return _fused_forward_call(emb, prep)


# --------------------------- pure-JAX reference ------------------------------

def _conv_ref(x, w_oihw, b, stride, padding):
    y = jax.lax.conv_general_dilated(
        x, jnp.transpose(w_oihw, (2, 3, 1, 0)),
        window_strides=(stride, stride),
        padding=[(padding, padding), (padding, padding)],
        dimension_numbers=('NHWC', 'HWIO', 'NHWC'),
        precision=jax.lax.Precision.HIGHEST)
    y = (y + b) / math.sqrt(1.0 + BN_EPS)
    return jnp.maximum(y, 0.0)


def reference_forward(params, user, item, num_factor):
    eu1 = params['emb_u1'][user]
    ei1 = params['emb_i1'][item]
    x = jnp.stack([eu1, ei1], axis=1)[..., None]
    x = _conv_ref(x, params['se_w1'], params['se_b1'], 2, 1)
    x = _conv_ref(x, params['se_w2'], params['se_b2'], 1, 0)
    x = _conv_ref(x, params['se_w3'], params['se_b3'], 1, 0)
    out_se = x.reshape(x.shape[0], -1)
    eu2 = params['emb_u2'][user]
    ei2 = params['emb_i2'][item]
    y = jnp.einsum('bi,bj->bij', eu2, ei2)[..., None]
    for w, b in zip(params['cv_ws'], params['cv_bs']):
        y = _conv_ref(y, w, b, 2, 0)
    out_cv = y.reshape(y.shape[0], -1)
    concat = jnp.concatenate([out_se, out_cv], axis=-1)
    return (concat @ params['pred_w'].T + params['pred_b']).reshape(-1)


# ---------------------------------- main -------------------------------------

if __name__ == "__main__":
    num_user, num_item = 50, 60
    num_factor, num_fm = 16, 8
    batch = 8

    key = jax.random.PRNGKey(0)
    pkey, ukey, ikey = jax.random.split(key, 3)
    params = init_params(pkey, num_user, num_item, num_factor, num_fm)
    prep = prepare_fused(params, num_factor=num_factor, num_fm=num_fm)

    user = jax.random.randint(ukey, (batch,), 0, num_user, dtype=jnp.int32)
    item = jax.random.randint(ikey, (batch,), 0, num_item, dtype=jnp.int32)

    fwd = jax.jit(lambda u, i: seconvncf_forward(params, prep, u, i))
    pred = jax.block_until_ready(fwd(user, item))

    ref = jax.block_until_ready(reference_forward(params, user, item, num_factor))

    assert pred.shape == (batch,), pred.shape
    # With precision=HIGHEST the observed error is ~1e-6 relative; tolerance is
    # kept loose only as a smoke-test margin.
    assert jnp.allclose(pred, ref, rtol=2e-2, atol=2e-5), (pred, ref)
    print("KERNEL_OK")
</pallas_src>

<mosaic_0001>
module attributes {stable_mosaic.version = 11 : i64} {
  func.func @kernel(%arg0: i32, %arg1: memref<32x16xf32, #tpu.memory_space<vmem>>, %arg2: memref<112x512xf32, #tpu.memory_space<vmem>>, %arg3: memref<944x128xf32, #tpu.memory_space<vmem>>, %arg4: memref<8x128xf32, #tpu.memory_space<vmem>>) attributes {dimension_semantics = [#tpu.dimension_semantics<arbitrary>], iteration_bounds = array<i64: 1>, scalar_prefetch = 0 : i64, scratch_operands = 0 : i64, tpu.core_type = #tpu.core_type<tc>, window_params = [{pipeline_mode = #tpu.pipeline_mode<synchronous>, transform_indices = @transform_0, window_bounds = array<i64: 32, 16>}, {pipeline_mode = #tpu.pipeline_mode<synchronous>, transform_indices = @transform_1, window_bounds = array<i64: 112, 512>}, {pipeline_mode = #tpu.pipeline_mode<synchronous>, transform_indices = @transform_2, window_bounds = array<i64: 944, 128>}, {pipeline_mode = #tpu.pipeline_mode<synchronous>, transform_indices = @transform_3, window_bounds = array<i64: 8, 128>}]} {
    %c0 = arith.constant 0 : index
    %c0_0 = arith.constant 0 : index
    %0 = vector.load %arg1[%c0, %c0_0] : memref<32x16xf32, #tpu.memory_space<vmem>>, vector<8x16xf32>
    %c8 = arith.constant 8 : index
    %c0_1 = arith.constant 0 : index
    %1 = vector.load %arg1[%c8, %c0_1] : memref<32x16xf32, #tpu.memory_space<vmem>>, vector<8x16xf32>
    %c16 = arith.constant 16 : index
    %c0_2 = arith.constant 0 : index
    %2 = vector.load %arg1[%c16, %c0_2] : memref<32x16xf32, #tpu.memory_space<vmem>>, vector<8x16xf32>
    %c24 = arith.constant 24 : index
    %c0_3 = arith.constant 0 : index
    %3 = vector.load %arg1[%c24, %c0_3] : memref<32x16xf32, #tpu.memory_space<vmem>>, vector<8x16xf32>
    %c0_4 = arith.constant 0 : index
    %c0_5 = arith.constant 0 : index
    %4 = vector.load %arg2[%c0_4, %c0_5] : memref<112x512xf32, #tpu.memory_space<vmem>>, vector<16x144xf32>
    %cst = arith.constant dense<0.000000e+00> : vector<8x144xf32>
    %5 = tpu.matmul %0, %4, %cst {dimension_numbers = #tpu.dot_dimension_numbers<[1], [0], [0], [1], [0, 0, 1, 1], [], []>, precision = #tpu.contract_precision<fp32>} : vector<8x16xf32>, vector<16x144xf32>, vector<8x144xf32> -> vector<8x144xf32>
    %c16_6 = arith.constant 16 : index
    %c0_7 = arith.constant 0 : index
    %6 = vector.load %arg2[%c16_6, %c0_7] : memref<112x512xf32, #tpu.memory_space<vmem>>, vector<16x144xf32>
    %cst_8 = arith.constant dense<0.000000e+00> : vector<8x144xf32>
    %7 = tpu.matmul %1, %6, %cst_8 {dimension_numbers = #tpu.dot_dimension_numbers<[1], [0], [0], [1], [0, 0, 1, 1], [], []>, precision = #tpu.contract_precision<fp32>} : vector<8x16xf32>, vector<16x144xf32>, vector<8x144xf32> -> vector<8x144xf32>
    %8 = arith.addf %5, %7 : vector<8x144xf32>
    %c32 = arith.constant 32 : index
    %c0_9 = arith.constant 0 : index
    %9 = vector.load %arg2[%c32, %c0_9] : memref<112x512xf32, #tpu.memory_space<vmem>>, vector<1x144xf32>
    %10 = vector.broadcast %9 : vector<1x144xf32> to vector<8x144xf32>
    %11 = arith.addf %8, %10 : vector<8x144xf32>
    %cst_10 = arith.constant 0.000000e+00 : f32
    %12 = vector.broadcast %cst_10 : f32 to vector<8x144xf32>
    %13 = arith.maximumf %11, %12 : vector<8x144xf32>
    %c0_11 = arith.constant 0 : index
    %c0_12 = arith.constant 0 : index
    %14 = vector.load %arg3[%c0_11, %c0_12] : memref<944x128xf32, #tpu.memory_space<vmem>>, vector<144x64xf32>
    %cst_13 = arith.constant dense<0.000000e+00> : vector<8x64xf32>
    %15 = tpu.matmul %13, %14, %cst_13 {dimension_numbers = #tpu.dot_dimension_numbers<[1], [0], [0], [1], [0, 0, 1, 1], [], []>, precision = #tpu.contract_precision<fp32>} : vector<8x144xf32>, vector<144x64xf32>, vector<8x64xf32> -> vector<8x64xf32>
    %c144 = arith.constant 144 : index
    %c0_14 = arith.constant 0 : index
    %16 = vector.load %arg3[%c144, %c0_14] : memref<944x128xf32, #tpu.memory_space<vmem>>, vector<1x64xf32>
    %17 = vector.broadcast %16 : vector<1x64xf32> to vector<8x64xf32>
    %18 = arith.addf %15, %17 : vector<8x64xf32>
    %cst_15 = arith.constant 0.000000e+00 : f32
    %19 = vector.broadcast %cst_15 : f32 to vector<8x64xf32>
    %20 = arith.maximumf %18, %19 : vector<8x64xf32>
    %c152 = arith.constant 152 : index
    %c0_16 = arith.constant 0 : index
    %21 = vector.load %arg3[%c152, %c0_16] : memref<944x128xf32, #tpu.memory_space<vmem>>, vector<64x8xf32>
    %cst_17 = arith.constant dense<0.000000e+00> : vector<8x8xf32>
    %22 = tpu.matmul %20, %21, %cst_17 {dimension_numbers = #tpu.dot_dimension_numbers<[1], [0], [0], [1], [0, 0, 1, 1], [], []>, precision = #tpu.contract_precision<fp32>} : vector<8x64xf32>, vector<64x8xf32>, vector<8x8xf32> -> vector<8x8xf32>
    %c216 = arith.constant 216 : index
    %c0_18 = arith.constant 0 : index
    %23 = vector.load %arg3[%c216, %c0_18] : memref<944x128xf32, #tpu.memory_space<vmem>>, vector<1x8xf32>
    %24 = vector.broadcast %23 : vector<1x8xf32> to vector<8x8xf32>
    %25 = arith.addf %22, %24 : vector<8x8xf32>
    %cst_19 = arith.constant 0.000000e+00 : f32
    %26 = vector.broadcast %cst_19 : f32 to vector<8x8xf32>
    %27 = arith.maximumf %25, %26 : vector<8x8xf32>
    %c40 = arith.constant 40 : index
    %c0_20 = arith.constant 0 : index
    %28 = vector.load %arg2[%c40, %c0_20] : memref<112x512xf32, #tpu.memory_space<vmem>>, vector<16x512xf32>
    %cst_21 = arith.constant dense<0.000000e+00> : vector<8x512xf32>
    %29 = tpu.matmul %2, %28, %cst_21 {dimension_numbers = #tpu.dot_dimension_numbers<[1], [0], [0], [1], [0, 0, 1, 1], [], []>, precision = #tpu.contract_precision<fp32>} : vector<8x16xf32>, vector<16x512xf32>, vector<8x512xf32> -> vector<8x512xf32>
    %c72 = arith.constant 72 : index
    %c0_22 = arith.constant 0 : index
    %30 = vector.load %arg2[%c72, %c0_22] : memref<112x512xf32, #tpu.memory_space<vmem>>, vector<16x512xf32>
    %cst_23 = arith.constant dense<0.000000e+00> : vector<8x512xf32>
    %31 = tpu.matmul %3, %30, %cst_23 {dimension_numbers = #tpu.dot_dimension_numbers<[1], [0], [0], [1], [0, 0, 1, 1], [], []>, precision = #tpu.contract_precision<fp32>} : vector<8x16xf32>, vector<16x512xf32>, vector<8x512xf32> -> vector<8x512xf32>
    %32 = arith.mulf %29, %31 : vector<8x512xf32>
    %c56 = arith.constant 56 : index
    %c0_24 = arith.constant 0 : index
    %33 = vector.load %arg2[%c56, %c0_24] : memref<112x512xf32, #tpu.memory_space<vmem>>, vector<16x512xf32>
    %cst_25 = arith.constant dense<0.000000e+00> : vector<8x512xf32>
    %34 = tpu.matmul %2, %33, %cst_25 {dimension_numbers = #tpu.dot_dimension_numbers<[1], [0], [0], [1], [0, 0, 1, 1], [], []>, precision = #tpu.contract_precision<fp32>} : vector<8x16xf32>, vector<16x512xf32>, vector<8x512xf32> -> vector<8x512xf32>
    %c88 = arith.constant 88 : index
    %c0_26 = arith.constant 0 : index
    %35 = vector.load %arg2[%c88, %c0_26] : memref<112x512xf32, #tpu.memory_space<vmem>>, vector<16x512xf32>
    %cst_27 = arith.constant dense<0.000000e+00> : vector<8x512xf32>
    %36 = tpu.matmul %3, %35, %cst_27 {dimension_numbers = #tpu.dot_dimension_numbers<[1], [0], [0], [1], [0, 0, 1, 1], [], []>, precision = #tpu.contract_precision<fp32>} : vector<8x16xf32>, vector<16x512xf32>, vector<8x512xf32> -> vector<8x512xf32>
    %37 = arith.mulf %34, %36 : vector<8x512xf32>
    %38 = arith.addf %32, %37 : vector<8x512xf32>
    %c104 = arith.constant 104 : index
    %c0_28 = arith.constant 0 : index
    %39 = vector.load %arg2[%c104, %c0_28] : memref<112x512xf32, #tpu.memory_space<vmem>>, vector<1x512xf32>
    %40 = vector.broadcast %39 : vector<1x512xf32> to vector<8x512xf32>
    %41 = arith.addf %38, %40 : vector<8x512xf32>
    %cst_29 = arith.constant 0.000000e+00 : f32
    %42 = vector.broadcast %cst_29 : f32 to vector<8x512xf32>
    %43 = arith.maximumf %41, %42 : vector<8x512xf32>
    %c224 = arith.constant 224 : index
    %c0_30 = arith.constant 0 : index
    %44 = vector.load %arg3[%c224, %c0_30] : memref<944x128xf32, #tpu.memory_space<vmem>>, vector<512x128xf32>
    %cst_31 = arith.constant dense<0.000000e+00> : vector<8x128xf32>
    %45 = tpu.matmul %43, %44, %cst_31 {dimension_numbers = #tpu.dot_dimension_numbers<[1], [0], [0], [1], [0, 0, 1, 1], [], []>, precision = #tpu.contract_precision<fp32>} : vector<8x512xf32>, vector<512x128xf32>, vector<8x128xf32> -> vector<8x128xf32>
    %c736 = arith.constant 736 : index
    %c0_32 = arith.constant 0 : index
    %46 = vector.load %arg3[%c736, %c0_32] : memref<944x128xf32, #tpu.memory_space<vmem>>, vector<1x128xf32>
    %47 = vector.broadcast %46 : vector<1x128xf32> to vector<8x128xf32>
    %48 = arith.addf %45, %47 : vector<8x128xf32>
    %cst_33 = arith.constant 0.000000e+00 : f32
    %49 = vector.broadcast %cst_33 : f32 to vector<8x128xf32>
    %50 = arith.maximumf %48, %49 : vector<8x128xf32>
    %c744 = arith.constant 744 : index
    %c0_34 = arith.constant 0 : index
    %51 = vector.load %arg3[%c744, %c0_34] : memref<944x128xf32, #tpu.memory_space<vmem>>, vector<128x32xf32>
    %cst_35 = arith.constant dense<0.000000e+00> : vector<8x32xf32>
    %52 = tpu.matmul %50, %51, %cst_35 {dimension_numbers = #tpu.dot_dimension_numbers<[1], [0], [0], [1], [0, 0, 1, 1], [], []>, precision = #tpu.contract_precision<fp32>} : vector<8x128xf32>, vector<128x32xf32>, vector<8x32xf32> -> vector<8x32xf32>
    %c872 = arith.constant 872 : index
    %c0_36 = arith.constant 0 : index
    %53 = vector.load %arg3[%c872, %c0_36] : memref<944x128xf32, #tpu.memory_space<vmem>>, vector<1x32xf32>
    %54 = vector.broadcast %53 : vector<1x32xf32> to vector<8x32xf32>
    %55 = arith.addf %52, %54 : vector<8x32xf32>
    %cst_37 = arith.constant 0.000000e+00 : f32
    %56 = vector.broadcast %cst_37 : f32 to vector<8x32xf32>
    %57 = arith.maximumf %55, %56 : vector<8x32xf32>
    %c880 = arith.constant 880 : index
    %c0_38 = arith.constant 0 : index
    %58 = vector.load %arg3[%c880, %c0_38] : memref<944x128xf32, #tpu.memory_space<vmem>>, vector<32x8xf32>
    %cst_39 = arith.constant dense<0.000000e+00> : vector<8x8xf32>
    %59 = tpu.matmul %57, %58, %cst_39 {dimension_numbers = #tpu.dot_dimension_numbers<[1], [0], [0], [1], [0, 0, 1, 1], [], []>, precision = #tpu.contract_precision<fp32>} : vector<8x32xf32>, vector<32x8xf32>, vector<8x8xf32> -> vector<8x8xf32>
    %c912 = arith.constant 912 : index
    %c0_40 = arith.constant 0 : index
    %60 = vector.load %arg3[%c912, %c0_40] : memref<944x128xf32, #tpu.memory_space<vmem>>, vector<1x8xf32>
    %61 = vector.broadcast %60 : vector<1x8xf32> to vector<8x8xf32>
    %62 = arith.addf %59, %61 : vector<8x8xf32>
    %cst_41 = arith.constant 0.000000e+00 : f32
    %63 = vector.broadcast %cst_41 : f32 to vector<8x8xf32>
    %64 = arith.maximumf %62, %63 : vector<8x8xf32>
    %c920 = arith.constant 920 : index
    %c0_42 = arith.constant 0 : index
    %65 = vector.load %arg3[%c920, %c0_42] : memref<944x128xf32, #tpu.memory_space<vmem>>, vector<8x128xf32>
    %cst_43 = arith.constant dense<0.000000e+00> : vector<8x128xf32>
    %66 = tpu.matmul %27, %65, %cst_43 {dimension_numbers = #tpu.dot_dimension_numbers<[1], [0], [0], [1], [0, 0, 1, 1], [], []>, precision = #tpu.contract_precision<fp32>} : vector<8x8xf32>, vector<8x128xf32>, vector<8x128xf32> -> vector<8x128xf32>
    %c928 = arith.constant 928 : index
    %c0_44 = arith.constant 0 : index
    %67 = vector.load %arg3[%c928, %c0_44] : memref<944x128xf32, #tpu.memory_space<vmem>>, vector<8x128xf32>
    %cst_45 = arith.constant dense<0.000000e+00> : vector<8x128xf32>
    %68 = tpu.matmul %64, %67, %cst_45 {dimension_numbers = #tpu.dot_dimension_numbers<[1], [0], [0], [1], [0, 0, 1, 1], [], []>, precision = #tpu.contract_precision<fp32>} : vector<8x8xf32>, vector<8x128xf32>, vector<8x128xf32> -> vector<8x128xf32>
    %69 = arith.addf %66, %68 : vector<8x128xf32>
    %c936 = arith.constant 936 : index
    %c0_46 = arith.constant 0 : index
    %70 = vector.load %arg3[%c936, %c0_46] : memref<944x128xf32, #tpu.memory_space<vmem>>, vector<1x128xf32>
    %71 = vector.broadcast %70 : vector<1x128xf32> to vector<8x128xf32>
    %72 = arith.addf %69, %71 : vector<8x128xf32>
    %c0_47 = arith.constant 0 : index
    %c0_48 = arith.constant 0 : index
    %73 = vector.load %arg4[%c0_47, %c0_48] : memref<8x128xf32, #tpu.memory_space<vmem>>, vector<8x128xf32>
    tpu.vector_store %arg4[%c0_47, %c0_48], %72 {strides = array<i32>} : memref<8x128xf32, #tpu.memory_space<vmem>>, vector<8x128xf32>,
    return
  }
  func.func @transform_0(%arg0: i32) -> (i32, i32) {
    %c0_i32 = arith.constant 0 : i32
    %c0_i32_0 = arith.constant 0 : i32
    %c0_i32_1 = arith.constant 0 : i32
    return %c0_i32, %c0_i32_0 : i32, i32
  }
  func.func @transform_1(%arg0: i32) -> (i32, i32) {
    %c0_i32 = arith.constant 0 : i32
    %c0_i32_0 = arith.constant 0 : i32
    %c0_i32_1 = arith.constant 0 : i32
    return %c0_i32, %c0_i32_0 : i32, i32
  }
  func.func @transform_2(%arg0: i32) -> (i32, i32) {
    %c0_i32 = arith.constant 0 : i32
    %c0_i32_0 = arith.constant 0 : i32
    %c0_i32_1 = arith.constant 0 : i32
    return %c0_i32, %c0_i32_0 : i32, i32
  }
  func.func @transform_3(%arg0: i32) -> (i32, i32) {
    %c0_i32 = arith.constant 0 : i32
    %c0_i32_0 = arith.constant 0 : i32
    %c0_i32_1 = arith.constant 0 : i32
    return %c0_i32, %c0_i32_0 : i32, i32
  }
}

</mosaic_0001>

<bundles_post_ra>
// kernel: _lambda_.1
= control target key start
LH: loop header
LB: loop body
LE: loop exit
PB: predicated region body
PF: predicated region fallthrough
CT: control target
= control target key end

     0   :  { %8 = vsyncpa [#allocation3], 0  ;;  %s12487_s12 = smov [#allocation2]   ;;  %s15147_s0 = inlined_call_operand.vmem [shape: f32[32,16], index: 0, kind: input, shape index: {}]   ;;  %s15148_s1 = inlined_call_operand.vmem [shape: f32[112,512], index: 1, kind: input, shape index: {}]   ;;  %s15149_s2 = inlined_call_operand.hbm [shape: f32[944,128], index: 2, kind: input, shape index: {}]   ;;  %s15150_s3 = inlined_call_operand.vmem [shape: f32[8,128], index: 3, kind: output, shape index: {}]  }
   0x1   :  { %s18_s13 = sshll.u32 %s12487_s12, 4  ;;  %s12463_s16 = scalar_lea.hbm %s15149_s2, 15104  ;;  %s19_s13 = int_to_ptr.vmem [resolvable:$true] %s18_s13 }
   0x2   :  { %p12464_p0 = scmp.ne.s32.totalorder %s15149_s2, %s12463_s16  ;;  %p12467_p1 = scmp.lt.u32.totalorder %s12463_s16, %s15149_s2 }
   0x4   :  { %p12469_p2 = pnand %p12467_p1, %p12464_p0 }
   0x6   :  { %12472 = shalt.err (!%p12469_p2)
}
   0x7   :  { %s12473_s21 = scalar_lea.vmem %s19_s13, 15104  ;;  %p12478_p4 = scmp.lt.s32.totalorder %s19_s13, %s19_s13 }
   0x8   :  { %p12474_p3 = scmp.ne.s32.totalorder %s19_s13, %s12473_s21  ;;  %p12479_p5 = scmp.lt.s32.totalorder %s12473_s21, %s12473_s21 }
   0xa   :  { %p12480_p6 = por %p12479_p5, %p12478_p4 }
   0xc   :  { %p12481_p7 = pnand %p12480_p6, %p12474_p3 }
   0xe   :  { %12484 = shalt.err (!%p12481_p7)
}
   0xf   :  { %s12488_s22 = smov 128   ;;  %s12489_s23 = smov 8  }
  0x10   :  { %24 = dma.hbm_to_vmem [thread:$0]  %s15149_s2, 15104, %s19_s13, [#allocation3], %s12488_s22, %s12488_s22, %s12489_s23  }
  0x11   :  { %12485 = dma.done.wait [#allocation3], 15104  }
  0x12   :  { %12486 = vsyncadd [#allocation3], 4294952192  ;;  %v15184_v0 = vmov 0.0   ;;  %v15160_v1 = vmov 0.0|0.0   ;;  %vm40_vm0 = vcmask 130048   ;;  %v37_v2 = vld [vmem:[%s15148_s1 + $0x48] sm:$0xff] }
  0x13   :  { %112 = vmatprep.mubr.f32.mxu0 %v15184_v0  ;;  %11349 = vmatprep.subr.bf16.mxu1 %v15160_v1  ;;  %v39_v3 = vld [vmem:[%s15148_s1 + $0x68] sm:$0xff]  ;;  %v36_v4 = vld [vmem:[%s15148_s1 + $0x40] sm:$0xff]  ;;  %v44_v5 = vand.u32 4294901760, %v37_v2  ;;  %v1048_v43 = vld [vmem:[#allocation2 + $0x10] sm:$0xff]  ;;  %vm12492_vm1 = vmmov 0   ;;  %vm1766_vm2 = vcmask 523264  }
  0x14   :  { %v48_v6 = vand.u32 4294901760, %v39_v3  ;;  %v38_v7 = vld [vmem:[%s15148_s1 + $0x60] sm:$0xff]  ;;  %v46_v8 = vand.u32 4294901760, %v36_v4  ;;  %v29_v9 = vld [vmem:[%s15147_s0 + $0x8] sm:$0xff]  ;;  %v1049_v44 = vld [vmem:[#allocation2 + $0x18] sm:$0xff]  ;;  %v1079_v52 = vand.u32 4294901760, %v1048_v43 }
  0x15   :  { %v50_v10 = vand.u32 4294901760, %v38_v7  ;;  %v42_v11 = vsel %vm40_vm0, %v29_v9, 0  ;;  %v125_v13 = vsub.f32 %v37_v2, %v44_v5  ;;  %v1046_v35 = vld [vmem:[#allocation2] sm:$0xff]  ;;  %v1047_v39 = vld [vmem:[#allocation2 + $0x8] sm:$0xff]  ;;  %v1082_v53 = vand.u32 4294901760, %v1049_v44  ;;  %v12585_v59 = vld [vmem:[#allocation2 + $0x30] sm:$0xff] }
  0x16   :  { %v12543_v12 = vpack.c.bf16 %v48_v6, %v44_v5  ;;  %v137_v14 = vsub.f32 %v39_v3, %v48_v6  ;;  %v131_v15 = vsub.f32 %v36_v4, %v46_v8  ;;  %v12547_v18 = vand.u32 4294901760, %v42_v11  ;;  %v12561_v45 = vld [vmem:[#allocation2 + $0x20] sm:$0xff]  ;;  %v12566_v47 = vld [vmem:[%s15148_s1 + $0x8] sm:$0xff]  ;;  %v1053_v2 = vld [vmem:[#allocation2 + $0x38] sm:$0xff] }
  0x17   :  { %v12545_v16 = vpack.c.bf16 %v50_v10, %v46_v8  ;;  %v143_v17 = vsub.f32 %v38_v7, %v50_v10  ;;  %v126_v19 = vand.u32 4294901760, %v125_v13  ;;  %v1073_v40 = vand.u32 4294901760, %v1046_v35  ;;  %v12571_v48 = vld [vmem:[%s15148_s1 + $0x28] sm:$0xff] }
  0x18   :  { %11275 = vmatprep.subr.bf16.mxu0 %v12543_v12  ;;  %v138_v20 = vand.u32 4294901760, %v137_v14  ;;  %v132_v21 = vand.u32 4294901760, %v131_v15  ;;  %v12552_v22 = vsub.f32 %v42_v11, %v12547_v18  ;;  %v11282_v38 = vpack.c.bf16 %v137_v14, %v125_v13  ;;  %v1051_v54 = vld [vmem:[#allocation2 + $0x28] sm:$0xff] }
  0x19   :  { %11277 = vmatpush1.bf16.msra.mxu0 %v12545_v16  ;;  %v144_v23 = vand.u32 4294901760, %v143_v17  ;;  %v127_v24 = vsub.f32 %v125_v13, %v126_v19  ;;  %v1076_v41 = vand.u32 4294901760, %v1047_v39  ;;  %v12559_v42 = vsub.f32 %v1046_v35, %v1073_v40 }
  0x1a   :  { %v139_v25 = vsub.f32 %v137_v14, %v138_v20  ;;  %v133_v26 = vsub.f32 %v131_v15, %v132_v21  ;;  %v115_v27 = vand.u32 4294901760, %v12552_v22  ;;  %v11284_v46 = vpack.c.bf16 %v143_v17, %v131_v15 }
  0x1b   :  { %v145_v28 = vsub.f32 %v143_v17, %v144_v23  ;;  %v128_v29 = vand.u32 4294901760, %v127_v24  ;;  %v1173_v49 = vand.u32 4294901760, %v12559_v42  ;;  %v12574_v50 = vsub.f32 %v1047_v39, %v1076_v41  ;;  %v1054_v17 = vld [vmem:[#allocation2 + $0x40] sm:$0xff]  ;;  %v1055_v24 = vld [vmem:[#allocation2 + $0x48] sm:$0xff]  ;;  %v12634_v39 = vld [vmem:[#allocation2 + $0x58] sm:$0xff] }
  0x1c   :  { %v140_v30 = vand.u32 4294901760, %v139_v25  ;;  %v134_v31 = vand.u32 4294901760, %v133_v26  ;;  %v116_v32 = vsub.f32 %v12552_v22, %v115_v27  ;;  %v12576_v51 = vpack.c.bf16 %v138_v20, %v126_v19 }
  0x1d   :  { %v146_v33 = vand.u32 4294901760, %v145_v28  ;;  %v12578_v55 = vpack.c.bf16 %v144_v23, %v132_v21  ;;  %v1174_v56 = vsub.f32 %v12559_v42, %v1173_v49  ;;  %v1180_v57 = vand.u32 4294901760, %v12574_v50 }
  0x1e   :  { %v11278_v34 = vpack.c.bf16 %v140_v30, %v128_v29  ;;  %v117_v36 = vand.u32 4294901760, %v116_v32  ;;  %v1085_v58 = vand.u32 4294901760, %v12561_v45  ;;  %v538_v60 = vand.u32 4294901760, %v12566_v47  ;;  %v12627_v30 = vld [vmem:[#allocation2 + $0x50] sm:$0xff] }
  0x1f   :  { %v11280_v37 = vpack.c.bf16 %v146_v33, %v134_v31  ;;  %v542_v61 = vand.u32 4294901760, %v12571_v48  ;;  %v12590_v62 = vsub.f32 %v1048_v43, %v1079_v52  ;;  %v12592_v63 = vsub.f32 %v1049_v44, %v1082_v53 }
  0x20   :  { %11279 = vmatprep.subr.bf16.mxu0 %v11278_v34  ;;  %118 = vmatmul.mubr.f32.vlgmr.msra.gmra.mrb[0].mxu0 %v117_v36  ;;  %v1175_v3 = vand.u32 4294901760, %v1174_v56  ;;  %v1181_v4 = vsub.f32 %v12574_v50, %v1180_v57  ;;  %v1088_v5 = vand.u32 4294901760, %v1051_v54  ;;  %v12599_v6 = vsub.f32 %v12561_v45, %v1085_v58 }
  0x21   :  { %11281 = vmatpush1.bf16.msra.mxu0 %v11280_v37  ;;  %208 = vmatprep.mubr.f32.mxu0 %v15184_v0  ;;  %v1187_v7 = vand.u32 4294901760, %v12590_v62  ;;  %v1194_v8 = vand.u32 4294901760, %v12592_v63  ;;  %v12604_v9 = vpack.c.bf16 %v1076_v41, %v1073_v40  ;;  %v1091_v10 = vand.u32 4294901760, %v12585_v59 }
  0x22   :  { %11283 = vmatprep.subr.bf16.mxu0 %v11282_v38  ;;  %v1182_v11 = vand.u32 4294901760, %v1181_v4  ;;  %v1201_v13 = vand.u32 4294901760, %v12599_v6  ;;  %v12608_v14 = vsub.f32 %v1051_v54, %v1088_v5  ;;  %v1094_v15 = vand.u32 4294901760, %v1053_v2  ;;  %v12653_v54 = vld [vmem:[#allocation2 + $0x60] sm:$0xff]  ;;  %v12663_v4 = vld [vmem:[#allocation2 + $0x68] sm:$0xff] }
  0x23   :  { %v1188_v19 = vsub.f32 %v12590_v62, %v1187_v7  ;;  %v1195_v20 = vsub.f32 %v12592_v63, %v1194_v8  ;;  %v12617_v21 = vsub.f32 %v12585_v59, %v1091_v10  ;;  %v12619_v23 = vpack.c.bf16 %v1082_v53, %v1079_v52 }
  0x24   :  { %v11350_v25 = vpack.c.bf16 %v1182_v11, %v1175_v3  ;;  %v1202_v26 = vsub.f32 %v12599_v6, %v1201_v13  ;;  %v15157_v28 = vand.u32 4294901760, %v12608_v14  ;;  %v12625_v29 = vsub.f32 %v1053_v2, %v1094_v15 }
  0x25   :  { %v1189_v31 = vand.u32 4294901760, %v1188_v19  ;;  %v1196_v32 = vand.u32 4294901760, %v1195_v20  ;;  %v15156_v33 = vand.u32 4294901760, %v12617_v21  ;;  %v1097_v34 = vand.u32 4294901760, %v1054_v17 }
  0x26   :  { %11351 = vmatpush1.bf16.msra.mxu1 %v11350_v25  ;;  %v1203_v35 = vand.u32 4294901760, %v1202_v26  ;;  %v1209_v36 = vsub.f32 %v12608_v14, %v15157_v28  ;;  %v15155_v37 = vand.u32 4294901760, %v12625_v29  ;;  %v1100_v38 = vand.u32 4294901760, %v1055_v24 }
  0x27   :  { %11352 = vmatprep.subr.bf16.mxu1 %v15160_v1  ;;  %v11353_v40 = vpack.c.bf16 %v1196_v32, %v1189_v31  ;;  %v1216_v41 = vsub.f32 %v12617_v21, %v15156_v33  ;;  %v12641_v43 = vsub.f32 %v1054_v17, %v1097_v34  ;;  %v1103_v44 = vand.u32 4294901760, %v12627_v30  ;;  %v32_v32 = vld [vmem:[%s15148_s1] sm:$0xff] }
  0x28   :  { %210 = vmatmul.mubr.f32.vlgmr.msra.gmra.mrb[0].mxu0 %v12547_v18  ;;  %v1210_v45 = vand.u32 4294901760, %v1209_v36  ;;  %v12649_v52 = vsub.f32 %v1055_v24, %v1100_v38  ;;  %v12651_v53 = vpack.c.bf16 %v1088_v5, %v1085_v58  ;;  %v1106_v2 = vand.u32 4294901760, %v12634_v39  ;;  %v28_v36 = vld [vmem:[%s15147_s0] sm:$0xff] }
  0x29   :  { %11285 = vmatpush1.bf16.msra.mxu0 %v11284_v46  ;;  %288 = vmatprep.mubr.f32.mxu0 %v15184_v0  ;;  %v1223_v46 = vsub.f32 %v12625_v29, %v15155_v37  ;;  %v1217_v56 = vand.u32 4294901760, %v1216_v41  ;;  %v15153_v59 = vand.u32 4294901760, %v12641_v43  ;;  %v12661_v3 = vsub.f32 %v12627_v30, %v1103_v44 }
  0x2a   :  { %11287 = vmatprep.subr.bf16.mxu0 %v12543_v12  ;;  %11354 = vmatpush1.bf16.msra.mxu1 %v11353_v40  ;;  %v11356_v11 = vpack.c.bf16 %v1210_v45, %v1203_v35  ;;  %v15151_v5 = vand.u32 4294901760, %v12649_v52  ;;  %v12666_v17 = vpack.c.bf16 %v1094_v15, %v1091_v10  ;;  %v12676_v20 = vsub.f32 %v12634_v39, %v1106_v2  ;;  %v34_v35 = vld [vmem:[%s15148_s1 + $0x20] sm:$0xff] }
  0x2b   :  { %v1224_v58 = vand.u32 4294901760, %v1223_v46  ;;  %11355 = vmatprep.subr.bf16.mxu1 %v15160_v1  ;;  %v15152_v19 = vand.u32 4294901760, %v12661_v3  ;;  %v1109_v24 = vand.u32 4294901760, %v12653_v54  ;;  %v12682_v10 = vsub.f32 %v12566_v47, %v538_v60 }
  0x2c   :  { %v1237_v15 = vsub.f32 %v12649_v52, %v15151_v5  ;;  %v1112_v25 = vand.u32 4294901760, %v12663_v4  ;;  %v12688_v26 = vpack.c.bf16 %v1100_v38, %v1097_v34  ;;  %v12693_v31 = vsub.f32 %v12571_v48, %v542_v61 }
  0x2d   :  { %v1244_v34 = vsub.f32 %v12661_v3, %v15152_v19  ;;  %v15154_v38 = vand.u32 4294901760, %v12676_v20  ;;  %v12711_v40 = vsub.f32 %v12653_v54, %v1109_v24  ;;  %v11359_v41 = vpack.c.bf16 %v1224_v58, %v1217_v56 }
  0x2e   :  { %11357 = vmatpush1.bf16.msra.mxu1 %v11356_v11  ;;  %v1238_v46 = vand.u32 4294901760, %v1237_v15  ;;  %v12716_v5 = vsub.f32 %v12663_v4, %v1112_v25  ;;  %v540_v56 = vand.u32 4294901760, %v32_v32  ;;  %v544_v11 = vand.u32 4294901760, %v34_v35 }
  0x2f   :  { %11358 = vmatprep.subr.bf16.mxu1 %v15160_v1  ;;  %v1251_v19 = vsub.f32 %v12676_v20, %v15154_v38  ;;  %v536_v58 = vsel %vm40_vm0, %v28_v36, 0  ;;  %v1245_v15 = vand.u32 4294901760, %v1244_v34  ;;  %v11298_v34 = vpack.c.bf16 %v542_v61, %v538_v60 }
  0x30   :  { %291 = vmatmul.mubr.f32.vlgmr.msra.gmra.mrb[0].mxu0 %v12552_v22  ;;  %v620_v22 = vand.u32 4294901760, %v12682_v10  ;;  %v12738_v33 = vand.u32 4294901760, %v536_v58  ;;  %v637_v28 = vsub.f32 %v34_v35, %v544_v11  ;;  %v11300_v35 = vpack.c.bf16 %v544_v11, %v540_v56 }
  0x31   :  { %11289 = vmatpush1.bf16.msra.mxu0 %v12545_v16  ;;  %365 = vmatprep.mubr.f32.mxu0 %v15184_v0  ;;  %v1252_v37 = vand.u32 4294901760, %v1251_v19  ;;  %v12814_v39 = vpack.c.bf16 %v1112_v25, %v1109_v24  ;;  %v1032_v24 = vlaneseq  ;;  %vm8783_vm3 = vcmask 261120  }
  0x32   :  { %11291 = vmatprep.subr.bf16.mxu0 %v12576_v51  ;;  %v1230_v51 = vsub.f32 %v12641_v43, %v15153_v59  ;;  %v15158_v59 = vand.u32 4294901760, %v12711_v40  ;;  %11360 = vmatpush1.bf16.msra.mxu1 %v11359_v41  ;;  %v621_v19 = vsub.f32 %v12682_v10, %v620_v22  ;;  %v638_v48 = vand.u32 4294901760, %v637_v28 }
  0x33   :  { %11361 = vmatprep.subr.bf16.mxu1 %v15160_v1  ;;  %v12831_v25 = vshrl.u32 %v1032_v24, 7  ;;  %vm9275_vm4 = vcmask 64512  }
  0x34   :  { %v1231_v45 = vand.u32 4294901760, %v1230_v51  ;;  %v15159_v51 = vand.u32 4294901760, %v12716_v5  ;;  %v622_v60 = vand.u32 4294901760, %v621_v19 }
  0x35   :  { %15372 = vst [vmem:[#allocation5_spill] sm:$0xff] %v12831_v25 }
  0x36   :  { %v11362_v38 = vpack.c.bf16 %v1238_v46, %v1231_v45  ;;  %v1265_v36 = vsub.f32 %v12716_v5, %v15159_v51  ;;  %v11365_v45 = vpack.c.bf16 %v1252_v37, %v1245_v15  ;;  %v608_v51 = vsub.f32 %v536_v58, %v12738_v33 }
  0x37   :  { %v639_v15 = vsub.f32 %v637_v28, %v638_v48 }
  0x38   :  { %369 = vmatmul.mubr.f32.vlgmr.msra.gmra.mrb[0].mxu0 %v115_v27  ;;  %v632_v27 = vand.u32 4294901760, %v12693_v31  ;;  %11363 = vmatpush1.bf16.msra.mxu1 %v11362_v38  ;;  %v609_v37 = vand.u32 4294901760, %v608_v51 }
  0x39   :  { %11293 = vmatpush1.bf16.msra.mxu0 %v12578_v55  ;;  %451 = vmatprep.mubr.f32.mxu0 %v15184_v0  ;;  %v1258_v55 = vsub.f32 %v12711_v40, %v15158_v59  ;;  %v1266_v59 = vand.u32 4294901760, %v1265_v36  ;;  %v640_v36 = vand.u32 4294901760, %v639_v15 }
  0x3a   :  { %11295 = vmatprep.subr.bf16.mxu0 %v12543_v12  ;;  %v625_v12 = vsub.f32 %v32_v32, %v540_v56  ;;  %v633_v41 = vsub.f32 %v12693_v31, %v632_v27  ;;  %11364 = vmatprep.subr.bf16.mxu1 %v15160_v1  ;;  %v11306_v56 = vpack.c.bf16 %v12693_v31, %v12682_v10 }
  0x3b   :  { %v1259_v46 = vand.u32 4294901760, %v1258_v55  ;;  %v11314_v11 = vpack.c.bf16 %v632_v27, %v620_v22  ;;  %v1062_v27 = vld [vmem:[#allocation2 + $0x80] sm:$0xff] }
  0x3c   :  { %v626_v47 = vand.u32 4294901760, %v625_v12  ;;  %v634_v61 = vand.u32 4294901760, %v633_v41  ;;  %11366 = vmatpush1.bf16.msra.mxu1 %v11365_v45 }
  0x3d   :  { %v11368_v32 = vpack.c.bf16 %v1266_v59, %v1259_v46  ;;  %11367 = vmatprep.subr.bf16.mxu1 %v15160_v1  ;;  %v1121_v46 = vand.u32 4294901760, %v1062_v27 }
  0x3e   :  { %v627_v38 = vsub.f32 %v625_v12, %v626_v47  ;;  %v11302_v58 = vpack.c.bf16 %v634_v61, %v622_v60  ;;  %v11316_v41 = vpack.c.bf16 %v638_v48, %v626_v47 }
  0x3f   :  { %v12789_v61 = vsub.f32 %v1062_v27, %v1121_v46 }
  0x40   :  { %453 = vmatmul.mubr.f32.vlgmr.msra.gmra.mrb[0].mxu0 %v12547_v18  ;;  %11369 = vmatpush1.bf16.msra.mxu1 %v11368_v32  ;;  %v628_v55 = vand.u32 4294901760, %v627_v38 }
  0x41   :  { %11297 = vmatpush1.bf16.msra.mxu0 %v12545_v16  ;;  %527 = vmatprep.mubr.f32.mxu0 %v15184_v0  ;;  %v610_v16 = vsub.f32 %v608_v51, %v609_v37  ;;  %v1285_v38 = vand.u32 4294901760, %v12789_v61 }
  0x42   :  { %11299 = vmatprep.subr.bf16.mxu0 %v11298_v34  ;;  %11370 = vmatprep.subr.bf16.mxu1 %v15160_v1  ;;  %v11304_v19 = vpack.c.bf16 %v640_v36, %v628_v55 }
  0x43   :  { %v611_v59 = vand.u32 4294901760, %v610_v16  ;;  %v12799_v16 = vpack.c.bf16 %v1106_v2, %v1103_v44  ;;  %v1286_v55 = vsub.f32 %v12789_v61, %v1285_v38 }
  0x48   :  { %529 = vmatmul.mubr.f32.vlgmr.msra.gmra.mrb[0].mxu0 %v12547_v18  ;;  %v11308_v18 = vpack.c.bf16 %v637_v28, %v625_v12  ;;  %v1060_v28 = vld [vmem:[#allocation2 + $0x70] sm:$0xff]  ;;  %v1063_v12 = vld [vmem:[#allocation2 + $0x88] sm:$0xff] }
  0x49   :  { %11301 = vmatpush1.bf16.msra.mxu0 %v11300_v35  ;;  %606 = vmatprep.mubr.f32.mxu0 %v15184_v0  ;;  %v1115_v10 = vand.u32 4294901760, %v1060_v28  ;;  %v1124_v47 = vand.u32 4294901760, %v1063_v12 }
  0x4a   :  { %11303 = vmatprep.subr.bf16.mxu0 %v11302_v58 }
  0x4b   :  { %v12791_v32 = vsub.f32 %v1063_v12, %v1124_v47  ;;  %v12823_v2 = vpack.c.bf16 %v1124_v47, %v1121_v46 }
  0x4d   :  { %v1292_v15 = vand.u32 4294901760, %v12791_v32  ;;  %v11401_v4 = vpack.c.bf16 %v12791_v32, %v12789_v61  ;;  %v1758_v61 = vld [vmem:[#allocation2 + $0xc0] sm:$0xff] }
  0x4f   :  { %v1293_v36 = vsub.f32 %v12791_v32, %v1292_v15 }
  0x50   :  { %612 = vmatmul.mubr.f32.vlgmr.msra.gmra.mrb[0].mxu0 %v611_v59  ;;  %v1287_v59 = vand.u32 4294901760, %v1286_v55 }
  0x51   :  { %11305 = vmatpush1.bf16.msra.mxu0 %v11304_v19  ;;  %702 = vmatprep.mubr.f32.mxu0 %v15184_v0  ;;  %v1294_v19 = vand.u32 4294901760, %v1293_v36  ;;  %v11380_v36 = vpack.c.bf16 %v12592_v63, %v12590_v62  ;;  %v15376_v62 = vand.u32 4294901760, %v12641_v43  ;;  %v15377_v63 = vand.u32 4294901760, %v12649_v52 }
  0x52   :  { %11307 = vmatprep.subr.bf16.mxu0 %v11306_v56  ;;  %v15173_v56 = vsub.s32 0, %v12831_v25 }
  0x53   :  { %v11374_v30 = vpack.c.bf16 %v1294_v19, %v1287_v59 }
  0x58   :  { %704 = vmatmul.mubr.f32.vlgmr.msra.gmra.mrb[0].mxu0 %v12738_v33 }
  0x59   :  { %11309 = vmatpush1.bf16.msra.mxu0 %v11308_v18  ;;  %782 = vmatprep.mubr.f32.mxu0 %v15184_v0  ;;  %v10186_v18 = vld [vmem:[%s15148_s1 + $0x80] ss:$8 sm:$0x3] }
  0x5a   :  { %11311 = vmatprep.subr.bf16.mxu0 %v11298_v34 }
  0x60   :  { %785 = vmatmul.mubr.f32.vlgmr.msra.gmra.mrb[0].mxu0 %v608_v51  ;;  %v12777_v51 = vsub.f32 %v1060_v28, %v1115_v10 }
  0x61   :  { %11313 = vmatpush1.bf16.msra.mxu0 %v11300_v35  ;;  %859 = vmatprep.mubr.f32.mxu0 %v15184_v0 }
  0x62   :  { %11315 = vmatprep.subr.bf16.mxu0 %v11314_v11  ;;  %v15172_v11 = vsub.s32 1, %v12831_v25 }
  0x64   :  { %v1039_v28 = vrot.slane %v10186_v18, %v15172_v11  ;;  %v13550_v11 = vld [vmem:[#allocation2 + $0x128] sm:$0xff] }
  0x68   :  { %863 = vmatmul.mubr.f32.vlgmr.msra.gmra.mrb[0].mxu0 %v609_v37 }
  0x69   :  { %11317 = vmatpush1.bf16.msra.mxu0 %v11316_v41  ;;  %945 = vmatprep.mubr.f32.mxu0 %v15184_v0  ;;  %v1035_v41 = vrot.slane %v10186_v18, %v15173_v56  ;;  %v11383_v18 = vpack.c.bf16 %v12608_v14, %v12599_v6  ;;  %v15378_v6 = vand.u32 4294901760, %v12661_v3 }
  0x6a   :  { %11319 = vmatprep.subr.bf16.mxu0 %v11298_v34  ;;  %v1271_v34 = vand.u32 4294901760, %v12777_v51 }
  0x6c   :  { %v1272_v48 = vsub.f32 %v12777_v51, %v1271_v34 }
  0x6e   :  { %v1273_v37 = vand.u32 4294901760, %v1272_v48 }
  0x70   :  { %947 = vmatmul.mubr.f32.vlgmr.msra.gmra.mrb[0].mxu0 %v12738_v33 }
  0x71   :  { %11321 = vmatpush1.bf16.msra.mxu0 %v11300_v35  ;;  %1021 = vmatprep.mubr.f32.mxu0 %v15184_v0 }
  0x72   :  { %11322 = vmatprep.subr.bf16.mxu0 %v15160_v1 }
  0x78   :  { %1023 = vmatmul.mubr.f32.vlgmr.msra.gmra.mrb[0].mxu0 %v12738_v33  ;;  %v1061_v33 = vld [vmem:[#allocation2 + $0x78] sm:$0xff] }
  0x79   :  { %11324 = vmatpush1.bf16.msra.mxu0 %v12604_v9  ;;  %v1118_v31 = vand.u32 4294901760, %v1061_v33 }
  0x7a   :  { %11325 = vmatprep.subr.bf16.mxu0 %v15160_v1 }
  0x7b   :  { %v12779_v22 = vsub.f32 %v1061_v33, %v1118_v31  ;;  %v12819_v44 = vpack.c.bf16 %v1118_v31, %v1115_v10 }
  0x7d   :  { %11327 = vmatpush1.bf16.msra.mxu0 %v12619_v23  ;;  %v1278_v45 = vand.u32 4294901760, %v12779_v22  ;;  %v11398_v54 = vpack.c.bf16 %v12779_v22, %v12777_v51 }
  0x7e   :  { %11328 = vmatprep.subr.bf16.mxu0 %v15160_v1 }
  0x7f   :  { %v1279_v60 = vsub.f32 %v12779_v22, %v1278_v45 }
  0x81   :  { %11330 = vmatpush1.bf16.msra.mxu0 %v12651_v53  ;;  %v1280_v35 = vand.u32 4294901760, %v1279_v60 }
  0x82   :  { %11331 = vmatprep.subr.bf16.mxu0 %v15160_v1 }
  0x83   :  { %v11371_v58 = vpack.c.bf16 %v1280_v35, %v1273_v37  ;;  %v11377_v35 = vpack.c.bf16 %v12574_v50, %v12559_v42  ;;  %v15373_v42 = vand.u32 4294901760, %v12608_v14  ;;  %v15380_v14 = vand.u32 4294901760, %v12711_v40 }
  0x85   :  { %11333 = vmatpush1.bf16.msra.mxu0 %v12666_v17  ;;  %11372 = vmatpush1.bf16.msra.mxu1 %v11371_v58  ;;  %v11437_v50 = vpack.c.bf16 %v15373_v42, %v1201_v13 }
  0x86   :  { %11334 = vmatprep.subr.bf16.mxu0 %v15160_v1  ;;  %11373 = vmatprep.subr.bf16.mxu1 %v15160_v1 }
  0x89   :  { %11336 = vmatpush1.bf16.msra.mxu0 %v12688_v26  ;;  %11375 = vmatpush1.bf16.msra.mxu1 %v11374_v30 }
  0x8a   :  { %11337 = vmatprep.subr.bf16.mxu0 %v15160_v1  ;;  %11376 = vmatprep.subr.bf16.mxu1 %v15160_v1 }
  0x8d   :  { %11339 = vmatpush1.bf16.msra.mxu0 %v12799_v16 }
  0x8e   :  { %11340 = vmatprep.subr.bf16.mxu0 %v15160_v1 }
  0x91   :  { %11342 = vmatpush1.bf16.msra.mxu0 %v12814_v39 }
  0x92   :  { %11343 = vmatprep.subr.bf16.mxu0 %v15160_v1 }
  0x95   :  { %11345 = vmatpush1.bf16.msra.mxu0 %v12819_v44 }
  0x96   :  { %11346 = vmatprep.subr.bf16.mxu0 %v15160_v1 }
  0x99   :  { %11348 = vmatpush1.bf16.msra.mxu0 %v12823_v2 }
  0x9a   :  { %11484 = vmatprep.subr.bf16.mxu0 %v15160_v1 }
 0x14b   :  { %v1024_v33 = vpop.f32.mrb[0].mxu0 }
 0x14c   :  { %v1042_v10 = vadd.f32 %v1035_v41, %v1024_v33  ;;  %v1026_v31 = vpop.f32.mrb[1].mxu0  ;;  %v11389_v33 = vpack.c.bf16 %v12649_v52, %v12641_v43  ;;  %v11452_v43 = vpack.c.bf16 %v1278_v45, %v1271_v34  ;;  %v11455_v52 = vpack.c.bf16 %v1292_v15, %v1285_v38  ;;  %v1757_v45 = vld [vmem:[#allocation2 + $0xb8] sm:$0xff] }
 0x14d   :  { %v1043_v27 = vadd.f32 %v1039_v28, %v1026_v31  ;;  %v11386_v28 = vpack.c.bf16 %v12625_v29, %v12617_v21  ;;  %v11395_v31 = vpack.c.bf16 %v12716_v5, %v12711_v40  ;;  %v1756_v40 = vld [vmem:[#allocation2 + $0xb0] sm:$0xff]  ;;  %v1783_v32 = vand.u32 4294901760, %v1757_v45 }
 0x14e   :  { %v1044_v12 = vmax.f32 %v1042_v10, 0.0  ;;  %v11392_v10 = vpack.c.bf16 %v12676_v20, %v12661_v3  ;;  %v1754_v3 = vld [vmem:[#allocation2 + $0xa0] sm:$0xff]  ;;  %v1780_v22 = vand.u32 4294901760, %v1756_v40  ;;  %v1786_v38 = vand.u32 4294901760, %v1758_v61 }
 0x14f   :  { %v1045_v46 = vmax.f32 %v1043_v27, 0.0 }
 0x150   :  { %v12842_v47 = vand.u32 4294901760, %v1044_v12 }
 0x151   :  { %v1070_v48 = vsel %vm40_vm0, %v1045_v46, 0 }
 0x152   :  { %v1161_v60 = vsub.f32 %v1044_v12, %v12842_v47  ;;  %v12846_v37 = vand.u32 4294901760, %v1070_v48 }
 0x154   :  { %v1162_v58 = vand.u32 4294901760, %v1161_v60  ;;  %1325 = vmatprep.mubr.f32.mxu1 %v12846_v37  ;;  %v1155_v55 = vsub.f32 %v1070_v48, %v12846_v37 }
 0x155   :  { %1327 = vmatmul.mubr.f32.vlgmr.msra.gmra.mrb[0].mxu1 %v12842_v47 }
 0x156   :  { %11378 = vmatpush1.bf16.msra.mxu1 %v11377_v35  ;;  %1434 = vmatprep.mubr.f32.mxu1 %v1155_v55  ;;  %v1156_v59 = vand.u32 4294901760, %v1155_v55  ;;  %v1163_v19 = vsub.f32 %v1161_v60, %v1162_v58  ;;  %v12983_v35 = vsub.f32 %v1757_v45, %v1783_v32 }
 0x157   :  { %11379 = vmatprep.subr.bf16.mxu1 %v15160_v1 }
 0x158   :  { %v1157_v30 = vsub.f32 %v1155_v55, %v1156_v59  ;;  %v1164_v41 = vand.u32 4294901760, %v1163_v19  ;;  %v1884_v42 = vand.u32 4294901760, %v12983_v35 }
 0x15a   :  { %11381 = vmatpush1.bf16.msra.mxu1 %v11380_v36  ;;  %v1158_v24 = vand.u32 4294901760, %v1157_v30 }
 0x15b   :  { %11382 = vmatprep.subr.bf16.mxu1 %v15160_v1 }
 0x15c   :  { %1159 = vmatprep.mubr.f32.mxu0 %v1158_v24 }
 0x15d   :  { %1165 = vmatmul.mubr.f32.vlgmr.msra.gmra.mrb[2].mxu0 %v1164_v41 }
 0x15e   :  { %11384 = vmatpush1.bf16.msra.mxu1 %v11383_v18  ;;  %10840 = vmatprep.mubr.msk.f32.mxu0 %vm12492_vm1, %v15184_v0 }
 0x15f   :  { %11385 = vmatprep.subr.bf16.mxu1 %v15160_v1 }
 0x162   :  { %11387 = vmatpush1.bf16.msra.mxu1 %v11386_v28 }
 0x163   :  { %11388 = vmatprep.subr.bf16.mxu1 %v15160_v1 }
 0x166   :  { %11390 = vmatpush1.bf16.msra.mxu1 %v11389_v33 }
 0x167   :  { %11391 = vmatprep.subr.bf16.mxu1 %v15160_v1 }
 0x16a   :  { %11393 = vmatpush1.bf16.msra.mxu1 %v11392_v10 }
 0x16b   :  { %11394 = vmatprep.subr.bf16.mxu1 %v15160_v1 }
 0x16e   :  { %11396 = vmatpush1.bf16.msra.mxu1 %v11395_v31 }
 0x16f   :  { %11397 = vmatprep.subr.bf16.mxu1 %v15160_v1 }
 0x172   :  { %11399 = vmatpush1.bf16.msra.mxu1 %v11398_v54  ;;  %v11431_v54 = vpack.c.bf16 %v1180_v57, %v1173_v49  ;;  %v15374_v49 = vand.u32 4294901760, %v12617_v21  ;;  %v15375_v57 = vand.u32 4294901760, %v12625_v29  ;;  %v15381_v21 = vand.u32 4294901760, %v12716_v5 }
 0x173   :  { %11400 = vmatprep.subr.bf16.mxu1 %v15160_v1 }
 0x174   :  { %v11440_v27 = vpack.c.bf16 %v15375_v57, %v15374_v49  ;;  %v11449_v29 = vpack.c.bf16 %v15381_v21, %v15380_v14  ;;  %v1885_v57 = vsub.f32 %v12983_v35, %v1884_v42 }
 0x176   :  { %11402 = vmatpush1.bf16.msra.mxu1 %v11401_v4  ;;  %v11434_v4 = vpack.c.bf16 %v1194_v8, %v1187_v7  ;;  %v11443_v7 = vpack.c.bf16 %v15377_v63, %v15376_v62  ;;  %v15379_v8 = vand.u32 4294901760, %v12676_v20  ;;  %v1886_v62 = vand.u32 4294901760, %v1885_v57 }
 0x177   :  { %11403 = vmatprep.subr.bf16.mxu1 %v15160_v1 }
 0x178   :  { %v11446_v13 = vpack.c.bf16 %v15379_v8, %v15378_v6 }
 0x179   :  { %1437 = vmatmul.mubr.f32.vlgmr.msra.gmra.mrb[0].mxu1 %v1161_v60 }
 0x17a   :  { %11405 = vmatpush1.bf16.msra.mxu1 %v12604_v9  ;;  %1527 = vmatprep.mubr.f32.mxu1 %v1156_v59 }
 0x17b   :  { %11406 = vmatprep.subr.bf16.mxu1 %v15160_v1 }
 0x17e   :  { %11408 = vmatpush1.bf16.msra.mxu1 %v12619_v23 }
 0x17f   :  { %11409 = vmatprep.subr.bf16.mxu1 %v15160_v1 }
 0x182   :  { %11411 = vmatpush1.bf16.msra.mxu1 %v12651_v53 }
 0x183   :  { %11412 = vmatprep.subr.bf16.mxu1 %v15160_v1 }
 0x186   :  { %11414 = vmatpush1.bf16.msra.mxu1 %v12666_v17 }
 0x187   :  { %11415 = vmatprep.subr.bf16.mxu1 %v15160_v1 }
 0x18a   :  { %11417 = vmatpush1.bf16.msra.mxu1 %v12688_v26 }
 0x18b   :  { %11418 = vmatprep.subr.bf16.mxu1 %v15160_v1 }
 0x18e   :  { %11420 = vmatpush1.bf16.msra.mxu1 %v12799_v16 }
 0x18f   :  { %11421 = vmatprep.subr.bf16.mxu1 %v15160_v1 }
 0x192   :  { %11423 = vmatpush1.bf16.msra.mxu1 %v12814_v39 }
 0x193   :  { %11424 = vmatprep.subr.bf16.mxu1 %v15160_v1 }
 0x196   :  { %11426 = vmatpush1.bf16.msra.mxu1 %v12819_v44 }
 0x197   :  { %11427 = vmatprep.subr.bf16.mxu1 %v15160_v1 }
 0x19a   :  { %11429 = vmatpush1.bf16.msra.mxu1 %v12823_v2 }
 0x19b   :  { %11430 = vmatprep.subr.bf16.mxu1 %v15160_v1 }
 0x19d   :  { %1531 = vmatmul.mubr.f32.vlgmr.msra.gmra.mrb[0].mxu1 %v1162_v58  ;;  %v12985_v58 = vsub.f32 %v1758_v61, %v1786_v38 }
 0x19e   :  { %11432 = vmatpush1.bf16.msra.mxu1 %v11431_v54  ;;  %1655 = vmatprep.mubr.f32.mxu1 %v12846_v37 }
 0x19f   :  { %11433 = vmatprep.subr.bf16.mxu1 %v15160_v1 }
 0x1a2   :  { %11435 = vmatpush1.bf16.msra.mxu1 %v11434_v4 }
 0x1a3   :  { %11436 = vmatprep.subr.bf16.mxu1 %v15160_v1 }
 0x1a6   :  { %11438 = vmatpush1.bf16.msra.mxu1 %v11437_v50  ;;  %v1891_v50 = vand.u32 4294901760, %v12985_v58 }
 0x1a7   :  { %11439 = vmatprep.subr.bf16.mxu1 %v15160_v1 }
 0x1aa   :  { %11441 = vmatpush1.bf16.msra.mxu1 %v11440_v27  ;;  %v1892_v27 = vsub.f32 %v12985_v58, %v1891_v50 }
 0x1ab   :  { %11442 = vmatprep.subr.bf16.mxu1 %v15160_v1 }
 0x1ac   :  { %v1893_v63 = vand.u32 4294901760, %v1892_v27 }
 0x1ae   :  { %11444 = vmatpush1.bf16.msra.mxu1 %v11443_v7  ;;  %v13013_v8 = vpack.c.bf16 %v1893_v63, %v1886_v62 }
 0x1af   :  { %11445 = vmatprep.subr.bf16.mxu1 %v15160_v1 }
 0x1b2   :  { %11447 = vmatpush1.bf16.msra.mxu1 %v11446_v13 }
 0x1b3   :  { %11448 = vmatprep.subr.bf16.mxu1 %v15160_v1 }
 0x1b6   :  { %11450 = vmatpush1.bf16.msra.mxu1 %v11449_v29 }
 0x1b7   :  { %11451 = vmatprep.subr.bf16.mxu1 %v15160_v1 }
 0x1ba   :  { %11453 = vmatpush1.bf16.msra.mxu1 %v11452_v43 }
 0x1bb   :  { %11454 = vmatprep.subr.bf16.mxu1 %v15160_v1 }
 0x1be   :  { %11456 = vmatpush1.bf16.msra.mxu1 %v11455_v52 }
 0x1bf   :  { %11457 = vmatprep.subr.bf16.mxu1 %v15160_v1 }
 0x1c1   :  { %1657 = vmatmul.mubr.f32.vlgmr.msra.gmra.mrb[0].mxu1 %v12842_v47 }
 0x1c2   :  { %11459 = vmatpush1.bf16.msra.mxu1 %v12604_v9  ;;  %1745 = vmatprep.mubr.f32.mxu1 %v12846_v37  ;;  %v12981_v37 = vsub.f32 %v1756_v40, %v1780_v22 }
 0x1c3   :  { %11460 = vmatprep.subr.bf16.mxu1 %v15160_v1 }
 0x1c4   :  { %v1877_v18 = vand.u32 4294901760, %v12981_v37 }
 0x1c6   :  { %11462 = vmatpush1.bf16.msra.mxu1 %v12619_v23  ;;  %v1878_v10 = vsub.f32 %v12981_v37, %v1877_v18 }
 0x1c7   :  { %11463 = vmatprep.subr.bf16.mxu1 %v15160_v1 }
 0x1c8   :  { %v1879_v4 = vand.u32 4294901760, %v1878_v10 }
 0x1ca   :  { %11465 = vmatpush1.bf16.msra.mxu1 %v12651_v53  ;;  %v1753_v53 = vld [vmem:[#allocation2 + $0x98] sm:$0xff] }
 0x1cb   :  { %11466 = vmatprep.subr.bf16.mxu1 %v15160_v1  ;;  %v1771_v5 = vand.u32 4294901760, %v1753_v53 }
 0x1cd   :  { %v12969_v15 = vsub.f32 %v1753_v53, %v1771_v5  ;;  %v11515_v53 = vpack.c.bf16 %v12985_v58, %v12983_v35  ;;  %v2308_v58 = vld [vmem:[%s15148_s1 + $0xa0] sm:$0xff] }
 0x1ce   :  { %11468 = vmatpush1.bf16.msra.mxu1 %v12666_v17  ;;  %v1774_v17 = vand.u32 4294901760, %v1754_v3 }
 0x1cf   :  { %11469 = vmatprep.subr.bf16.mxu1 %v15160_v1 }
 0x1d0   :  { %v12961_v20 = vpack.c.bf16 %v1774_v17, %v1771_v5 }
 0x1d2   :  { %11471 = vmatpush1.bf16.msra.mxu1 %v12688_v26  ;;  %v1755_v26 = vld [vmem:[#allocation2 + $0xa8] sm:$0xff]  ;;  %11486 = vmatpush3.bf16.msra.mxu0 %v12961_v20 }
 0x1d3   :  { %11472 = vmatprep.subr.bf16.mxu1 %v15160_v1  ;;  %v1777_v51 = vand.u32 4294901760, %v1755_v26  ;;  %11487 = vmatprep.subr.bf16.mxu0 %v15160_v1 }
 0x1d5   :  { %v12965_v34 = vpack.c.bf16 %v1780_v22, %v1777_v51  ;;  %v12979_v60 = vsub.f32 %v1755_v26, %v1777_v51  ;;  %v13031_v26 = vpack.c.bf16 %v1891_v50, %v1884_v42  ;;  %v30_v51 = vld [vmem:[%s15147_s0 + $0x10] sm:$0xff] }
 0x1d6   :  { %11474 = vmatpush1.bf16.msra.mxu1 %v12799_v16  ;;  %v12971_v16 = vsub.f32 %v1754_v3, %v1774_v17  ;;  %v2317_v22 = vsel %vm40_vm0, %v30_v51, 0 }
 0x1d7   :  { %11475 = vmatprep.subr.bf16.mxu1 %v15160_v1  ;;  %11489 = vmatpush3.bf16.msra.mxu0 %v12965_v34  ;;  %v1870_v24 = vand.u32 4294901760, %v12979_v60  ;;  %v13039_v45 = vand.u32 4294901760, %v2317_v22 }
 0x1d8   :  { %11490 = vmatprep.subr.bf16.mxu0 %v15160_v1  ;;  %v1863_v48 = vand.u32 4294901760, %v12971_v16  ;;  %v11509_v52 = vpack.c.bf16 %v12971_v16, %v12969_v15 }
 0x1d9   :  { %v1871_v33 = vsub.f32 %v12979_v60, %v1870_v24  ;;  %v13029_v17 = vpack.c.bf16 %v1877_v18, %v1870_v24  ;;  %v13042_v61 = vsub.f32 %v2317_v22, %v13039_v45 }
 0x1da   :  { %11477 = vmatpush1.bf16.msra.mxu1 %v12814_v39  ;;  %v12973_v39 = vpack.c.bf16 %v1786_v38, %v1783_v32  ;;  %v1864_v30 = vsub.f32 %v12971_v16, %v1863_v48  ;;  %v4299_v32 = vld [vmem:[%s15148_s1 + $0xe8] sm:$0xff] }
 0x1db   :  { %11478 = vmatprep.subr.bf16.mxu1 %v15160_v1  ;;  %v1872_v54 = vand.u32 4294901760, %v1871_v33  ;;  %v4303_v38 = vld [vmem:[%s15148_s1 + $0x108] sm:$0xff]  ;;  %v13057_v18 = vand.u32 4294901760, %v13042_v61 }
 0x1dc   :  { %11492 = vmatpush3.bf16.msra.mxu0 %v12973_v39  ;;  %v1865_v28 = vand.u32 4294901760, %v1864_v30  ;;  %v2309_v16 = vld [vmem:[%s15148_s1 + $0xa8] sm:$0xff] }
 0x1dd   :  { %11493 = vmatprep.subr.bf16.mxu0 %v15160_v1  ;;  %v13007_v49 = vpack.c.bf16 %v1879_v4, %v1872_v54  ;;  %v2391_v10 = vsub.f32 %v13042_v61, %v13057_v18 }
 0x1de   :  { %11480 = vmatpush1.bf16.msra.mxu1 %v12819_v44  ;;  %v1759_v44 = vld [vmem:[#allocation2 + $0xc8] sm:$0xff] }
 0x1df   :  { %11481 = vmatprep.subr.bf16.mxu1 %v15160_v1  ;;  %v1789_v12 = vand.u32 4294901760, %v1759_v44  ;;  %v13061_v50 = vand.u32 4294901760, %v2391_v10  ;;  %v5293_v10 = vld [vmem:[%s15148_s1 + $0x188] sm:$0xff] }
 0x1e1   :  { %v12989_v36 = vsub.f32 %v1759_v44, %v1789_v12  ;;  %v4306_v44 = vand.u32 4294901760, %v4299_v32 }
 0x1e2   :  { %11483 = vmatpush1.bf16.msra.mxu1 %v12823_v2  ;;  %v1760_v2 = vld [vmem:[#allocation2 + $0xd0] sm:$0xff] }
 0x1e3   :  { %v1792_v46 = vand.u32 4294901760, %v1760_v2  ;;  %v1898_v7 = vand.u32 4294901760, %v12989_v36  ;;  %v4387_v30 = vsub.f32 %v4299_v32, %v4306_v44 }
 0x1e5   :  { %1747 = vmatmul.mubr.f32.vlgmr.msra.gmra.mrb[0].mxu1 %v12842_v47  ;;  %v1856_v47 = vand.u32 4294901760, %v12969_v15  ;;  %v12987_v55 = vpack.c.bf16 %v1792_v46, %v1789_v12  ;;  %v12991_v59 = vsub.f32 %v1760_v2, %v1792_v46  ;;  %v1899_v13 = vsub.f32 %v12989_v36, %v1898_v7  ;;  %v4298_v12 = vld [vmem:[%s15148_s1 + $0xe0] sm:$0xff] }
 0x1e6   :  { %4374 = vmatprep.mubr.f32.mxu1 %v15184_v0  ;;  %v4310_v2 = vand.u32 4294901760, %v4303_v38  ;;  %v4302_v46 = vld [vmem:[%s15148_s1 + $0x100] sm:$0xff]  ;;  %v4388_v54 = vand.u32 4294901760, %v4387_v30 }
 0x1e7   :  { %v1857_v19 = vsub.f32 %v12969_v15, %v1856_v47  ;;  %11495 = vmatpush3.bf16.msra.mxu0 %v12987_v55  ;;  %v1905_v6 = vand.u32 4294901760, %v12991_v59  ;;  %v1900_v21 = vand.u32 4294901760, %v1899_v13  ;;  %v11518_v3 = vpack.c.bf16 %v12991_v59, %v12989_v36  ;;  %v2312_v36 = vld [vmem:[%s15148_s1 + $0xc0] sm:$0xff] }
 0x1e8   :  { %11496 = vmatprep.subr.bf16.mxu0 %v15160_v1  ;;  %v13027_v5 = vpack.c.bf16 %v1863_v48, %v1856_v47  ;;  %v4308_v47 = vand.u32 4294901760, %v4298_v12  ;;  %v4312_v48 = vand.u32 4294901760, %v4302_v46  ;;  %v4399_v24 = vsub.f32 %v4303_v38, %v4310_v2  ;;  %v31_v38 = vld [vmem:[%s15147_s0 + $0x18] sm:$0xff] }
 0x1e9   :  { %v1858_v41 = vand.u32 4294901760, %v1857_v19  ;;  %v1906_v14 = vsub.f32 %v12991_v59, %v1905_v6  ;;  %v13033_v40 = vpack.c.bf16 %v1905_v6, %v1898_v7  ;;  %v11652_v19 = vpack.c.bf16 %v4310_v2, %v4306_v44 }
 0x1ea   :  { %v4405_v33 = vsub.f32 %v4302_v46, %v4312_v48  ;;  %v4400_v4 = vand.u32 4294901760, %v4399_v24  ;;  %v4389_v57 = vsub.f32 %v4387_v30, %v4388_v54  ;;  %v11660_v22 = vpack.c.bf16 %v4399_v24, %v4387_v30  ;;  %v10187_v46 = vld [vmem:[#allocation2 + $0x90] ss:$0 sm:$0xff] }
 0x1eb   :  { %v13003_v31 = vpack.c.bf16 %v1865_v28, %v1858_v41  ;;  %v1907_v29 = vand.u32 4294901760, %v1906_v14  ;;  %v11654_v41 = vpack.c.bf16 %v4312_v48, %v4308_v47  ;;  %v4393_v28 = vsub.f32 %v4298_v12, %v4308_v47  ;;  %11653 = vmatprep.subr.bf16.mxu1 %v11652_v19 }
 0x1ec   :  { %v4406_v27 = vand.u32 4294901760, %v4405_v33  ;;  %v4401_v62 = vsub.f32 %v4399_v24, %v4400_v4  ;;  %v4390_v63 = vand.u32 4294901760, %v4389_v57  ;;  %v11668_v44 = vpack.c.bf16 %v4400_v4, %v4388_v54  ;;  %v5292_v57 = vld [vmem:[%s15148_s1 + $0x180] sm:$0xff] }
 0x1ed   :  { %v13017_v43 = vpack.c.bf16 %v1907_v29, %v1900_v21  ;;  %11655 = vmatpush1.bf16.msra.mxu1 %v11654_v41  ;;  %v4394_v42 = vand.u32 4294901760, %v4393_v28  ;;  %v11662_v32 = vpack.c.bf16 %v4405_v33, %v4393_v28  ;;  %v3310_v12 = vsel %vm40_vm0, %v31_v38, 0 }
 0x1ee   :  { %v4402_v7 = vand.u32 4294901760, %v4401_v62  ;;  %v4407_v13 = vsub.f32 %v4405_v33, %v4406_v27  ;;  %v13075_v47 = vand.u32 4294901760, %v3310_v12  ;;  %v5289_v33 = vld [vmem:[%s15148_s1 + $0x168] sm:$0xff]  ;;  %v5300_v4 = vand.u32 4294901760, %v5293_v10 }
 0x1ef   :  { %v4395_v6 = vsub.f32 %v4393_v28, %v4394_v42  ;;  %v11670_v2 = vpack.c.bf16 %v4406_v27, %v4394_v42  ;;  %v5288_v42 = vld [vmem:[%s15148_s1 + $0x160] sm:$0xff]  ;;  %v5302_v62 = vand.u32 4294901760, %v5292_v57  ;;  %v2321_v59 = vand.u32 4294901760, %v2308_v58 }
 0x1f0   :  { %4380 = vmatmul.mubr.f32.vlgmr.msra.gmra.mrb[2].mxu1 %v13061_v50  ;;  %v11656_v14 = vpack.c.bf16 %v4402_v7, %v4390_v63  ;;  %v4408_v29 = vand.u32 4294901760, %v4407_v13  ;;  %v5298_v27 = vand.u32 4294901760, %v5288_v42  ;;  %v5389_v13 = vsub.f32 %v5293_v10, %v5300_v4 }
 0x1f1   :  { %4470 = vmatprep.mubr.f32.mxu1 %v15184_v0  ;;  %v4396_v21 = vand.u32 4294901760, %v4395_v6 }
 0x1f2   :  { %11657 = vmatprep.subr.bf16.mxu1 %v11656_v14  ;;  %v5383_v14 = vsub.f32 %v5288_v42, %v5298_v27 }
 0x1f3   :  { %v11658_v51 = vpack.c.bf16 %v4408_v29, %v4396_v21  ;;  %v13100_v21 = vpack.c.bf16 %v5302_v62, %v5298_v27 }
 0x1f5   :  { %11659 = vmatpush1.bf16.msra.mxu1 %v11658_v51 }
 0x1f6   :  { %11661 = vmatprep.subr.bf16.mxu1 %v11660_v22 }
 0x1f8   :  { %4472 = vmatmul.mubr.f32.vlgmr.msra.gmra.mrb[2].mxu1 %v13039_v45 }
 0x1f9   :  { %4550 = vmatprep.mubr.f32.mxu1 %v15184_v0  ;;  %11663 = vmatpush1.bf16.msra.mxu1 %v11662_v32 }
 0x1fa   :  { %11665 = vmatprep.subr.bf16.mxu1 %v11652_v19 }
 0x200   :  { %4553 = vmatmul.mubr.f32.vlgmr.msra.gmra.mrb[2].mxu1 %v13042_v61 }
 0x201   :  { %11667 = vmatpush1.bf16.msra.mxu1 %v11654_v41  ;;  %4627 = vmatprep.mubr.f32.mxu1 %v15184_v0 }
 0x202   :  { %11669 = vmatprep.subr.bf16.mxu1 %v11668_v44  ;;  %v5390_v44 = vand.u32 4294901760, %v5389_v13 }
 0x208   :  { %4631 = vmatmul.mubr.f32.vlgmr.msra.gmra.mrb[2].mxu1 %v13057_v18 }
 0x209   :  { %4713 = vmatprep.mubr.f32.mxu1 %v15184_v0  ;;  %11671 = vmatpush1.bf16.msra.mxu1 %v11670_v2  ;;  %v5384_v2 = vand.u32 4294901760, %v5383_v14 }
 0x20a   :  { %11673 = vmatprep.subr.bf16.mxu1 %v11652_v19  ;;  %v13086_v19 = vsub.f32 %v3310_v12, %v13075_v47 }
 0x20c   :  { %v13103_v29 = vand.u32 4294901760, %v13086_v19 }
 0x20e   :  { %v3384_v32 = vsub.f32 %v13086_v19, %v13103_v29 }
 0x210   :  { %4715 = vmatmul.mubr.f32.vlgmr.msra.gmra.mrb[2].mxu1 %v13039_v45 }
 0x211   :  { %11675 = vmatpush1.bf16.msra.mxu1 %v11654_v41  ;;  %4789 = vmatprep.mubr.f32.mxu1 %v15184_v0 }
 0x218   :  { %4791 = vmatmul.mubr.f32.vlgmr.msra.gmra.mrb[2].mxu1 %v13039_v45 }
 0x219   :  { %5364 = vmatprep.mubr.f32.mxu1 %v15184_v0 }
 0x230   :  { %v12959_v9 = vpop.f32.mrb[2].mxu0 }
 0x231   :  { %v1168_v23 = vpop.f32.mrb[3].mxu0  ;;  %v1167_v48 = vadd.f32 %v10187_v46, %v12959_v9  ;;  %v5296_v9 = vand.u32 4294901760, %v5289_v33  ;;  %v5395_v46 = vsub.f32 %v5292_v57, %v5302_v62 }
 0x232   :  { %v11512_v23 = vpack.c.bf16 %v12981_v37, %v12979_v60  ;;  %v2313_v60 = vld [vmem:[%s15148_s1 + $0xc8] sm:$0xff]  ;;  %v2319_v37 = vand.u32 4294901760, %v2309_v16 }
 0x233   :  { %v13095_v7 = vpack.c.bf16 %v5300_v4, %v5296_v9  ;;  %v5377_v6 = vsub.f32 %v5289_v33, %v5296_v9  ;;  %v5385_v33 = vsub.f32 %v5383_v14, %v5384_v2  ;;  %v2323_v35 = vand.u32 4294901760, %v2313_v60 }
 0x235   :  { %11701 = vmatprep.subr.bf16.mxu1 %v13095_v7  ;;  %v5378_v51 = vand.u32 4294901760, %v5377_v6  ;;  %v5386_v4 = vand.u32 4294901760, %v5385_v33 }
 0x236   :  { %11703 = vmatpush1.bf16.msra.mxu1 %v13100_v21 }
 0x237   :  { %v5379_v38 = vsub.f32 %v5377_v6, %v5378_v51 }
 0x2b8   :  { %v1748_v30 = vpop.f32.mrb[0].mxu1 }
 0x2b9   :  { %v12313_v24 = vadd.f32 %v1748_v30, %v1167_v48  ;;  %v1750_v28 = vpop.f32.mrb[1].mxu1  ;;  %v13114_v48 = vand.u32 4294901760, %v3384_v32  ;;  %v11710_v32 = vpack.c.bf16 %v5395_v46, %v5383_v14 }
 0x2ba   :  { %v5391_v28 = vsub.f32 %v5389_v13, %v5390_v44 }
 0x2bb   :  { %v1752_v54 = vmax.f32 %v12313_v24, 0.0  ;;  %v5380_v24 = vand.u32 4294901760, %v5379_v38  ;;  %5370 = vmatmul.mubr.f32.vlgmr.msra.gmra.mrb[4].mxu1 %v13114_v48 }
 0x2bc   :  { %v5392_v9 = vand.u32 4294901760, %v5391_v28  ;;  %5460 = vmatprep.mubr.f32.mxu1 %v15184_v0 }
 0x2bd   :  { %v1768_v63 = vsel %vm1766_vm2, %v1752_v54, 0  ;;  %v5396_v54 = vand.u32 4294901760, %v5395_v46 }
 0x2be   :  { %v13097_v41 = vand.u32 4294901760, %v1768_v63  ;;  %v11704_v57 = vpack.c.bf16 %v5392_v9, %v5380_v24  ;;  %v2314_v24 = vld [vmem:[%s15148_s1 + $0xd0] sm:$0xff] }
 0x2bf   :  { %v5397_v42 = vsub.f32 %v5395_v46, %v5396_v54  ;;  %v11718_v15 = vpack.c.bf16 %v5396_v54, %v5384_v2  ;;  %v2315_v2 = vld [vmem:[%s15148_s1 + $0xd8] sm:$0xff] }
 0x2c0   :  { %v13106_v22 = vsub.f32 %v1768_v63, %v13097_v41  ;;  %11705 = vmatprep.subr.bf16.mxu1 %v11704_v57  ;;  %v11708_v63 = vpack.c.bf16 %v5389_v13, %v5377_v6  ;;  %v11556_v6 = vpack.c.bf16 %v2323_v35, %v2319_v37  ;;  %v2814_v46 = vand.u32 4294901760, %v2315_v2 }
 0x2c1   :  { %v5398_v27 = vand.u32 4294901760, %v5397_v42 }
 0x2c2   :  { %v1845_v12 = vand.u32 4294901760, %v13106_v22  ;;  %v2903_v9 = vsub.f32 %v2315_v2, %v2814_v46 }
 0x2c3   :  { %v11706_v62 = vpack.c.bf16 %v5398_v27, %v5386_v4 }
 0x2c4   :  { %v1846_v30 = vsub.f32 %v13106_v22, %v1845_v12  ;;  %v2904_v27 = vand.u32 4294901760, %v2903_v9 }
 0x2c5   :  { %11707 = vmatpush1.bf16.msra.mxu1 %v11706_v62 }
 0x2c6   :  { %v1847_v10 = vand.u32 4294901760, %v1846_v30  ;;  %11709 = vmatprep.subr.bf16.mxu1 %v11708_v63  ;;  %v2310_v30 = vld [vmem:[%s15148_s1 + $0xb0] sm:$0xff] }
 0x2c7   :  { %v2812_v33 = vand.u32 4294901760, %v2310_v30 }
 0x2c8   :  { %10841 = vmatmul.mubr.f32.vlgmr.msra.gmra.mrb[4].mxu0 %v1847_v10  ;;  %5462 = vmatmul.mubr.f32.vlgmr.msra.gmra.mrb[4].mxu1 %v13075_v47  ;;  %v2816_v10 = vand.u32 4294901760, %v2314_v24 }
 0x2c9   :  { %11498 = vmatpush3.bf16.msra.mxu0 %v13003_v31  ;;  %10859 = vmatprep.mubr.msk.f32.mxu0 %vm12492_vm1, %v15184_v0  ;;  %v11716_v31 = vpack.c.bf16 %v5390_v44, %v5378_v51  ;;  %v2311_v44 = vld [vmem:[%s15148_s1 + $0xb8] sm:$0xff]  ;;  %v2897_v4 = vsub.f32 %v2310_v30, %v2812_v33 }
 0x2ca   :  { %11499 = vmatprep.subr.bf16.mxu0 %v15160_v1  ;;  %11711 = vmatpush1.bf16.msra.mxu1 %v11710_v32  ;;  %v2909_v42 = vsub.f32 %v2314_v24, %v2816_v10 }
 0x2cb   :  { %5540 = vmatprep.mubr.f32.mxu1 %v15184_v0  ;;  %11713 = vmatprep.subr.bf16.mxu1 %v13095_v7  ;;  %v2898_v62 = vand.u32 4294901760, %v2897_v4 }
 0x2cc   :  { %v2910_v63 = vand.u32 4294901760, %v2909_v42 }
 0x2cd   :  { %11501 = vmatpush3.bf16.msra.mxu0 %v13007_v49  ;;  %v2325_v49 = vand.u32 4294901760, %v2312_v36 }
 0x2ce   :  { %11502 = vmatprep.subr.bf16.mxu0 %v15160_v1 }
 0x2d0   :  { %5543 = vmatmul.mubr.f32.vlgmr.msra.gmra.mrb[4].mxu1 %v13086_v19 }
 0x2d1   :  { %11504 = vmatpush3.bf16.msra.mxu0 %v13013_v8  ;;  %11715 = vmatpush1.bf16.msra.mxu1 %v13100_v21  ;;  %v2400_v8 = vsub.f32 %v2309_v16, %v2319_v37  ;;  %v2899_v16 = vsub.f32 %v2897_v4, %v2898_v62 }
 0x2d2   :  { %11505 = vmatprep.subr.bf16.mxu0 %v15160_v1  ;;  %5617 = vmatprep.mubr.f32.mxu1 %v15184_v0 }
 0x2d3   :  { %11717 = vmatprep.subr.bf16.mxu1 %v11716_v31 }
 0x2d5   :  { %11507 = vmatpush3.bf16.msra.mxu0 %v13017_v43  ;;  %v2412_v43 = vsub.f32 %v2313_v60, %v2323_v35  ;;  %v2911_v60 = vsub.f32 %v2909_v42, %v2910_v63 }
 0x2d6   :  { %11508 = vmatprep.subr.bf16.mxu0 %v15160_v1 }
 0x2d7   :  { %v11564_v38 = vpack.c.bf16 %v2412_v43, %v2400_v8 }
 0x2d8   :  { %10860 = vmatmul.mubr.f32.vlgmr.msra.gmra.mrb[4].mxu0 %v13097_v41  ;;  %5621 = vmatmul.mubr.f32.vlgmr.msra.gmra.mrb[4].mxu1 %v13103_v29 }
 0x2d9   :  { %11510 = vmatpush3.bf16.msra.mxu0 %v11509_v52  ;;  %10878 = vmatprep.mubr.msk.f32.mxu0 %vm12492_vm1, %v15184_v0  ;;  %v2406_v52 = vsub.f32 %v2308_v58, %v2321_v59  ;;  %v11582_v58 = vpack.c.bf16 %v2816_v10, %v2812_v33 }
 0x2da   :  { %11511 = vmatprep.subr.bf16.mxu0 %v15160_v1  ;;  %11719 = vmatpush1.bf16.msra.mxu1 %v11718_v15  ;;  %v2905_v15 = vsub.f32 %v2903_v9, %v2904_v27 }
 0x2db   :  { %5703 = vmatprep.mubr.f32.mxu1 %v15184_v0  ;;  %11721 = vmatprep.subr.bf16.mxu1 %v13095_v7 }
 0x2dc   :  { %v2906_v35 = vand.u32 4294901760, %v2905_v15 }
 0x2dd   :  { %11513 = vmatpush3.bf16.msra.mxu0 %v11512_v23  ;;  %v2418_v23 = vsub.f32 %v2312_v36, %v2325_v49  ;;  %v2900_v36 = vand.u32 4294901760, %v2899_v16 }
 0x2de   :  { %11514 = vmatprep.subr.bf16.mxu0 %v15160_v1 }
 0x2e0   :  { %5705 = vmatmul.mubr.f32.vlgmr.msra.gmra.mrb[4].mxu1 %v13075_v47 }
 0x2e1   :  { %11516 = vmatpush3.bf16.msra.mxu0 %v11515_v53  ;;  %11723 = vmatpush1.bf16.msra.mxu1 %v13100_v21  ;;  %v2401_v53 = vand.u32 4294901760, %v2400_v8  ;;  %v11558_v21 = vpack.c.bf16 %v2325_v49, %v2321_v59  ;;  %v2912_v59 = vand.u32 4294901760, %v2911_v60 }
 0x2e2   :  { %11517 = vmatprep.subr.bf16.mxu0 %v15160_v1  ;;  %5779 = vmatprep.mubr.f32.mxu1 %v15184_v0 }
 0x2e5   :  { %11519 = vmatpush3.bf16.msra.mxu0 %v11518_v3  ;;  %v2413_v3 = vand.u32 4294901760, %v2412_v43 }
 0x2e6   :  { %11520 = vmatprep.subr.bf16.mxu0 %v15160_v1 }
 0x2e8   :  { %10879 = vmatmul.mubr.f32.vlgmr.msra.gmra.mrb[4].mxu0 %v13106_v22  ;;  %5781 = vmatmul.mubr.f32.vlgmr.msra.gmra.mrb[4].mxu1 %v13075_v47 }
 0x2e9   :  { %11522 = vmatpush3.bf16.msra.mxu0 %v12961_v20  ;;  %10897 = vmatprep.mubr.msk.f32.mxu0 %vm12492_vm1, %v15184_v0 }
 0x2ea   :  { %11523 = vmatprep.subr.bf16.mxu0 %v15160_v1 }
 0x2ed   :  { %11525 = vmatpush3.bf16.msra.mxu0 %v12965_v34 }
 0x2ee   :  { %11526 = vmatprep.subr.bf16.mxu0 %v15160_v1 }
 0x2f1   :  { %11528 = vmatpush3.bf16.msra.mxu0 %v12973_v39 }
 0x2f2   :  { %11529 = vmatprep.subr.bf16.mxu0 %v15160_v1 }
 0x2f5   :  { %11531 = vmatpush3.bf16.msra.mxu0 %v12987_v55 }
 0x2f6   :  { %11532 = vmatprep.subr.bf16.mxu0 %v15160_v1 }
 0x2f8   :  { %10898 = vmatmul.mubr.f32.vlgmr.msra.gmra.mrb[4].mxu0 %v1845_v12  ;;  %v2810_v12 = vand.u32 4294901760, %v2311_v44 }
 0x2f9   :  { %11534 = vmatpush3.bf16.msra.mxu0 %v13027_v5  ;;  %10916 = vmatprep.mubr.msk.f32.mxu0 %vm12492_vm1, %v15184_v0  ;;  %v2407_v5 = vand.u32 4294901760, %v2406_v52 }
 0x2fa   :  { %11535 = vmatprep.subr.bf16.mxu0 %v15160_v1  ;;  %v2891_v54 = vsub.f32 %v2311_v44, %v2810_v12  ;;  %v11580_v32 = vpack.c.bf16 %v2814_v46, %v2810_v12 }
 0x2fc   :  { %v2892_v57 = vand.u32 4294901760, %v2891_v54 }
 0x2fd   :  { %11537 = vmatpush3.bf16.msra.mxu0 %v13029_v17  ;;  %v2419_v17 = vand.u32 4294901760, %v2418_v23 }
 0x2fe   :  { %11538 = vmatprep.subr.bf16.mxu0 %v15160_v1  ;;  %v2893_v31 = vsub.f32 %v2891_v54, %v2892_v57 }
 0x2ff   :  { %v2420_v7 = vsub.f32 %v2418_v23, %v2419_v17  ;;  %v11574_v28 = vpack.c.bf16 %v2419_v17, %v2407_v5 }
 0x300   :  { %v2894_v37 = vand.u32 4294901760, %v2893_v31  ;;  %v3307_v31 = vld [vmem:[%s15148_s1 + $0x150] sm:$0xff] }
 0x301   :  { %11540 = vmatpush3.bf16.msra.mxu0 %v13031_v26  ;;  %v2402_v26 = vsub.f32 %v2400_v8, %v2401_v53  ;;  %v11586_v8 = vpack.c.bf16 %v2912_v59, %v2900_v36  ;;  %v3809_v60 = vand.u32 4294901760, %v3307_v31 }
 0x302   :  { %11541 = vmatprep.subr.bf16.mxu0 %v15160_v1  ;;  %v11584_v49 = vpack.c.bf16 %v2906_v35, %v2894_v37 }
 0x303   :  { %v2403_v13 = vand.u32 4294901760, %v2402_v26  ;;  %v3301_v26 = vld [vmem:[%s15148_s1 + $0x120] sm:$0xff]  ;;  %v3902_v36 = vsub.f32 %v3307_v31, %v3809_v60 }
 0x305   :  { %11543 = vmatpush3.bf16.msra.mxu0 %v13033_v40  ;;  %v2414_v40 = vsub.f32 %v2412_v43, %v2413_v3  ;;  %v11588_v43 = vpack.c.bf16 %v2903_v9, %v2891_v54 }
 0x306   :  { %11544 = vmatprep.subr.bf16.mxu0 %v15160_v1 }
 0x307   :  { %v2415_v14 = vand.u32 4294901760, %v2414_v40  ;;  %v3305_v40 = vld [vmem:[%s15148_s1 + $0x140] sm:$0xff] }
 0x308   :  { %10917 = vmatmul.mubr.f32.vlgmr.msra.gmra.mrb[4].mxu0 %v13097_v41 }
 0x309   :  { %11546 = vmatpush3.bf16.msra.mxu0 %v12961_v20  ;;  %10935 = vmatprep.mubr.msk.f32.mxu0 %vm12492_vm1, %v15184_v0  ;;  %v2408_v20 = vsub.f32 %v2406_v52, %v2407_v5  ;;  %v11560_v22 = vpack.c.bf16 %v2415_v14, %v2403_v13 }
 0x30a   :  { %11547 = vmatprep.subr.bf16.mxu0 %v15160_v1 }
 0x30b   :  { %v2409_v51 = vand.u32 4294901760, %v2408_v20  ;;  %v11598_v20 = vpack.c.bf16 %v2910_v63, %v2898_v62 }
 0x30d   :  { %11549 = vmatpush3.bf16.msra.mxu0 %v12965_v34  ;;  %v2421_v34 = vand.u32 4294901760, %v2420_v7  ;;  %v3314_v7 = vand.u32 4294901760, %v3301_v26 }
 0x30e   :  { %11550 = vmatprep.subr.bf16.mxu0 %v15160_v1 }
 0x311   :  { %11552 = vmatpush3.bf16.msra.mxu0 %v12973_v39  ;;  %v11562_v39 = vpack.c.bf16 %v2421_v34, %v2409_v51 }
 0x312   :  { %11553 = vmatprep.subr.bf16.mxu0 %v15160_v1 }
 0x315   :  { %11555 = vmatpush3.bf16.msra.mxu0 %v12987_v55  ;;  %v11566_v55 = vpack.c.bf16 %v2418_v23, %v2406_v52  ;;  %v11590_v52 = vpack.c.bf16 %v2909_v42, %v2897_v4  ;;  %v11596_v23 = vpack.c.bf16 %v2904_v27, %v2892_v57  ;;  %v3304_v57 = vld [vmem:[%s15148_s1 + $0x138] sm:$0xff] }
 0x316   :  { %11557 = vmatprep.subr.bf16.mxu0 %v11556_v6  ;;  %v3308_v27 = vld [vmem:[%s15148_s1 + $0x158] sm:$0xff]  ;;  %v3803_v62 = vand.u32 4294901760, %v3304_v57 }
 0x317   :  { %v3807_v63 = vand.u32 4294901760, %v3308_v27 }
 0x318   :  { %10936 = vmatmul.mubr.f32.vlgmr.msra.gmra.mrb[4].mxu0 %v13097_v41  ;;  %v11572_v41 = vpack.c.bf16 %v2413_v3, %v2401_v53  ;;  %v3302_v53 = vld [vmem:[%s15148_s1 + $0x128] sm:$0xff]  ;;  %v3884_v37 = vsub.f32 %v3304_v57, %v3803_v62 }
 0x319   :  { %11559 = vmatpush1.bf16.msra.mxu0 %v11558_v21  ;;  %2387 = vmatprep.mubr.f32.mxu0 %v15184_v0  ;;  %v3306_v3 = vld [vmem:[%s15148_s1 + $0x148] sm:$0xff]  ;;  %v3312_v5 = vand.u32 4294901760, %v3302_v53  ;;  %v3896_v35 = vsub.f32 %v3308_v27, %v3807_v63 }
 0x31a   :  { %11561 = vmatprep.subr.bf16.mxu0 %v11560_v22  ;;  %v3316_v17 = vand.u32 4294901760, %v3306_v3  ;;  %v3885_v59 = vand.u32 4294901760, %v3884_v37 }
 0x31b   :  { %v3393_v13 = vsub.f32 %v3302_v53, %v3312_v5 }
 0x31c   :  { %2393 = vmatmul.mubr.f32.vlgmr.msra.gmra.mrb[6].mxu0 %v13061_v50  ;;  %v3405_v14 = vsub.f32 %v3306_v3, %v3316_v17 }
 0x31d   :  { %11563 = vmatpush1.bf16.msra.mxu0 %v11562_v39  ;;  %2483 = vmatprep.mubr.f32.mxu0 %v15184_v0  ;;  %v3394_v34 = vand.u32 4294901760, %v3393_v13 }
 0x31e   :  { %11565 = vmatprep.subr.bf16.mxu0 %v11564_v38  ;;  %v3406_v22 = vand.u32 4294901760, %v3405_v14  ;;  %v11612_v9 = vpack.c.bf16 %v3405_v14, %v3393_v13 }
 0x320   :  { %v3407_v44 = vsub.f32 %v3405_v14, %v3406_v22  ;;  %v11620_v42 = vpack.c.bf16 %v3406_v22, %v3394_v34  ;;  %v11636_v14 = vpack.c.bf16 %v3896_v35, %v3884_v37 }
 0x322   :  { %v3408_v30 = vand.u32 4294901760, %v3407_v44  ;;  %v4300_v44 = vld [vmem:[%s15148_s1 + $0xf0] sm:$0xff] }
 0x324   :  { %2485 = vmatmul.mubr.f32.vlgmr.msra.gmra.mrb[6].mxu0 %v13039_v45 }
 0x325   :  { %11567 = vmatpush1.bf16.msra.mxu0 %v11566_v55  ;;  %2563 = vmatprep.mubr.f32.mxu0 %v15184_v0  ;;  %v11604_v55 = vpack.c.bf16 %v3316_v17, %v3312_v5 }
 0x326   :  { %11569 = vmatprep.subr.bf16.mxu0 %v11556_v6 }
 0x32c   :  { %2566 = vmatmul.mubr.f32.vlgmr.msra.gmra.mrb[6].mxu0 %v13042_v61 }
 0x32d   :  { %11571 = vmatpush1.bf16.msra.mxu0 %v11558_v21  ;;  %2640 = vmatprep.mubr.f32.mxu0 %v15184_v0 }
 0x32e   :  { %11573 = vmatprep.subr.bf16.mxu0 %v11572_v41  ;;  %v3395_v41 = vsub.f32 %v3393_v13, %v3394_v34 }
 0x330   :  { %v3396_v46 = vand.u32 4294901760, %v3395_v41 }
 0x332   :  { %v11608_v10 = vpack.c.bf16 %v3408_v30, %v3396_v46  ;;  %v4799_v46 = vand.u32 4294901760, %v4300_v44 }
 0x334   :  { %2644 = vmatmul.mubr.f32.vlgmr.msra.gmra.mrb[6].mxu0 %v13057_v18 }
 0x335   :  { %11575 = vmatpush1.bf16.msra.mxu0 %v11574_v28  ;;  %2726 = vmatprep.mubr.f32.mxu0 %v15184_v0 }
 0x336   :  { %11577 = vmatprep.subr.bf16.mxu0 %v11556_v6  ;;  %v3318_v6 = vand.u32 4294901760, %v3305_v40 }
 0x338   :  { %v3411_v51 = vsub.f32 %v3305_v40, %v3318_v6  ;;  %v11606_v24 = vpack.c.bf16 %v3318_v6, %v3314_v7 }
 0x33a   :  { %v3412_v38 = vand.u32 4294901760, %v3411_v51 }
 0x33c   :  { %2728 = vmatmul.mubr.f32.vlgmr.msra.gmra.mrb[6].mxu0 %v13039_v45  ;;  %v3413_v12 = vsub.f32 %v3411_v51, %v3412_v38 }
 0x33d   :  { %11579 = vmatpush1.bf16.msra.mxu0 %v11558_v21  ;;  %2802 = vmatprep.mubr.f32.mxu0 %v15184_v0  ;;  %v3399_v21 = vsub.f32 %v3301_v26, %v3314_v7 }
 0x33e   :  { %11581 = vmatprep.subr.bf16.mxu0 %v11580_v32  ;;  %v3414_v33 = vand.u32 4294901760, %v3413_v12 }
 0x33f   :  { %v3400_v39 = vand.u32 4294901760, %v3399_v21  ;;  %v11614_v4 = vpack.c.bf16 %v3411_v51, %v3399_v21 }
 0x341   :  { %v3401_v2 = vsub.f32 %v3399_v21, %v3400_v39  ;;  %v11622_v15 = vpack.c.bf16 %v3412_v38, %v3400_v39  ;;  %v4792_v21 = vpop.f32.mrb[2].mxu1  ;;  %v4301_v39 = vld [vmem:[%s15148_s1 + $0xf8] sm:$0xff] }
 0x342   :  { %v4794_v51 = vpop.f32.mrb[3].mxu1  ;;  %v4305_v38 = vld [vmem:[%s15148_s1 + $0x118] sm:$0xff] }
 0x343   :  { %v3402_v28 = vand.u32 4294901760, %v3401_v2  ;;  %v4801_v41 = vand.u32 4294901760, %v4305_v38  ;;  %v4304_v2 = vld [vmem:[%s15148_s1 + $0x110] sm:$0xff] }
 0x344   :  { %2804 = vmatmul.mubr.f32.vlgmr.msra.gmra.mrb[6].mxu0 %v13039_v45  ;;  %v4803_v30 = vand.u32 4294901760, %v4304_v2 }
 0x345   :  { %11583 = vmatpush1.bf16.msra.mxu0 %v11582_v58  ;;  %2878 = vmatprep.mubr.f32.mxu0 %v15184_v0  ;;  %v11610_v54 = vpack.c.bf16 %v3414_v33, %v3402_v28  ;;  %v13302_v28 = vsub.f32 %v4305_v38, %v4801_v41  ;;  %v13306_v33 = vsub.f32 %v4300_v44, %v4799_v46 }
 0x346   :  { %11585 = vmatprep.subr.bf16.mxu0 %v11584_v49  ;;  %v3897_v49 = vand.u32 4294901760, %v3896_v35 }
 0x348   :  { %2884 = vmatmul.mubr.f32.vlgmr.msra.gmra.mrb[8].mxu0 %v13061_v50  ;;  %v3898_v53 = vsub.f32 %v3896_v35, %v3897_v49  ;;  %v11644_v22 = vpack.c.bf16 %v3897_v49, %v3885_v59  ;;  %v13338_v49 = vld [vmem:[#allocation2 + $0x170] sm:$0xff] }
 0x349   :  { %11587 = vmatpush1.bf16.msra.mxu0 %v11586_v8  ;;  %2974 = vmatprep.mubr.f32.mxu0 %v15184_v0 }
 0x34a   :  { %11589 = vmatprep.subr.bf16.mxu0 %v11588_v43  ;;  %v3903_v43 = vand.u32 4294901760, %v3902_v36  ;;  %v3899_v26 = vand.u32 4294901760, %v3898_v53  ;;  %v13343_v53 = vld [vmem:[#allocation2 + $0x178] sm:$0xff] }
 0x34c   :  { %v3904_v5 = vsub.f32 %v3902_v36, %v3903_v43 }
 0x34e   :  { %v3905_v7 = vand.u32 4294901760, %v3904_v5  ;;  %v13346_v5 = vld [vmem:[#allocation2 + $0xf0] sm:$0xff] }
 0x350   :  { %2976 = vmatmul.mubr.f32.vlgmr.msra.gmra.mrb[8].mxu0 %v13039_v45 }
 0x351   :  { %11591 = vmatpush1.bf16.msra.mxu0 %v11590_v52  ;;  %3054 = vmatprep.mubr.f32.mxu0 %v15184_v0  ;;  %v11628_v52 = vpack.c.bf16 %v3807_v63, %v3803_v62 }
 0x352   :  { %11593 = vmatprep.subr.bf16.mxu0 %v11580_v32 }
 0x358   :  { %3057 = vmatmul.mubr.f32.vlgmr.msra.gmra.mrb[8].mxu0 %v13042_v61 }
 0x359   :  { %11595 = vmatpush1.bf16.msra.mxu0 %v11582_v58  ;;  %3131 = vmatprep.mubr.f32.mxu0 %v15184_v0 }
 0x35a   :  { %11597 = vmatprep.subr.bf16.mxu0 %v11596_v23  ;;  %v3886_v23 = vsub.f32 %v3884_v37, %v3885_v59 }
 0x35c   :  { %v3887_v17 = vand.u32 4294901760, %v3886_v23 }
 0x35e   :  { %v11632_v6 = vpack.c.bf16 %v3899_v26, %v3887_v17  ;;  %v13348_v17 = vld [vmem:[#allocation2 + $0xf8] sm:$0xff] }
 0x360   :  { %3135 = vmatmul.mubr.f32.vlgmr.msra.gmra.mrb[8].mxu0 %v13057_v18 }
 0x361   :  { %11599 = vmatpush1.bf16.msra.mxu0 %v11598_v20  ;;  %3217 = vmatprep.mubr.f32.mxu0 %v15184_v0 }
 0x362   :  { %11601 = vmatprep.subr.bf16.mxu0 %v11580_v32  ;;  %v3303_v32 = vld [vmem:[%s15148_s1 + $0x130] sm:$0xff] }
 0x363   :  { %v3805_v16 = vand.u32 4294901760, %v3303_v32 }
 0x365   :  { %v11630_v40 = vpack.c.bf16 %v3809_v60, %v3805_v16  ;;  %v13333_v60 = vpack.c.bf16 %v4803_v30, %v4799_v46 }
 0x368   :  { %3219 = vmatmul.mubr.f32.vlgmr.msra.gmra.mrb[8].mxu0 %v13039_v45 }
 0x369   :  { %11603 = vmatpush1.bf16.msra.mxu0 %v11582_v58  ;;  %3293 = vmatprep.mubr.f32.mxu0 %v15184_v0  ;;  %v3890_v58 = vsub.f32 %v3303_v32, %v3805_v16  ;;  %v13331_v16 = vld [vmem:[#allocation2 + $0xe0] sm:$0xff] }
 0x36a   :  { %11605 = vmatprep.subr.bf16.mxu0 %v11604_v55  ;;  %v6387_v59 = vand.u32 4294901760, %v13331_v16 }
 0x36b   :  { %v3891_v8 = vand.u32 4294901760, %v3890_v58  ;;  %v11638_v34 = vpack.c.bf16 %v3902_v36, %v3890_v58  ;;  %v13335_v36 = vld [vmem:[#allocation2 + $0xe8] sm:$0xff] }
 0x36c   :  { %v6390_v23 = vand.u32 4294901760, %v13335_v36 }
 0x36d   :  { %v3892_v3 = vsub.f32 %v3890_v58, %v3891_v8  ;;  %v11646_v12 = vpack.c.bf16 %v3903_v43, %v3891_v8 }
 0x36f   :  { %v3893_v20 = vand.u32 4294901760, %v3892_v3  ;;  %v6441_v3 = vand.u32 4294901760, %v13338_v49 }
 0x370   :  { %3295 = vmatmul.mubr.f32.vlgmr.msra.gmra.mrb[8].mxu0 %v13039_v45 }
 0x371   :  { %11607 = vmatpush1.bf16.msra.mxu0 %v11606_v24  ;;  %3380 = vmatprep.mubr.f32.mxu0 %v15184_v0  ;;  %v11634_v13 = vpack.c.bf16 %v3905_v7, %v3893_v20  ;;  %v13359_v20 = vsub.f32 %v13335_v36, %v6390_v23  ;;  %v6444_v7 = vand.u32 4294901760, %v13343_v53 }
 0x372   :  { %11609 = vmatprep.subr.bf16.mxu0 %v11608_v10  ;;  %v13308_v10 = vsub.f32 %v4304_v2, %v4803_v30 }
 0x373   :  { %v15166_v38 = vand.u32 4294901760, %v13359_v20 }
 0x374   :  { %3386 = vmatmul.mubr.f32.vlgmr.msra.gmra.mrb[10].mxu0 %v13114_v48 }
 0x375   :  { %11611 = vmatpush1.bf16.msra.mxu0 %v11610_v54  ;;  %3476 = vmatprep.mubr.f32.mxu0 %v15184_v0  ;;  %v6509_v46 = vsub.f32 %v13359_v20, %v15166_v38 }
 0x376   :  { %11613 = vmatprep.subr.bf16.mxu0 %v11612_v9  ;;  %v4891_v9 = vand.u32 4294901760, %v13302_v28 }
 0x378   :  { %v4892_v62 = vsub.f32 %v13302_v28, %v4891_v9 }
 0x37c   :  { %3478 = vmatmul.mubr.f32.vlgmr.msra.gmra.mrb[10].mxu0 %v13075_v47 }
 0x37d   :  { %11615 = vmatpush1.bf16.msra.mxu0 %v11614_v4  ;;  %3556 = vmatprep.mubr.f32.mxu0 %v15184_v0  ;;  %v4885_v4 = vand.u32 4294901760, %v13306_v33 }
 0x37e   :  { %11617 = vmatprep.subr.bf16.mxu0 %v11604_v55 }
 0x37f   :  { %v4886_v63 = vsub.f32 %v13306_v33, %v4885_v4 }
 0x381   :  { %v4887_v37 = vand.u32 4294901760, %v4886_v63  ;;  %v6337_v63 = vld [vmem:[#allocation2 + $0x180] sm:$0xff] }
 0x384   :  { %3559 = vmatmul.mubr.f32.vlgmr.msra.gmra.mrb[10].mxu0 %v13086_v19 }
 0x385   :  { %11619 = vmatpush1.bf16.msra.mxu0 %v11606_v24  ;;  %3633 = vmatprep.mubr.f32.mxu0 %v15184_v0 }
 0x386   :  { %11621 = vmatprep.subr.bf16.mxu0 %v11620_v42  ;;  %v4897_v42 = vand.u32 4294901760, %v13308_v10 }
 0x388   :  { %v4898_v32 = vsub.f32 %v13308_v10, %v4897_v42 }
 0x38a   :  { %v4899_v35 = vand.u32 4294901760, %v4898_v32 }
 0x38c   :  { %3637 = vmatmul.mubr.f32.vlgmr.msra.gmra.mrb[10].mxu0 %v13103_v29 }
 0x38d   :  { %11623 = vmatpush1.bf16.msra.mxu0 %v11622_v15  ;;  %3719 = vmatprep.mubr.f32.mxu0 %v15184_v0  ;;  %v4893_v15 = vand.u32 4294901760, %v4892_v62 }
 0x38e   :  { %11625 = vmatprep.subr.bf16.mxu0 %v11604_v55  ;;  %v4797_v55 = vand.u32 4294901760, %v4301_v39 }
 0x390   :  { %v13314_v57 = vpack.c.bf16 %v4801_v41, %v4797_v55  ;;  %v13379_v41 = vsub.f32 %v13343_v53, %v6444_v7 }
 0x394   :  { %3721 = vmatmul.mubr.f32.vlgmr.msra.gmra.mrb[10].mxu0 %v13075_v47 }
 0x395   :  { %11627 = vmatpush1.bf16.msra.mxu0 %v11606_v24  ;;  %3795 = vmatprep.mubr.f32.mxu0 %v15184_v0  ;;  %v13300_v24 = vsub.f32 %v4301_v39, %v4797_v55  ;;  %v13374_v39 = vld [vmem:[#allocation2 + $0x168] sm:$0xff] }
 0x396   :  { %11629 = vmatprep.subr.bf16.mxu0 %v11628_v52 }
 0x397   :  { %v4879_v54 = vand.u32 4294901760, %v13300_v24 }
 0x399   :  { %v4880_v27 = vsub.f32 %v13300_v24, %v4879_v54 }
 0x39b   :  { %v4881_v31 = vand.u32 4294901760, %v4880_v27  ;;  %v15164_v27 = vand.u32 4294901760, %v13379_v41 }
 0x39c   :  { %3797 = vmatmul.mubr.f32.vlgmr.msra.gmra.mrb[10].mxu0 %v13075_v47 }
 0x39d   :  { %11631 = vmatpush1.bf16.msra.mxu0 %v11630_v40  ;;  %3871 = vmatprep.mubr.f32.mxu0 %v15184_v0  ;;  %v11680_v8 = vpack.c.bf16 %v4893_v15, %v4881_v31  ;;  %v6635_v36 = vsub.f32 %v13379_v41, %v15164_v27 }
 0x39e   :  { %11633 = vmatprep.subr.bf16.mxu0 %v11632_v6  ;;  %v13363_v6 = vsub.f32 %v13338_v49, %v6441_v3 }
 0x3a0   :  { %3877 = vmatmul.mubr.f32.vlgmr.msra.gmra.mrb[12].mxu0 %v13114_v48  ;;  %v15165_v55 = vand.u32 4294901760, %v13363_v6 }
 0x3a1   :  { %11635 = vmatpush1.bf16.msra.mxu0 %v11634_v13  ;;  %3967 = vmatprep.mubr.f32.mxu0 %v15184_v0  ;;  %v6393_v13 = vand.u32 4294901760, %v13346_v5 }
 0x3a2   :  { %11637 = vmatprep.subr.bf16.mxu0 %v11636_v14  ;;  %v11682_v14 = vpack.c.bf16 %v4899_v35, %v4887_v37  ;;  %v6628_v30 = vsub.f32 %v13363_v6, %v15165_v55  ;;  %v6338_v37 = vld [vmem:[#allocation2 + $0x188] sm:$0xff]  ;;  %v6510_v35 = vand.u32 4294901760, %v6509_v46 }
 0x3a3   :  { %v13382_v44 = vsub.f32 %v13346_v5, %v6393_v13 }
 0x3a5   :  { %v15162_v62 = vand.u32 4294901760, %v13382_v44 }
 0x3a7   :  { %v6516_v49 = vsub.f32 %v13382_v44, %v15162_v62 }
 0x3a8   :  { %3969 = vmatmul.mubr.f32.vlgmr.msra.gmra.mrb[12].mxu0 %v13075_v47 }
 0x3a9   :  { %11639 = vmatpush1.bf16.msra.mxu0 %v11638_v34  ;;  %4047 = vmatprep.mubr.f32.mxu0 %v15184_v0  ;;  %v6396_v34 = vand.u32 4294901760, %v13348_v17  ;;  %v6517_v46 = vand.u32 4294901760, %v6516_v49 }
 0x3aa   :  { %11641 = vmatprep.subr.bf16.mxu0 %v11628_v52 }
 0x3b0   :  { %4050 = vmatmul.mubr.f32.vlgmr.msra.gmra.mrb[12].mxu0 %v13086_v19 }
 0x3b1   :  { %11643 = vmatpush1.bf16.msra.mxu0 %v11630_v40  ;;  %4124 = vmatprep.mubr.f32.mxu0 %v15184_v0 }
 0x3b2   :  { %11645 = vmatprep.subr.bf16.mxu0 %v11644_v22  ;;  %v13372_v22 = vld [vmem:[#allocation2 + $0x160] sm:$0xff] }
 0x3b3   :  { %v15183_v32 = vand.u32 4294901760, %v13372_v22 }
 0x3b8   :  { %4128 = vmatmul.mubr.f32.vlgmr.msra.gmra.mrb[12].mxu0 %v13103_v29 }
 0x3b9   :  { %11647 = vmatpush1.bf16.msra.mxu0 %v11646_v12  ;;  %4210 = vmatprep.mubr.f32.mxu0 %v15184_v0  ;;  %v13388_v12 = vsub.f32 %v13348_v17, %v6396_v34  ;;  %v6447_v17 = vand.u32 4294901760, %v6337_v63 }
 0x3ba   :  { %11649 = vmatprep.subr.bf16.mxu0 %v11628_v52 }
 0x3bb   :  { %v5782_v58 = vpop.f32.mrb[4].mxu1  ;;  %v15163_v15 = vand.u32 4294901760, %v13388_v12  ;;  %v13423_v62 = vsub.f32 %v6337_v63, %v6447_v17 }
 0x3bc   :  { %v13340_v43 = vmul.f32 %v5782_v58, %v4792_v21  ;;  %v5784_v52 = vpop.f32.mrb[5].mxu1  ;;  %v11684_v21 = vpack.c.bf16 %v13302_v28, %v13300_v24  ;;  %v6629_v58 = vand.u32 4294901760, %v6628_v30  ;;  %v6450_v30 = vand.u32 4294901760, %v6338_v37 }
 0x3bd   :  { %v13350_v26 = vmul.f32 %v5784_v52, %v4794_v51  ;;  %v11686_v52 = vpack.c.bf16 %v13308_v10, %v13306_v33  ;;  %v6523_v53 = vsub.f32 %v13388_v12, %v15163_v15  ;;  %v13427_v15 = vpack.c.bf16 %v6390_v23, %v6387_v59 }
 0x3be   :  { %v13431_v38 = vsub.f32 %v6338_v37, %v6450_v30  ;;  %v13446_v23 = vpack.c.bf16 %v6396_v34, %v6393_v13 }
 0x3bf   :  { %v6524_v1 = vand.u32 4294901760, %v6523_v53  ;;  %v11692_v53 = vpack.c.bf16 %v4891_v9, %v4879_v54  ;;  %v5290_v9 = vld [vmem:[%s15148_s1 + $0x170] sm:$0xff] }
 0x3c0   :  { %4212 = vmatmul.mubr.f32.vlgmr.msra.gmra.mrb[12].mxu0 %v13075_v47 }
 0x3c1   :  { %11651 = vmatpush1.bf16.msra.mxu0 %v11630_v40  ;;  %4286 = vmatprep.mubr.f32.mxu0 %v15184_v0  ;;  %v13355_v40 = vsub.f32 %v13331_v16, %v6387_v59  ;;  %v15170_v16 = vand.u32 4294901760, %v13431_v38 }
 0x3c2   :  { %11677 = vmatprep.subr.bf16.mxu0 %v13314_v57 }
 0x3c3   :  { %v15167_v51 = vand.u32 4294901760, %v13355_v40 }
 0x3c5   :  { %v6502_v2 = vsub.f32 %v13355_v40, %v15167_v51 }
 0x3c7   :  { %v6503_v31 = vand.u32 4294901760, %v6502_v2  ;;  %v6636_v2 = vand.u32 4294901760, %v6635_v36  ;;  %v15171_v36 = vand.u32 4294901760, %v13423_v62 }
 0x3c8   :  { %4288 = vmatmul.mubr.f32.vlgmr.msra.gmra.mrb[12].mxu0 %v13075_v47 }
 0x3c9   :  { %11679 = vmatpush1.bf16.msra.mxu0 %v13333_v60  ;;  %4865 = vmatprep.mubr.f32.mxu0 %v15184_v0  ;;  %v13429_v55 = vpack.c.bf16 %v6636_v2, %v6629_v58 }
 0x3ca   :  { %11681 = vmatprep.subr.bf16.mxu0 %v11680_v8  ;;  %v6321_v8 = vld [vmem:[#allocation2 + $0x100] sm:$0xff] }
 0x3cb   :  { %v6399_v27 = vand.u32 4294901760, %v6321_v8 }
 0x3cc   :  { %4871 = vmatmul.mubr.f32.vlgmr.msra.gmra.mrb[14].mxu0 %v13061_v50  ;;  %v15178_v50 = vand.u32 4294901760, %v13374_v39 }
 0x3cd   :  { %11683 = vmatpush1.bf16.msra.mxu0 %v11682_v14  ;;  %4961 = vmatprep.mubr.f32.mxu0 %v15184_v0  ;;  %v6322_v14 = vld [vmem:[#allocation2 + $0x108] sm:$0xff]  ;;  %v13439_v63 = vsub.f32 %v6321_v8, %v6399_v27 }
 0x3ce   :  { %11685 = vmatprep.subr.bf16.mxu0 %v11684_v21  ;;  %v13418_v5 = vpack.c.bf16 %v15178_v50, %v15183_v32  ;;  %v13420_v21 = vpack.c.bf16 %v6510_v35, %v6503_v31  ;;  %v6402_v51 = vand.u32 4294901760, %v6322_v14  ;;  %v13433_v31 = vpack.c.bf16 %v6444_v7, %v6441_v3  ;;  %v13577_v32 = vld [vmem:[#allocation2 + $0x130] sm:$0xff] }
 0x3cf   :  { %v13435_v35 = vpack.c.bf16 %v6524_v1, %v6517_v46  ;;  %v6642_v1 = vsub.f32 %v13423_v62, %v15171_v36  ;;  %v15169_v3 = vand.u32 4294901760, %v13439_v63  ;;  %v6649_v7 = vsub.f32 %v13431_v38, %v15170_v16  ;;  %v5291_v46 = vld [vmem:[%s15148_s1 + $0x178] sm:$0xff]  ;;  %v13548_v36 = vld [vmem:[#allocation2 + $0x120] sm:$0xff] }
 0x3d0   :  { %11749 = vmatprep.subr.bf16.mxu1 %v13418_v5  ;;  %v13443_v59 = vsub.f32 %v6322_v14, %v6402_v51  ;;  %v13483_v24 = vpack.c.bf16 %v6402_v51, %v6399_v27  ;;  %v5787_v28 = vand.u32 4294901760, %v5291_v46  ;;  %v5789_v51 = vand.u32 4294901760, %v5290_v9 }
 0x3d1   :  { %11751 = vmatpush3.bf16.msra.mxu1 %v13427_v15  ;;  %v6643_v58 = vand.u32 4294901760, %v6642_v1  ;;  %v6530_v13 = vsub.f32 %v13439_v63, %v15169_v3  ;;  %v6650_v34 = vand.u32 4294901760, %v6649_v7  ;;  %v5295_v1 = vld [vmem:[%s15148_s1 + $0x198] sm:$0xff]  ;;  %v13538_v3 = vld [vmem:[#allocation2 + $0x1a8] sm:$0xff] }
 0x3d2   :  { %11753 = vmatprep.subr.bf16.mxu1 %v13433_v31  ;;  %v15168_v37 = vand.u32 4294901760, %v13443_v59  ;;  %15383 = vst [vmem:[#allocation7_spill] sm:$0xff] %v13483_v24  ;;  %v5791_v54 = vand.u32 4294901760, %v5295_v1  ;;  %v13498_v7 = vsub.f32 %v5291_v46, %v5787_v28 }
 0x3d3   :  { %v6531_v8 = vand.u32 4294901760, %v6530_v13  ;;  %v13471_v14 = vpack.c.bf16 %v6650_v34, %v6643_v58  ;;  %v13504_v13 = vsub.f32 %v5290_v9, %v5789_v51 }
 0x3d4   :  { %4963 = vmatmul.mubr.f32.vlgmr.msra.gmra.mrb[14].mxu0 %v13039_v45  ;;  %v6537_v49 = vsub.f32 %v13443_v59, %v15168_v37  ;;  %v13500_v58 = vsub.f32 %v5295_v1, %v5791_v54  ;;  %v15177_v33 = vand.u32 4294901760, %v13498_v7  ;;  %v13536_v37 = vld [vmem:[#allocation2 + $0x1a0] sm:$0xff] }
 0x3d5   :  { %11687 = vmatpush1.bf16.msra.mxu0 %v11686_v52  ;;  %5041 = vmatprep.mubr.f32.mxu0 %v15184_v0  ;;  %v13465_v52 = vpack.c.bf16 %v6450_v30, %v6447_v17  ;;  %v5294_v30 = vld [vmem:[%s15148_s1 + $0x190] sm:$0xff] }
 0x3d6   :  { %11689 = vmatprep.subr.bf16.mxu0 %v13314_v57  ;;  %11755 = vmatpush3.bf16.msra.mxu1 %v13446_v23  ;;  %v6538_v2 = vand.u32 4294901760, %v6537_v49  ;;  %v5793_v27 = vand.u32 4294901760, %v5294_v30  ;;  %v15174_v10 = vand.u32 4294901760, %v13500_v58  ;;  %v15175_v49 = vand.u32 4294901760, %v13504_v13 }
 0x3d7   :  { %15382 = vst [vmem:[#allocation6_spill] sm:$0xff] %v13465_v52  ;;  %11757 = vmatprep.subr.bf16.mxu1 %v13465_v52  ;;  %v15401_v52 = vand.u32 4294901760, %v13374_v39 }
 0x3d8   :  { %v13481_v17 = vpack.c.bf16 %v6538_v2, %v6531_v8  ;;  %v13506_v34 = vsub.f32 %v5294_v30, %v5793_v27  ;;  %v13517_v8 = vld [vmem:[#allocation2 + $0x110] sm:$0xff]  ;;  %v13521_v2 = vpack.c.bf16 %v5791_v54, %v5787_v28  ;;  %v5882_v46 = vsub.f32 %v13500_v58, %v15174_v10 }
 0x3d9   :  { %v15182_v28 = vand.u32 4294901760, %v13517_v8  ;;  %v5876_v16 = vsub.f32 %v13504_v13, %v15175_v49 }
 0x3da   :  { %11759 = vmatpush3.bf16.msra.mxu1 %v13483_v24  ;;  %v5883_v10 = vand.u32 4294901760, %v5882_v46  ;;  %v13575_v46 = vpack.c.bf16 %v5793_v27, %v5789_v51  ;;  %v15200_v27 = vand.u32 4294901760, %v13577_v32  ;;  %v13632_v24 = vld [vmem:[#allocation2 + $0x1d8] sm:$0xff] }
 0x3dc   :  { %5044 = vmatmul.mubr.f32.vlgmr.msra.gmra.mrb[14].mxu0 %v13042_v61  ;;  %v11694_v61 = vpack.c.bf16 %v4897_v42, %v4885_v4  ;;  %v13511_v4 = vld [vmem:[#allocation2 + $0x190] sm:$0xff]  ;;  %v13513_v42 = vld [vmem:[#allocation2 + $0x198] sm:$0xff] }
 0x3dd   :  { %11691 = vmatpush1.bf16.msra.mxu0 %v13333_v60  ;;  %5118 = vmatprep.mubr.f32.mxu0 %v15184_v0  ;;  %v15180_v9 = vand.u32 4294901760, %v13511_v4  ;;  %v15179_v30 = vand.u32 4294901760, %v13513_v42 }
 0x3de   :  { %11693 = vmatprep.subr.bf16.mxu0 %v11692_v53  ;;  %v13519_v53 = vld [vmem:[#allocation2 + $0x118] sm:$0xff] }
 0x3df   :  { %v15181_v54 = vand.u32 4294901760, %v13519_v53  ;;  %v13556_v56 = vpack.c.bf16 %v15179_v30, %v15180_v9  ;;  %v13570_v9 = vld [vmem:[#allocation2 + $0x1b0] sm:$0xff] }
 0x3e1   :  { %15385 = vst [vmem:[#allocation9_spill] sm:$0xff] %v13556_v56  ;;  %v13563_v49 = vpack.c.bf16 %v15181_v54, %v15182_v28  ;;  %11761 = vmatprep.subr.bf16.mxu1 %v13556_v56  ;;  %v5877_v54 = vand.u32 4294901760, %v5876_v16  ;;  %v15389_v56 = vand.u32 4294901760, %v13550_v11  ;;  %v15197_v16 = vand.u32 4294901760, %v13570_v9 }
 0x3e3   :  { %15386 = vst [vmem:[#allocation10_spill] sm:$0xff] %v13563_v49  ;;  %11763 = vmatpush3.bf16.msra.mxu1 %v13563_v49 }
 0x3e4   :  { %5122 = vmatmul.mubr.f32.vlgmr.msra.gmra.mrb[14].mxu0 %v13057_v18  ;;  %v15176_v18 = vand.u32 4294901760, %v13506_v34 }
 0x3e5   :  { %11695 = vmatpush1.bf16.msra.mxu0 %v11694_v61  ;;  %5204 = vmatprep.mubr.f32.mxu0 %v15184_v0 }
 0x3e6   :  { %11697 = vmatprep.subr.bf16.mxu0 %v13314_v57  ;;  %v5870_v57 = vsub.f32 %v13498_v7, %v15177_v33  ;;  %v15190_v33 = vand.u32 4294901760, %v13538_v3 }
 0x3eb   :  { %v13529_v1 = vpop.f32.mrb[4].mxu0 }
 0x3ec   :  { %15384 = vst [vmem:[#allocation8_spill] sm:$0xff] %v13529_v1  ;;  %v10937_v61 = vpop.f32.mrb[5].mxu0  ;;  %5206 = vmatmul.mubr.f32.vlgmr.msra.gmra.mrb[14].mxu0 %v13039_v45  ;;  %v15388_v1 = vand.u32 4294901760, %v13548_v36 }
 0x3ed   :  { %11699 = vmatpush1.bf16.msra.mxu0 %v13333_v60  ;;  %5280 = vmatprep.mubr.f32.mxu0 %v15184_v0  ;;  %v5888_v61 = vsub.f32 %v13506_v34, %v15176_v18  ;;  %v5871_v60 = vand.u32 4294901760, %v5870_v57  ;;  %v15191_v18 = vand.u32 4294901760, %v13536_v37  ;;  %v13572_v57 = vld [vmem:[#allocation2 + $0x1b8] sm:$0xff] }
 0x3ee   :  { %11725 = vmatprep.subr.bf16.mxu0 %v13521_v2  ;;  %v13579_v0 = vld [vmem:[#allocation2 + $0x138] sm:$0xff]  ;;  %v13591_v49 = vpack.c.bf16 %v15389_v56, %v15388_v1  ;;  %v15196_v51 = vand.u32 4294901760, %v13572_v57  ;;  %v15391_v56 = vmov 0.0  }
 0x3ef   :  { %v5889_v28 = vand.u32 4294901760, %v5888_v61  ;;  %v13585_v50 = vpack.c.bf16 %v15190_v33, %v15191_v18  ;;  %v11728_v30 = vpack.c.bf16 %v5883_v10, %v5871_v60  ;;  %v13599_v33 = vld [vmem:[#allocation2 + $0x1c0] sm:$0xff]  ;;  %v13601_v10 = vld [vmem:[#allocation2 + $0x1c8] sm:$0xff]  ;;  %v11732_v61 = vpack.c.bf16 %v13500_v58, %v13498_v7 }
 0x3f0   :  { %15390 = vst [vmem:[#allocation12_spill] sm:$0xff] %v13591_v49  ;;  %v13606_v60 = vld [vmem:[#allocation2 + $0x140] sm:$0xff]  ;;  %v13608_v18 = vld [vmem:[#allocation2 + $0x148] sm:$0xff] }
 0x3f1   :  { %15387 = vst [vmem:[#allocation11_spill] sm:$0xff] %v13585_v50  ;;  %11765 = vmatprep.subr.bf16.mxu1 %v13585_v50  ;;  %v11730_v1 = vpack.c.bf16 %v5889_v28, %v5877_v54  ;;  %v15206_v28 = vand.u32 4294901760, %v13599_v33  ;;  %v15205_v54 = vand.u32 4294901760, %v13601_v10 }
 0x3f2   :  { %11767 = vmatpush3.bf16.msra.mxu1 %v13591_v49  ;;  %v15393_v49 = vand.u32 4294901760, %v13579_v0 }
 0x3f4   :  { %5282 = vmatmul.mubr.f32.vlgmr.msra.gmra.mrb[14].mxu0 %v13039_v45  ;;  %v13614_v45 = vpack.c.bf16 %v15196_v51, %v15197_v16  ;;  %v13622_v50 = vpack.c.bf16 %v15393_v49, %v15200_v27  ;;  %v15208_v51 = vand.u32 4294901760, %v13606_v60  ;;  %v13630_v16 = vld [vmem:[#allocation2 + $0x1d0] sm:$0xff]  ;;  %v13640_v49 = vpack.c.bf16 %v15205_v54, %v15206_v28  ;;  %v13644_v27 = vld [vmem:[#allocation2 + $0x158] sm:$0xff] }
 0x3f5   :  { %11727 = vmatpush1.bf16.msra.mxu0 %v13575_v46  ;;  %5855 = vmatprep.mubr.f32.mxu0 %v15391_v56  ;;  %v15216_v28 = vand.u32 4294901760, %v13644_v27 }
 0x3f6   :  { %15392 = vst [vmem:[#allocation13_spill] sm:$0xff] %v13614_v45  ;;  %11729 = vmatprep.subr.bf16.mxu0 %v11728_v30  ;;  %15394 = vst [vmem:[#allocation14_spill] sm:$0xff] %v13622_v50  ;;  %11769 = vmatprep.subr.bf16.mxu1 %v13614_v45  ;;  %v15207_v30 = vand.u32 4294901760, %v13608_v18 }
 0x3f7   :  { %11771 = vmatpush3.bf16.msra.mxu1 %v13622_v50  ;;  %15395 = vst [vmem:[#allocation15_spill] sm:$0xff] %v13640_v49  ;;  %v15215_v50 = vand.u32 4294901760, %v13632_v24 }
 0x3f8   :  { %5861 = vmatmul.mubr.f32.vlgmr.msra.gmra.mrb[16].mxu0 %v13114_v48  ;;  %v13642_v48 = vld [vmem:[#allocation2 + $0x150] sm:$0xff]  ;;  %v13650_v45 = vpack.c.bf16 %v15207_v30, %v15208_v51  ;;  %11773 = vmatprep.subr.bf16.mxu1 %v13640_v49 }
 0x3f9   :  { %11731 = vmatpush1.bf16.msra.mxu0 %v11730_v1  ;;  %5951 = vmatprep.mubr.f32.mxu0 %v15391_v56  ;;  %v15218_v1 = vand.u32 4294901760, %v13630_v16  ;;  %v15217_v54 = vand.u32 4294901760, %v13642_v48 }
 0x3fa   :  { %11733 = vmatprep.subr.bf16.mxu0 %v11732_v61  ;;  %15396 = vst [vmem:[#allocation16_spill] sm:$0xff] %v13650_v45  ;;  %v11734_v61 = vpack.c.bf16 %v13506_v34, %v13504_v13 }
 0x3fb   :  { %11775 = vmatpush3.bf16.msra.mxu1 %v13650_v45  ;;  %v13664_v30 = vpack.c.bf16 %v15215_v50, %v15218_v1  ;;  %v13671_v51 = vpack.c.bf16 %v15216_v28, %v15217_v54  ;;  %v15399_v45 = vand.u32 4294901760, %v13372_v22  ;;  %v13682_v50 = vsub.f32 %v13374_v39, %v15401_v52 }
 0x3fc   :  { %v15408_v54 = vand.u32 4294901760, %v13519_v53 }
 0x3fd   :  { %15397 = vst [vmem:[#allocation17_spill] sm:$0xff] %v13664_v30  ;;  %11777 = vmatprep.subr.bf16.mxu1 %v13664_v30  ;;  %15398 = vst [vmem:[#allocation18_spill] sm:$0xff] %v13671_v51  ;;  %v13677_v49 = vsub.f32 %v13372_v22, %v15399_v45  ;;  %v15403_v22 = vand.u32 4294901760, %v13498_v7  ;;  %v15404_v45 = vand.u32 4294901760, %v13500_v58 }
 0x3fe   :  { %15402 = vst [vmem:[#allocation20_spill] sm:$0xff] %v13682_v50  ;;  %v13726_v1 = vsub.f32 %v13519_v53, %v15408_v54  ;;  %v15412_v54 = vand.u32 4294901760, %v13536_v37  ;;  %v15428_v53 = vand.u32 4294901760, %v13644_v27 }
 0x3ff   :  { %15400 = vst [vmem:[#allocation19_spill] sm:$0xff] %v13677_v49  ;;  %11779 = vmatpush3.bf16.msra.mxu1 %v13671_v51  ;;  %v11812_v28 = vpack.c.bf16 %v13682_v50, %v13677_v49  ;;  %v11740_v39 = vpack.c.bf16 %v15404_v45, %v15403_v22  ;;  %v15219_v7 = vand.u32 4294901760, %v13677_v49  ;;  %v15405_v45 = vand.u32 4294901760, %v13511_v4 }
 0x400   :  { %5953 = vmatmul.mubr.f32.vlgmr.msra.gmra.mrb[16].mxu0 %v13075_v47  ;;  %v15409_v22 = vand.u32 4294901760, %v13504_v13  ;;  %v13745_v13 = vsub.f32 %v13536_v37, %v15412_v54  ;;  %v13848_v58 = vsub.f32 %v13644_v27, %v15428_v53 }
 0x401   :  { %11735 = vmatpush1.bf16.msra.mxu0 %v11734_v61  ;;  %6031 = vmatprep.mubr.f32.mxu0 %v15391_v56  ;;  %v13711_v61 = vsub.f32 %v13511_v4, %v15405_v45  ;;  %v15410_v4 = vand.u32 4294901760, %v13506_v34  ;;  %v15413_v34 = vand.u32 4294901760, %v13538_v3 }
 0x402   :  { %11737 = vmatprep.subr.bf16.mxu0 %v13521_v2  ;;  %11813 = vmatprep.subr.bf16.mxu1 %v11812_v28  ;;  %v15407_v28 = vand.u32 4294901760, %v13517_v8 }
 0x403   :  { %v11742_v45 = vpack.c.bf16 %v15410_v4, %v15409_v22  ;;  %v13750_v22 = vsub.f32 %v13538_v3, %v15413_v34 }
 0x408   :  { %6034 = vmatmul.mubr.f32.vlgmr.msra.gmra.mrb[16].mxu0 %v13086_v19  ;;  %v15406_v19 = vand.u32 4294901760, %v13513_v42 }
 0x409   :  { %11739 = vmatpush1.bf16.msra.mxu0 %v13575_v46  ;;  %6108 = vmatprep.mubr.f32.mxu0 %v15391_v56 }
 0x40a   :  { %11741 = vmatprep.subr.bf16.mxu0 %v11740_v39  ;;  %v13716_v52 = vsub.f32 %v13513_v42, %v15406_v19  ;;  %v13721_v39 = vsub.f32 %v13517_v8, %v15407_v28  ;;  %v6614_v42 = vsub.f32 %v13677_v49, %v15219_v7  ;;  %v15411_v8 = vand.u32 4294901760, %v13682_v50 }
 0x40b   :  { %v15414_v19 = vand.u32 4294901760, %v13548_v36 }
 0x40c   :  { %v6621_v28 = vsub.f32 %v13682_v50, %v15411_v8  ;;  %v15415_v8 = vand.u32 4294901760, %v13550_v11  ;;  %v6615_v3 = vand.u32 4294901760, %v6614_v42 }
 0x40d   :  { %v13756_v4 = vsub.f32 %v13548_v36, %v15414_v19  ;;  %v15416_v36 = vand.u32 4294901760, %v13570_v9  ;;  %v15419_v19 = vand.u32 4294901760, %v13577_v32 }
 0x40e   :  { %v13761_v7 = vsub.f32 %v13550_v11, %v15415_v8  ;;  %v15418_v11 = vand.u32 4294901760, %v13572_v57 }
 0x40f   :  { %v13772_v34 = vsub.f32 %v13570_v9, %v15416_v36  ;;  %v13782_v8 = vsub.f32 %v13577_v32, %v15419_v19  ;;  %v15421_v32 = vand.u32 4294901760, %v13599_v33 }
 0x410   :  { %6112 = vmatmul.mubr.f32.vlgmr.msra.gmra.mrb[16].mxu0 %v13103_v29  ;;  %v6622_v29 = vand.u32 4294901760, %v6621_v28  ;;  %v15224_v28 = vand.u32 4294901760, %v13745_v13 }
 0x411   :  { %11743 = vmatpush1.bf16.msra.mxu0 %v11742_v45  ;;  %6194 = vmatprep.mubr.f32.mxu0 %v15391_v56  ;;  %15417 = vst [vmem:[#allocation21_spill] sm:$0xff] %v13772_v34  ;;  %v13777_v45 = vsub.f32 %v13572_v57, %v15418_v11  ;;  %v13801_v11 = vsub.f32 %v13599_v33, %v15421_v32  ;;  %v15221_v33 = vand.u32 4294901760, %v13711_v61  ;;  %v15427_v32 = vand.u32 4294901760, %v13642_v48 }
 0x412   :  { %11745 = vmatprep.subr.bf16.mxu0 %v13521_v2  ;;  %v15420_v2 = vand.u32 4294901760, %v13579_v0  ;;  %v11780_v9 = vpack.c.bf16 %v6622_v29, %v6615_v3  ;;  %v15423_v3 = vand.u32 4294901760, %v13606_v60  ;;  %v15231_v27 = vand.u32 4294901760, %v13772_v34 }
 0x413   :  { %v13843_v37 = vsub.f32 %v13642_v48, %v15427_v32  ;;  %v15229_v48 = vand.u32 4294901760, %v13761_v7  ;;  %v15236_v53 = vand.u32 4294901760, %v13777_v45  ;;  %v6670_v32 = vsub.f32 %v13745_v13, %v15224_v28 }
 0x414   :  { %v13787_v42 = vsub.f32 %v13579_v0, %v15420_v2  ;;  %v15422_v0 = vand.u32 4294901760, %v13601_v10  ;;  %v13813_v29 = vsub.f32 %v13606_v60, %v15423_v3  ;;  %v15424_v2 = vand.u32 4294901760, %v13608_v18 }
 0x415   :  { %v15223_v60 = vand.u32 4294901760, %v13726_v1  ;;  %v15425_v3 = vand.u32 4294901760, %v13630_v16  ;;  %v6684_v28 = vsub.f32 %v13772_v34, %v15231_v27  ;;  %v15246_v49 = vand.u32 4294901760, %v13801_v11 }
 0x416   :  { %v13806_v19 = vsub.f32 %v13601_v10, %v15422_v0  ;;  %v13818_v36 = vsub.f32 %v13608_v18, %v15424_v2  ;;  %v15220_v10 = vand.u32 4294901760, %v13716_v52  ;;  %v15222_v0 = vand.u32 4294901760, %v13721_v39 }
 0x417   :  { %v13793_v54 = vpop.f32.mrb[6].mxu0  ;;  %v13831_v18 = vsub.f32 %v13630_v16, %v15425_v3  ;;  %v6656_v16 = vsub.f32 %v13711_v61, %v15221_v33  ;;  %v6551_v33 = vsub.f32 %v13726_v1, %v15223_v60  ;;  %v6565_v60 = vsub.f32 %v13761_v7, %v15229_v48 }
 0x418   :  { %v13795_v57 = vpop.f32.mrb[7].mxu0  ;;  %6196 = vmatmul.mubr.f32.vlgmr.msra.gmra.mrb[16].mxu0 %v13075_v47  ;;  %v15239_v27 = vand.u32 4294901760, %v13806_v19 }
 0x419   :  { %11747 = vmatpush1.bf16.msra.mxu0 %v13575_v46  ;;  %6270 = vmatprep.mubr.f32.mxu0 %v15391_v56  ;;  %v15225_v46 = vand.u32 4294901760, %v13750_v22  ;;  %v6657_v3 = vand.u32 4294901760, %v6656_v16  ;;  %v6671_v56 = vand.u32 4294901760, %v6670_v32  ;;  %v6566_v30 = vand.u32 4294901760, %v6565_v60 }
 0x41a   :  { %11781 = vmatprep.subr.bf16.mxu0 %v11780_v9  ;;  %v15426_v9 = vand.u32 4294901760, %v13632_v24  ;;  %v15241_v32 = vand.u32 4294901760, %v13818_v36 }
 0x41c   :  { %v13836_v2 = vsub.f32 %v13632_v24, %v15426_v9  ;;  %v6663_v24 = vsub.f32 %v13716_v52, %v15220_v10  ;;  %v15226_v9 = vand.u32 4294901760, %v13756_v4  ;;  %v6544_v10 = vsub.f32 %v13721_v39, %v15222_v0 }
 0x41e   :  { %v6558_v0 = vsub.f32 %v13756_v4, %v15226_v9  ;;  %v6552_v9 = vand.u32 4294901760, %v6551_v33  ;;  %v15242_v60 = vand.u32 4294901760, %v13836_v2 }
 0x420   :  { %6272 = vmatmul.mubr.f32.vlgmr.msra.gmra.mrb[16].mxu0 %v13075_v47  ;;  %v6677_v47 = vsub.f32 %v13750_v22, %v15225_v46  ;;  %v6691_v46 = vsub.f32 %v13777_v45, %v15236_v53  ;;  %v6559_v51 = vand.u32 4294901760, %v6558_v0  ;;  %v6685_v53 = vand.u32 4294901760, %v6684_v28 }
 0x421   :  { %11783 = vmatpush3.bf16.msra.mxu0 %v13420_v21  ;;  %v6664_v21 = vand.u32 4294901760, %v6663_v24  ;;  %v6545_v24 = vand.u32 4294901760, %v6544_v10  ;;  %v6698_v28 = vsub.f32 %v13801_v11, %v15246_v49  ;;  %v15240_v0 = vand.u32 4294901760, %v13831_v18 }
 0x422   :  { %11785 = vmatprep.subr.bf16.mxu0 %v13429_v55  ;;  %v15247_v55 = vand.u32 4294901760, %v13782_v8  ;;  %v6678_v50 = vand.u32 4294901760, %v6677_v47  ;;  %v6692_v34 = vand.u32 4294901760, %v6691_v46  ;;  %v6705_v46 = vsub.f32 %v13806_v19, %v15239_v27 }
 0x423   :  { %v11792_v48 = vpack.c.bf16 %v6664_v21, %v6657_v3  ;;  %v15245_v3 = vand.u32 4294901760, %v13813_v29  ;;  %v6593_v47 = vsub.f32 %v13818_v36, %v15241_v32  ;;  %v15244_v21 = vand.u32 4294901760, %v13843_v37 }
 0x424   :  { %v6572_v16 = vsub.f32 %v13782_v8, %v15247_v55  ;;  %v11796_v10 = vpack.c.bf16 %v6678_v50, %v6671_v56  ;;  %v6706_v27 = vand.u32 4294901760, %v6705_v46  ;;  %v14032_v55 = vld [vmem:[#allocation2 + $0x298] sm:$0xff] }
 0x425   :  { %11787 = vmatpush3.bf16.msra.mxu0 %v13435_v35  ;;  %v15429_v35 = vand.u32 4294901760, %v13787_v42  ;;  %15453 = vst [vmem:[#allocation35_spill] sm:$0xff] %v14032_v55 }
 0x426   :  { %11789 = vmatprep.subr.bf16.mxu0 %v13471_v14  ;;  %v11794_v14 = vpack.c.bf16 %v6552_v9, %v6545_v24  ;;  %v11800_v9 = vpack.c.bf16 %v6692_v34, %v6685_v53  ;;  %v6573_v50 = vand.u32 4294901760, %v6572_v16  ;;  %v15243_v24 = vand.u32 4294901760, %v13848_v58 }
 0x427   :  { %v6579_v33 = vsub.f32 %v13787_v42, %v15429_v35  ;;  %v6699_v35 = vand.u32 4294901760, %v6698_v28  ;;  %v6594_v16 = vand.u32 4294901760, %v6593_v47 }
 0x429   :  { %11791 = vmatpush3.bf16.msra.mxu0 %v13481_v17  ;;  %v11798_v17 = vpack.c.bf16 %v6566_v30, %v6559_v51  ;;  %v6580_v56 = vand.u32 4294901760, %v6579_v33  ;;  %v6712_v51 = vsub.f32 %v13831_v18, %v15240_v0  ;;  %v6719_v30 = vsub.f32 %v13836_v2, %v15242_v60 }
 0x42a   :  { %11793 = vmatprep.subr.bf16.mxu0 %v11792_v48  ;;  %v6586_v48 = vsub.f32 %v13813_v29, %v15245_v3  ;;  %v6600_v33 = vsub.f32 %v13843_v37, %v15244_v21  ;;  %v14000_v3 = vld [vmem:[#allocation2 + $0x208] sm:$0xff] }
 0x42b   :  { %v11802_v34 = vpack.c.bf16 %v6580_v56, %v6573_v50  ;;  %v6713_v28 = vand.u32 4294901760, %v6712_v51  ;;  %v6720_v46 = vand.u32 4294901760, %v6719_v30  ;;  %v15432_v51 = vsub.s32 1, %v12831_v25  ;;  %15446 = vst [vmem:[#allocation31_spill] sm:$0xff] %v14000_v3 }
 0x42c   :  { %v6587_v53 = vand.u32 4294901760, %v6586_v48  ;;  %v6601_v32 = vand.u32 4294901760, %v6600_v33 }
 0x42d   :  { %11795 = vmatpush3.bf16.msra.mxu0 %v11794_v14  ;;  %v6607_v14 = vsub.f32 %v13848_v58, %v15243_v24  ;;  %v14030_v24 = vld [vmem:[#allocation2 + $0x290] sm:$0xff] }
 0x42e   :  { %11797 = vmatprep.subr.bf16.mxu0 %v11796_v10  ;;  %v11804_v10 = vpack.c.bf16 %v6706_v27, %v6699_v35  ;;  %v11806_v0 = vpack.c.bf16 %v6594_v16, %v6587_v53  ;;  %v13942_v27 = vld [vmem:[%s15148_s1 + $0x1a0] ss:$8 sm:$0xf]  ;;  %v15431_v35 = vsub.s32 0, %v12831_v25  ;;  %15452 = vst [vmem:[#allocation34_spill] sm:$0xff] %v14030_v24 }
 0x42f   :  { %v6608_v60 = vand.u32 4294901760, %v6607_v14  ;;  %15430 = vst [vmem:[#allocation22_spill] sm:$0xff] %v13942_v27  ;;  %v6296_v30 = vrot.slane %v13942_v27, %v15432_v51 }
 0x431   :  { %11799 = vmatpush3.bf16.msra.mxu0 %v11798_v17  ;;  %v11808_v17 = vpack.c.bf16 %v6720_v46, %v6713_v28  ;;  %v11810_v50 = vpack.c.bf16 %v6608_v60, %v6601_v32  ;;  %v6292_v32 = vrot.slane %v13942_v27, %v15431_v35  ;;  %v13974_v35 = vld [vmem:[#allocation2 + $0x270] sm:$0xff]  ;;  %v15462_v27 = vpack.c.bf16 %v13431_v38, %v13423_v62 }
 0x432   :  { %11801 = vmatprep.subr.bf16.mxu0 %v11800_v9  ;;  %15436 = vst [vmem:[#allocation26_spill] sm:$0xff] %v13974_v35 }
 0x435   :  { %11803 = vmatpush3.bf16.msra.mxu0 %v11802_v34 }
 0x436   :  { %11805 = vmatprep.subr.bf16.mxu0 %v11804_v10 }
 0x439   :  { %11807 = vmatpush3.bf16.msra.mxu0 %v11806_v0 }
 0x43a   :  { %11809 = vmatprep.subr.bf16.mxu0 %v11808_v17 }
 0x43d   :  { %11811 = vmatpush3.bf16.msra.mxu0 %v11810_v50 }
 0x43e   :  { %11845 = vmatprep.subr.bf16.mxu0 %v13418_v5 }
 0x443   :  { %v13935_v56 = vpop.f32.mrb[8].mxu0 }
 0x444   :  { %v13937_v48 = vpop.f32.mrb[9].mxu0 }
 0x46f   :  { %v3798_v9 = vpop.f32.mrb[10].mxu0 }
 0x470   :  { %v4294_v47 = vmul.f32 %v3798_v9, %v13793_v54  ;;  %v3800_v0 = vpop.f32.mrb[11].mxu0  ;;  %v13970_v9 = vld [vmem:[#allocation2 + $0x1e0] sm:$0xff] }
 0x471   :  { %v4295_v60 = vmul.f32 %v3800_v0, %v13795_v57  ;;  %15434 = vst [vmem:[#allocation24_spill] sm:$0xff] %v13970_v9  ;;  %v13977_v0 = vld [vmem:[#allocation2 + $0x278] sm:$0xff] }
 0x472   :  { %v6282_v34 = vadd.f32 %v13340_v43, %v4294_v47  ;;  %v13972_v47 = vld [vmem:[#allocation2 + $0x1e8] sm:$0xff]  ;;  %15437 = vst [vmem:[#allocation27_spill] sm:$0xff] %v13977_v0 }
 0x473   :  { %v6283_v53 = vadd.f32 %v13350_v26, %v4295_v60  ;;  %15435 = vst [vmem:[#allocation25_spill] sm:$0xff] %v13972_v47  ;;  %v15438_v60 = vld [vmem:[#allocation6_spill] sm:$0xff] }
 0x474   :  { %v6309_v16 = vadd.f32 %v6292_v32, %v6282_v34  ;;  %v15250_v34 = vand.u32 4294901760, %v13972_v47 }
 0x475   :  { %v6310_v33 = vadd.f32 %v6296_v30, %v6283_v53  ;;  %v15249_v30 = vand.u32 4294901760, %v13970_v9  ;;  %v13982_v53 = vld [vmem:[#allocation2 + $0x1f0] sm:$0xff] }
 0x476   :  { %v6313_v14 = vmax.f32 %v6309_v16, 0.0  ;;  %15439 = vst [vmem:[#allocation6_spill] sm:$0xff] %v13982_v53  ;;  %v13984_v16 = vld [vmem:[#allocation2 + $0x1f8] sm:$0xff] }
 0x477   :  { %v6314_v10 = vmax.f32 %v6310_v33, 0.0  ;;  %15440 = vst [vmem:[#allocation28_spill] sm:$0xff] %v13984_v16  ;;  %v15253_v33 = vand.u32 4294901760, %v13974_v35  ;;  %v14008_v49 = vsub.f32 %v13970_v9, %v15249_v30  ;;  %v14086_v9 = vld [vmem:[#allocation2 + $0x2a0] sm:$0xff] }
 0x478   :  { %v13954_v54 = vand.u32 4294901760, %v6313_v14  ;;  %15472 = vst [vmem:[#allocation42_spill] sm:$0xff] %v14086_v9 }
 0x479   :  { %v13956_v28 = vand.u32 4294901760, %v6314_v10 }
 0x47a   :  { %15433 = vst [vmem:[#allocation23_spill] sm:$0xff] %v13954_v54  ;;  %v13959_v46 = vsub.f32 %v6313_v14, %v13954_v54  ;;  %v13987_v14 = vld [vmem:[#allocation2 + $0x280] sm:$0xff] }
 0x47b   :  { %v6483_v57 = vsub.f32 %v6314_v10, %v13956_v28  ;;  %6723 = vmatprep.mubr.f32.mxu0 %v13956_v28  ;;  %15441 = vst [vmem:[#allocation29_spill] sm:$0xff] %v13987_v14  ;;  %v15254_v10 = vand.u32 4294901760, %v13977_v0 }
 0x47c   :  { %6725 = vmatmul.mubr.f32.vlgmr.msra.gmra.mrb[18].mxu0 %v13954_v54  ;;  %v15248_v43 = vand.u32 4294901760, %v13959_v46  ;;  %v14088_v54 = vld [vmem:[#allocation2 + $0x2a8] sm:$0xff] }
 0x47d   :  { %11847 = vmatpush3.bf16.msra.mxu0 %v13427_v15  ;;  %v6484_v26 = vand.u32 4294901760, %v6483_v57  ;;  %v14026_v30 = vsub.f32 %v13977_v0, %v15254_v10  ;;  %v15456_v10 = vand.u32 4294901760, %v13982_v53  ;;  %v14050_v0 = vld [vmem:[#allocation2 + $0x210] sm:$0xff]  ;;  %15473 = vst [vmem:[#allocation43_spill] sm:$0xff] %v14088_v54 }
 0x47e   :  { %11849 = vmatprep.subr.bf16.mxu0 %v13433_v31  ;;  %v6491_v17 = vsub.f32 %v13959_v46, %v15248_v43  ;;  %v15449_v43 = vld [vmem:[#allocation9_spill] sm:$0xff]  ;;  %15460 = vst [vmem:[#allocation37_spill] sm:$0xff] %v14050_v0 }
 0x47f   :  { %6967 = vmatprep.mubr.f32.mxu0 %v6484_v26  ;;  %v6485_v50 = vsub.f32 %v6483_v57, %v6484_v26  ;;  %v13990_v26 = vld [vmem:[#allocation2 + $0x288] sm:$0xff]  ;;  %15451 = vst [vmem:[#allocation33_spill] sm:$0xff] %v14026_v30  ;;  %v14043_v25 = vsub.f32 %v13982_v53, %v15456_v10  ;;  %v15482_v30 = vand.u32 4294901760, %v14032_v55 }
 0x480   :  { %v6492_v51 = vand.u32 4294901760, %v6491_v17  ;;  %15442 = vst [vmem:[#allocation30_spill] sm:$0xff] %v13990_v26  ;;  %v15443_v17 = vpack.c.bf16 %v13359_v20, %v13355_v40 }
 0x481   :  { %11851 = vmatpush3.bf16.msra.mxu0 %v13446_v23  ;;  %v6486_v32 = vand.u32 4294901760, %v6485_v50  ;;  %v15444_v50 = vld [vmem:[#allocation7_spill] sm:$0xff] }
 0x482   :  { %11853 = vmatprep.subr.bf16.mxu0 %v15438_v60 }
 0x483   :  { %6487 = vmatprep.mubr.f32.mxu1 %v6486_v32  ;;  %v13998_v32 = vld [vmem:[#allocation2 + $0x200] sm:$0xff] }
 0x484   :  { %6493 = vmatmul.mubr.f32.vlgmr.msra.gmra.mrb[6].mxu1 %v6492_v51  ;;  %15445 = vst [vmem:[#allocation7_spill] sm:$0xff] %v13998_v32  ;;  %v15447_v51 = vpack.c.bf16 %v13379_v41, %v13363_v6 }
 0x485   :  { %11815 = vmatpush3.bf16.msra.mxu1 %v15443_v17  ;;  %11855 = vmatpush3.bf16.msra.mxu0 %v15444_v50  ;;  %v14013_v17 = vsub.f32 %v13972_v47, %v15250_v34  ;;  %v15458_v34 = vand.u32 4294901760, %v13984_v16  ;;  %v15464_v47 = vand.u32 4294901760, %v13987_v14 }
 0x486   :  { %6860 = vmatprep.mubr.f32.mxu1 %v6483_v57  ;;  %11817 = vmatprep.subr.bf16.mxu1 %v15447_v51  ;;  %v14020_v57 = vsub.f32 %v13974_v35, %v15253_v33  ;;  %v15454_v33 = vpack.c.bf16 %v13388_v12, %v13382_v44  ;;  %v15455_v51 = vld [vmem:[#allocation10_spill] sm:$0xff] }
 0x487   :  { %15448 = vst [vmem:[#allocation32_spill] sm:$0xff] %v14013_v17  ;;  %11857 = vmatprep.subr.bf16.mxu0 %v15449_v43  ;;  %15457 = vst [vmem:[#allocation10_spill] sm:$0xff] %v14043_v25  ;;  %v14048_v21 = vsub.f32 %v13984_v16, %v15458_v34  ;;  %v14052_v35 = vld [vmem:[#allocation2 + $0x218] sm:$0xff]  ;;  %v14061_v10 = vsub.f32 %v13987_v14, %v15464_v47  ;;  %v15466_v34 = vand.u32 4294901760, %v13990_v26  ;;  %v15468_v17 = vand.u32 4294901760, %v13998_v32 }
 0x488   :  { %15450 = vst [vmem:[#allocation9_spill] sm:$0xff] %v14020_v57  ;;  %15461 = vst [vmem:[#allocation38_spill] sm:$0xff] %v14052_v35  ;;  %v15470_v14 = vand.u32 4294901760, %v14000_v3  ;;  %v14114_v57 = vsub.f32 %v14032_v55, %v15482_v30  ;;  %v14130_v30 = vld [vmem:[#allocation2 + $0x2b0] sm:$0xff]  ;;  %v14132_v55 = vld [vmem:[#allocation2 + $0x2b8] sm:$0xff] }
 0x489   :  { %11819 = vmatpush3.bf16.msra.mxu1 %v15454_v33  ;;  %11859 = vmatpush3.bf16.msra.mxu0 %v15455_v51  ;;  %15459 = vst [vmem:[#allocation36_spill] sm:$0xff] %v14048_v21  ;;  %v15463_v33 = vld [vmem:[#allocation11_spill] sm:$0xff]  ;;  %v14068_v16 = vsub.f32 %v13990_v26, %v15466_v34  ;;  %v14077_v47 = vsub.f32 %v13998_v32, %v15468_v17  ;;  %v15475_v21 = vld [vmem:[#allocation12_spill] sm:$0xff]  ;;  %v15479_v34 = vld [vmem:[#allocation13_spill] sm:$0xff] }
 0x48a   :  { %11821 = vmatprep.subr.bf16.mxu1 %v15462_v27  ;;  %11861 = vmatprep.subr.bf16.mxu0 %v15463_v33  ;;  %15465 = vst [vmem:[#allocation11_spill] sm:$0xff] %v14061_v10  ;;  %v14082_v53 = vsub.f32 %v14000_v3, %v15470_v14  ;;  %v15474_v27 = vpack.c.bf16 %v13443_v59, %v13439_v63  ;;  %v14094_v17 = vld [vmem:[#allocation2 + $0x220] sm:$0xff]  ;;  %v14096_v32 = vld [vmem:[#allocation2 + $0x228] sm:$0xff]  ;;  %15483 = vst [vmem:[#allocation46_spill] sm:$0xff] %v14114_v57  ;;  %v15486_v3 = vand.u32 4294901760, %v14052_v35 }
 0x48b   :  { %15467 = vst [vmem:[#allocation39_spill] sm:$0xff] %v14068_v16  ;;  %15469 = vst [vmem:[#allocation40_spill] sm:$0xff] %v14077_v47  ;;  %v15478_v26 = vpack.c.bf16 %v13716_v52, %v13711_v61  ;;  %v15490_v16 = vpack.c.bf16 %v13726_v1, %v13721_v39  ;;  %v15491_v14 = vld [vmem:[#allocation14_spill] sm:$0xff]  ;;  %v15504_v57 = vpack.c.bf16 %v13761_v7, %v13756_v4 }
 0x48c   :  { %15471 = vst [vmem:[#allocation41_spill] sm:$0xff] %v14082_v53  ;;  %15476 = vst [vmem:[#allocation12_spill] sm:$0xff] %v14094_v17  ;;  %v14126_v53 = vsub.f32 %v14052_v35, %v15486_v3  ;;  %v15502_v35 = vand.u32 4294901760, %v14096_v32  ;;  %v15505_v3 = vld [vmem:[#allocation16_spill] sm:$0xff] }
 0x48d   :  { %11823 = vmatpush3.bf16.msra.mxu1 %v15474_v27  ;;  %11863 = vmatpush3.bf16.msra.mxu0 %v15475_v21  ;;  %15477 = vst [vmem:[#allocation44_spill] sm:$0xff] %v14096_v32  ;;  %v15480_v27 = vand.u32 4294901760, %v14030_v24  ;;  %15488 = vst [vmem:[#allocation49_spill] sm:$0xff] %v14130_v30 }
 0x48e   :  { %11825 = vmatprep.subr.bf16.mxu1 %v15478_v26  ;;  %11865 = vmatprep.subr.bf16.mxu0 %v15479_v34  ;;  %v15484_v26 = vand.u32 4294901760, %v14050_v0  ;;  %15487 = vst [vmem:[#allocation48_spill] sm:$0xff] %v14126_v53  ;;  %15489 = vst [vmem:[#allocation50_spill] sm:$0xff] %v14132_v55  ;;  %v14170_v53 = vsub.f32 %v14096_v32, %v15502_v35  ;;  %v15506_v35 = vld [vmem:[#allocation21_spill] sm:$0xff] }
 0x48f   :  { %v14109_v25 = vsub.f32 %v14030_v24, %v15480_v27  ;;  %v15494_v24 = vpack.c.bf16 %v13750_v22, %v13745_v13  ;;  %v15495_v27 = vld [vmem:[#allocation15_spill] sm:$0xff]  ;;  %v15507_v32 = vpack.c.bf16 %v13777_v45, %v15506_v35 }
 0x490   :  { %v14121_v10 = vsub.f32 %v14050_v0, %v15484_v26  ;;  %v14138_v26 = vld [vmem:[#allocation2 + $0x230] sm:$0xff]  ;;  %v14140_v0 = vld [vmem:[#allocation2 + $0x238] sm:$0xff]  ;;  %15503 = vst [vmem:[#allocation55_spill] sm:$0xff] %v14170_v53 }
 0x491   :  { %15481 = vst [vmem:[#allocation45_spill] sm:$0xff] %v14109_v25  ;;  %11827 = vmatpush3.bf16.msra.mxu1 %v15490_v16  ;;  %11867 = vmatpush3.bf16.msra.mxu0 %v15491_v14  ;;  %15492 = vst [vmem:[#allocation51_spill] sm:$0xff] %v14138_v26  ;;  %v15496_v16 = vand.u32 4294901760, %v14086_v9  ;;  %v15498_v14 = vand.u32 4294901760, %v14088_v54 }
 0x492   :  { %15485 = vst [vmem:[#allocation47_spill] sm:$0xff] %v14121_v10  ;;  %15493 = vst [vmem:[#allocation52_spill] sm:$0xff] %v14140_v0  ;;  %11829 = vmatprep.subr.bf16.mxu1 %v15494_v24  ;;  %11869 = vmatprep.subr.bf16.mxu0 %v15495_v27  ;;  %v15500_v24 = vand.u32 4294901760, %v14094_v17 }
 0x493   :  { %v14153_v47 = vsub.f32 %v14086_v9, %v15496_v16  ;;  %v14158_v34 = vsub.f32 %v14088_v54, %v15498_v14  ;;  %v14174_v14 = vld [vmem:[#allocation2 + $0x2c0] sm:$0xff]  ;;  %v14176_v54 = vld [vmem:[#allocation2 + $0x2c8] sm:$0xff]  ;;  %v15508_v16 = vld [vmem:[#allocation17_spill] sm:$0xff]  ;;  %v15514_v9 = vand.u32 4294901760, %v14138_v26 }
 0x494   :  { %v14165_v25 = vsub.f32 %v14094_v17, %v15500_v24  ;;  %v15509_v17 = vand.u32 4294901760, %v14130_v30  ;;  %v15519_v24 = vld [vmem:[#allocation18_spill] sm:$0xff] }
 0x495   :  { %15497 = vst [vmem:[#allocation15_spill] sm:$0xff] %v14153_v47  ;;  %15499 = vst [vmem:[#allocation53_spill] sm:$0xff] %v14158_v34  ;;  %11831 = vmatpush3.bf16.msra.mxu1 %v15504_v57  ;;  %11871 = vmatpush3.bf16.msra.mxu0 %v15505_v3  ;;  %v15511_v57 = vand.u32 4294901760, %v14132_v55  ;;  %v14204_v47 = vld [vmem:[#allocation2 + $0x248] sm:$0xff]  ;;  %v14209_v53 = vsub.f32 %v14138_v26, %v15514_v9  ;;  %v14220_v34 = vld [vmem:[#allocation2 + $0x2d0] sm:$0xff]  ;;  %v15521_v9 = vpack.c.bf16 %v13806_v19, %v13801_v11 }
 0x496   :  { %15501 = vst [vmem:[#allocation54_spill] sm:$0xff] %v14165_v25  ;;  %11833 = vmatprep.subr.bf16.mxu1 %v15507_v32  ;;  %11873 = vmatprep.subr.bf16.mxu0 %v15508_v16  ;;  %v14193_v10 = vsub.f32 %v14130_v30, %v15509_v17  ;;  %v14202_v32 = vld [vmem:[#allocation2 + $0x240] sm:$0xff]  ;;  %15513 = vst [vmem:[#allocation57_spill] sm:$0xff] %v14204_v47  ;;  %v15516_v17 = vand.u32 4294901760, %v14140_v0  ;;  %v14234_v26 = vld [vmem:[#allocation2 + $0x258] sm:$0xff]  ;;  %v15522_v25 = vand.u32 4294901760, %v14174_v14 }
 0x497   :  { %v14198_v3 = vsub.f32 %v14132_v55, %v15511_v57  ;;  %15515 = vst [vmem:[#allocation58_spill] sm:$0xff] %v14209_v53  ;;  %v15518_v57 = vpack.c.bf16 %v13787_v42, %v13782_v8  ;;  %15520 = vst [vmem:[#allocation60_spill] sm:$0xff] %v14220_v34  ;;  %v14222_v55 = vld [vmem:[#allocation2 + $0x2d8] sm:$0xff] }
 0x498   :  { %15510 = vst [vmem:[#allocation21_spill] sm:$0xff] %v14193_v10  ;;  %v14214_v30 = vsub.f32 %v14140_v0, %v15516_v17  ;;  %v15526_v17 = vand.u32 4294901760, %v13959_v46 }
 0x499   :  { %15512 = vst [vmem:[#allocation56_spill] sm:$0xff] %v14198_v3  ;;  %11835 = vmatpush3.bf16.msra.mxu1 %v15518_v57  ;;  %11875 = vmatpush3.bf16.msra.mxu0 %v15519_v24  ;;  %v14232_v57 = vld [vmem:[#allocation2 + $0x250] sm:$0xff]  ;;  %v14241_v3 = vsub.f32 %v14174_v14, %v15522_v25  ;;  %v15528_v25 = vpack.c.bf16 %v13818_v36, %v13813_v29 }
 0x49a   :  { %15517 = vst [vmem:[#allocation59_spill] sm:$0xff] %v14214_v30  ;;  %11837 = vmatprep.subr.bf16.mxu1 %v15521_v9  ;;  %11909 = vmatprep.subr.bf16.mxu0 %v13418_v5  ;;  %v15524_v9 = vand.u32 4294901760, %v14176_v54  ;;  %v15532_v30 = vld [vmem:[#allocation20_spill] sm:$0xff] }
 0x49b   :  { %v4289_v16 = vpop.f32.mrb[12].mxu0  ;;  %15523 = vst [vmem:[#allocation61_spill] sm:$0xff] %v14241_v3  ;;  %v15533_v24 = vand.u32 4294901760, %v15532_v30 }
 0x49c   :  { %v14246_v5 = vsub.f32 %v14176_v54, %v15524_v9  ;;  %v14249_v0 = vmul.f32 %v4289_v16, %v13935_v56  ;;  %6971 = vmatmul.mubr.f32.vlgmr.msra.gmra.mrb[20].mxu0 %v15526_v17  ;;  %v4291_v10 = vpop.f32.mrb[13].mxu0  ;;  %v15529_v9 = vpack.c.bf16 %v13836_v2, %v13831_v18  ;;  %v15536_v16 = vand.u32 4294901760, %v14204_v47 }
 0x49d   :  { %v14256_v53 = vmul.f32 %v4291_v10, %v13937_v48  ;;  %11839 = vmatpush3.bf16.msra.mxu1 %v15528_v25  ;;  %11911 = vmatpush3.bf16.msra.mxu0 %v13427_v15  ;;  %v15530_v48 = vld [vmem:[#allocation19_spill] sm:$0xff]  ;;  %v15534_v15 = vand.u32 4294901760, %v14202_v32 }
 0x49e   :  { %15525 = vst [vmem:[#allocation62_spill] sm:$0xff] %v14249_v0  ;;  %7241 = vmatprep.mubr.f32.mxu0 %v13956_v28  ;;  %11841 = vmatprep.subr.bf16.mxu1 %v15529_v9  ;;  %v15531_v10 = vand.u32 4294901760, %v15530_v48  ;;  %v14282_v17 = vsub.f32 %v14204_v47, %v15536_v16  ;;  %v14287_v9 = vld [vmem:[#allocation2 + $0x268] sm:$0xff]  ;;  %v15537_v48 = vand.u32 4294901760, %v14220_v34  ;;  %v15542_v0 = vand.u32 4294901760, %v13359_v20 }
 0x49f   :  { %15527 = vst [vmem:[#allocation63_spill] sm:$0xff] %v14256_v53  ;;  %v14277_v56 = vsub.f32 %v14202_v32, %v15534_v15  ;;  %11913 = vmatprep.subr.bf16.mxu0 %v13433_v31  ;;  %v14285_v53 = vld [vmem:[#allocation2 + $0x260] sm:$0xff]  ;;  %v15540_v31 = vpack.c.bf16 %v13848_v58, %v13843_v37  ;;  %v15541_v15 = vand.u32 4294901760, %v13355_v40  ;;  %v15547_v40 = vand.u32 4294901760, %v13379_v41 }
 0x4a0   :  { %v11876_v25 = vpack.c.bf16 %v15533_v24, %v15531_v10  ;;  %v14292_v30 = vsub.f32 %v14220_v34, %v15537_v48  ;;  %v15539_v24 = vand.u32 4294901760, %v14222_v55  ;;  %v15543_v34 = vand.u32 4294901760, %v14232_v57 }
 0x4a1   :  { %15535 = vst [vmem:[#allocation19_spill] sm:$0xff] %v14277_v56  ;;  %11843 = vmatpush3.bf16.msra.mxu1 %v15540_v31  ;;  %11915 = vmatpush3.bf16.msra.mxu0 %v13446_v23  ;;  %v11878_v48 = vpack.c.bf16 %v15542_v0, %v15541_v15  ;;  %v15546_v23 = vand.u32 4294901760, %v13363_v6  ;;  %v7297_v20 = vand.u32 4294901760, %v14285_v53  ;;  %v7300_v0 = vand.u32 4294901760, %v14287_v9 }
 0x4a2   :  { %15538 = vst [vmem:[#allocation20_spill] sm:$0xff] %v14292_v30  ;;  %v14297_v10 = vsub.f32 %v14222_v55, %v15539_v24  ;;  %v14312_v47 = vsub.f32 %v14232_v57, %v15543_v34  ;;  %v15545_v24 = vand.u32 4294901760, %v14234_v26  ;;  %11877 = vmatprep.subr.bf16.mxu1 %v11876_v25  ;;  %11917 = vmatprep.subr.bf16.mxu0 %v15438_v60  ;;  %v15548_v6 = vand.u32 4294901760, %v13382_v44  ;;  %v15584_v34 = vld [vmem:[#allocation17_spill] sm:$0xff] }
 0x4a3   :  { %v11880_v31 = vpack.c.bf16 %v15547_v40, %v15546_v23  ;;  %v15549_v41 = vand.u32 4294901760, %v13388_v12  ;;  %v15550_v25 = vand.u32 4294901760, %v13423_v62  ;;  %v14349_v44 = vsub.f32 %v14287_v9, %v7300_v0 }
 0x4a4   :  { %15544 = vst [vmem:[#allocation64_spill] sm:$0xff] %v14312_v47  ;;  %v14317_v16 = vsub.f32 %v14234_v26, %v15545_v24  ;;  %6863 = vmatmul.mubr.f32.vlgmr.msra.gmra.mrb[8].mxu1 %v13959_v46  ;;  %v15551_v24 = vand.u32 4294901760, %v13431_v38  ;;  %v14344_v46 = vsub.f32 %v14285_v53, %v7297_v20  ;;  %v15552_v12 = vand.u32 4294901760, %v13439_v63 }
 0x4a5   :  { %11879 = vmatpush3.bf16.msra.mxu1 %v11878_v48  ;;  %7137 = vmatprep.mubr.f32.mxu1 %v13956_v28  ;;  %v11882_v60 = vpack.c.bf16 %v15549_v41, %v15548_v6  ;;  %v15553_v62 = vand.u32 4294901760, %v13443_v59  ;;  %v15554_v38 = vand.u32 4294901760, %v13711_v61  ;;  %v15556_v63 = vand.u32 4294901760, %v13721_v39  ;;  %v15560_v41 = vld [vmem:[#allocation32_spill] sm:$0xff]  ;;  %v15561_v39 = vld [vmem:[#allocation9_spill] sm:$0xff] }
 0x4a6   :  { %11919 = vmatpush3.bf16.msra.mxu0 %v15444_v50  ;;  %11881 = vmatprep.subr.bf16.mxu1 %v11880_v31  ;;  %v11884_v23 = vpack.c.bf16 %v15551_v24, %v15550_v25  ;;  %v15555_v50 = vand.u32 4294901760, %v13716_v52  ;;  %v15331_v40 = vand.u32 4294901760, %v14344_v46  ;;  %v15329_v31 = vand.u32 4294901760, %v14349_v44  ;;  %v15562_v25 = vld [vmem:[#allocation33_spill] sm:$0xff] }
 0x4a7   :  { %11921 = vmatprep.subr.bf16.mxu0 %v15449_v43  ;;  %v11886_v28 = vpack.c.bf16 %v15553_v62, %v15552_v12  ;;  %v15557_v59 = vand.u32 4294901760, %v13726_v1  ;;  %v15559_v6 = vand.u32 4294901760, %v13750_v22  ;;  %v15328_v52 = vand.u32 4294901760, %v14008_v49  ;;  %v15563_v24 = vld [vmem:[#allocation13_spill] sm:$0xff]  ;;  %v15566_v62 = vld [vmem:[#allocation10_spill] sm:$0xff] }
 0x4a8   :  { %v11888_v48 = vpack.c.bf16 %v15555_v50, %v15554_v38  ;;  %v7483_v1 = vsub.f32 %v14349_v44, %v15329_v31  ;;  %v15326_v22 = vand.u32 4294901760, %v15562_v25  ;;  %v15565_v12 = vand.u32 4294901760, %v13761_v7  ;;  %v15570_v7 = vld [vmem:[#allocation14_spill] sm:$0xff] }
 0x4a9   :  { %11883 = vmatpush3.bf16.msra.mxu1 %v11882_v60  ;;  %v11890_v43 = vpack.c.bf16 %v15557_v59, %v15556_v63  ;;  %v15327_v60 = vand.u32 4294901760, %v15560_v41  ;;  %v15567_v38 = vand.u32 4294901760, %v15506_v35  ;;  %v15568_v50 = vand.u32 4294901760, %v13777_v45 }
 0x4aa   :  { %11923 = vmatpush3.bf16.msra.mxu0 %v15455_v51  ;;  %11885 = vmatprep.subr.bf16.mxu1 %v11884_v23  ;;  %v15558_v51 = vand.u32 4294901760, %v13745_v13  ;;  %v15325_v13 = vand.u32 4294901760, %v15561_v39  ;;  %v15564_v23 = vand.u32 4294901760, %v13756_v4  ;;  %v7364_v63 = vsub.f32 %v14008_v49, %v15328_v52  ;;  %v15569_v4 = vld [vmem:[#allocation36_spill] sm:$0xff]  ;;  %v15578_v52 = vld [vmem:[#allocation41_spill] sm:$0xff] }
 0x4ab   :  { %11925 = vmatprep.subr.bf16.mxu0 %v15463_v33  ;;  %v7476_v33 = vsub.f32 %v14344_v46, %v15331_v40  ;;  %v7371_v59 = vsub.f32 %v15560_v41, %v15327_v60  ;;  %v7497_v35 = vsub.f32 %v15562_v25, %v15326_v22  ;;  %v15577_v60 = vld [vmem:[#allocation40_spill] sm:$0xff] }
 0x4ac   :  { %v11892_v61 = vpack.c.bf16 %v15559_v6, %v15558_v51  ;;  %v15337_v51 = vand.u32 4294901760, %v15569_v4  ;;  %v7490_v45 = vsub.f32 %v15561_v39, %v15325_v13  ;;  %v7365_v15 = vand.u32 4294901760, %v7364_v63 }
 0x4ad   :  { %11887 = vmatpush3.bf16.msra.mxu1 %v11886_v28  ;;  %v15330_v28 = vand.u32 4294901760, %v15566_v62  ;;  %v7477_v6 = vand.u32 4294901760, %v7476_v33  ;;  %v7372_v31 = vand.u32 4294901760, %v7371_v59  ;;  %v15585_v59 = vld [vmem:[#allocation45_spill] sm:$0xff] }
 0x4ae   :  { %11927 = vmatpush3.bf16.msra.mxu0 %v15475_v21  ;;  %11889 = vmatprep.subr.bf16.mxu1 %v11888_v48  ;;  %v11894_v21 = vpack.c.bf16 %v15565_v12, %v15564_v23  ;;  %v11896_v48 = vpack.c.bf16 %v15568_v50, %v15567_v38  ;;  %v15572_v23 = vand.u32 4294901760, %v13787_v42  ;;  %v15573_v38 = vld [vmem:[#allocation11_spill] sm:$0xff]  ;;  %v15579_v42 = vand.u32 4294901760, %v13813_v29 }
 0x4af   :  { %11929 = vmatprep.subr.bf16.mxu0 %v15563_v24  ;;  %v15571_v24 = vand.u32 4294901760, %v13782_v8  ;;  %v15336_v50 = vand.u32 4294901760, %v15573_v38  ;;  %v7378_v22 = vsub.f32 %v15566_v62, %v15330_v28  ;;  %v15334_v8 = vand.u32 4294901760, %v15578_v52 }
 0x4b0   :  { %v7491_v40 = vand.u32 4294901760, %v7490_v45  ;;  %v7498_v29 = vand.u32 4294901760, %v7497_v35 }
 0x4b1   :  { %11891 = vmatpush3.bf16.msra.mxu1 %v11890_v43  ;;  %v7484_v43 = vand.u32 4294901760, %v7483_v1  ;;  %v11898_v12 = vpack.c.bf16 %v15572_v23, %v15571_v24  ;;  %v15575_v1 = vand.u32 4294901760, %v13801_v11  ;;  %v15580_v24 = vand.u32 4294901760, %v13818_v36 }
 0x4b2   :  { %11931 = vmatpush3.bf16.msra.mxu0 %v15570_v7  ;;  %11893 = vmatprep.subr.bf16.mxu1 %v11892_v61  ;;  %v15574_v61 = vld [vmem:[#allocation39_spill] sm:$0xff]  ;;  %v15576_v7 = vand.u32 4294901760, %v13806_v19  ;;  %v7385_v11 = vsub.f32 %v15569_v4, %v15337_v51  ;;  %v15581_v19 = vld [vmem:[#allocation16_spill] sm:$0xff]  ;;  %v7504_v36 = vsub.f32 %v15573_v38, %v15336_v50  ;;  %v7379_v45 = vand.u32 4294901760, %v7378_v22  ;;  %v15590_v22 = vld [vmem:[#allocation18_spill] sm:$0xff] }
 0x4b3   :  { %11933 = vmatprep.subr.bf16.mxu0 %v15495_v27  ;;  %v15333_v33 = vand.u32 4294901760, %v15574_v61  ;;  %v15332_v27 = vand.u32 4294901760, %v15577_v60  ;;  %v11902_v23 = vpack.c.bf16 %v15580_v24, %v15579_v42  ;;  %v15586_v42 = vld [vmem:[#allocation46_spill] sm:$0xff]  ;;  %v7399_v35 = vsub.f32 %v15578_v52, %v15334_v8  ;;  %v15593_v8 = vld [vmem:[#allocation53_spill] sm:$0xff]  ;;  %v15598_v50 = vld [vmem:[#allocation56_spill] sm:$0xff] }
 0x4b4   :  { %v11900_v13 = vpack.c.bf16 %v15576_v7, %v15575_v1  ;;  %v15582_v1 = vand.u32 4294901760, %v13831_v18  ;;  %v15583_v7 = vand.u32 4294901760, %v13836_v2  ;;  %v15339_v18 = vand.u32 4294901760, %v15586_v42 }
 0x4b5   :  { %11895 = vmatpush3.bf16.msra.mxu1 %v11894_v21  ;;  %v11972_v21 = vpack.c.bf16 %v7484_v43, %v7477_v6  ;;  %v7511_v63 = vsub.f32 %v15574_v61, %v15333_v33  ;;  %v15587_v2 = vand.u32 4294901760, %v13843_v37  ;;  %v15588_v6 = vand.u32 4294901760, %v13848_v58  ;;  %v15589_v58 = vld [vmem:[#allocation47_spill] sm:$0xff] }
 0x4b6   :  { %11935 = vmatpush3.bf16.msra.mxu0 %v15581_v19  ;;  %11897 = vmatprep.subr.bf16.mxu1 %v11896_v48  ;;  %v11904_v28 = vpack.c.bf16 %v15583_v7, %v15582_v1  ;;  %v15335_v48 = vand.u32 4294901760, %v15585_v59  ;;  %v11974_v24 = vpack.c.bf16 %v7372_v31, %v7365_v15  ;;  %v7386_v19 = vand.u32 4294901760, %v7385_v11  ;;  %v15595_v11 = vld [vmem:[#allocation55_spill] sm:$0xff] }
 0x4b7   :  { %11937 = vmatprep.subr.bf16.mxu0 %v15584_v34  ;;  %v11906_v43 = vpack.c.bf16 %v15588_v6, %v15587_v2  ;;  %v7392_v34 = vsub.f32 %v15577_v60, %v15332_v27  ;;  %v14458_v37 = vpack.c.bf16 %v7300_v0, %v7297_v20  ;;  %v15338_v1 = vand.u32 4294901760, %v15589_v58  ;;  %v15591_v2 = vld [vmem:[#allocation48_spill] sm:$0xff]  ;;  %v15592_v27 = vld [vmem:[#allocation15_spill] sm:$0xff] }
 0x4b8   :  { %v11976_v7 = vpack.c.bf16 %v7498_v29, %v7491_v40  ;;  %v15340_v6 = vand.u32 4294901760, %v15591_v2  ;;  %v15343_v33 = vand.u32 4294901760, %v15592_v27  ;;  %v7505_v15 = vand.u32 4294901760, %v7504_v36  ;;  %v15594_v40 = vld [vmem:[#allocation54_spill] sm:$0xff] }
 0x4b9   :  { %11899 = vmatpush3.bf16.msra.mxu1 %v11898_v12  ;;  %v15345_v12 = vand.u32 4294901760, %v15593_v8  ;;  %v7512_v31 = vand.u32 4294901760, %v7511_v63  ;;  %v7518_v53 = vsub.f32 %v15585_v59, %v15335_v48  ;;  %v7525_v9 = vsub.f32 %v15586_v42, %v15339_v18  ;;  %v15597_v63 = vld [vmem:[#allocation21_spill] sm:$0xff] }
 0x4ba   :  { %11939 = vmatpush3.bf16.msra.mxu0 %v15590_v22  ;;  %11901 = vmatprep.subr.bf16.mxu1 %v11900_v13  ;;  %v7393_v20 = vand.u32 4294901760, %v7392_v34  ;;  %v7400_v0 = vand.u32 4294901760, %v7399_v35  ;;  %v15596_v22 = vld [vmem:[#allocation23_spill] sm:$0xff]  ;;  %v7406_v36 = vsub.f32 %v15589_v58, %v15338_v1  ;;  %v7413_v34 = vsub.f32 %v15591_v2, %v15340_v6  ;;  %v15601_v18 = vld [vmem:[#allocation25_spill] sm:$0xff]  ;;  %v15603_v6 = vld [vmem:[#allocation26_spill] sm:$0xff] }
 0x4bb   :  { %11973 = vmatprep.subr.bf16.mxu0 %v11972_v21  ;;  %v11978_v21 = vpack.c.bf16 %v7386_v19, %v7379_v45  ;;  %v7532_v35 = vsub.f32 %v15592_v27, %v15343_v33  ;;  %v11980_v45 = vpack.c.bf16 %v7512_v31, %v7505_v15  ;;  %v15599_v19 = vld [vmem:[#allocation24_spill] sm:$0xff]  ;;  %v15602_v51 = vand.u32 4294901760, %v15601_v18  ;;  %v15605_v58 = vld [vmem:[#allocation27_spill] sm:$0xff] }
 0x4bc   :  { %v15600_v1 = vand.u32 4294901760, %v15599_v19  ;;  %v7526_v48 = vand.u32 4294901760, %v7525_v9  ;;  %v11982_v29 = vpack.c.bf16 %v7400_v0, %v7393_v20  ;;  %v15604_v13 = vand.u32 4294901760, %v15603_v6 }
 0x4bd   :  { %7243 = vmatmul.mubr.f32.vlgmr.msra.gmra.mrb[22].mxu0 %v15596_v22  ;;  %11903 = vmatpush3.bf16.msra.mxu1 %v11902_v23  ;;  %v7539_v23 = vsub.f32 %v15593_v8, %v15345_v12  ;;  %v15606_v2 = vand.u32 4294901760, %v15605_v58  ;;  %v15607_v27 = vand.u32 4294901760, %v15594_v40  ;;  %v15608_v15 = vand.u32 4294901760, %v15595_v11  ;;  %v15611_v58 = vld [vmem:[#allocation58_spill] sm:$0xff]  ;;  %v15615_v12 = vld [vmem:[#allocation28_spill] sm:$0xff] }
 0x4be   :  { %11905 = vmatprep.subr.bf16.mxu1 %v11904_v28  ;;  %11975 = vmatpush3.bf16.msra.mxu0 %v11974_v24  ;;  %v14492_v28 = vpack.c.bf16 %v15602_v51, %v15600_v1  ;;  %v7519_v24 = vand.u32 4294901760, %v7518_v53  ;;  %v15609_v51 = vand.u32 4294901760, %v15597_v63  ;;  %v15610_v1 = vand.u32 4294901760, %v15598_v50  ;;  %v15612_v53 = vld [vmem:[#allocation59_spill] sm:$0xff] }
 0x4bf   :  { %11977 = vmatprep.subr.bf16.mxu0 %v11976_v7  ;;  %v14498_v33 = vpack.c.bf16 %v15606_v2, %v15604_v13  ;;  %v7420_v7 = vsub.f32 %v15594_v40, %v15607_v27  ;;  %v7427_v31 = vsub.f32 %v15595_v11, %v15608_v15  ;;  %v7407_v27 = vand.u32 4294901760, %v7406_v36  ;;  %v15619_v36 = vld [vmem:[#allocation30_spill] sm:$0xff] }
 0x4c0   :  { %v7546_v18 = vsub.f32 %v15597_v63, %v15609_v51  ;;  %v7553_v6 = vsub.f32 %v15598_v50, %v15610_v1  ;;  %v7414_v20 = vand.u32 4294901760, %v7413_v34  ;;  %v7533_v0 = vand.u32 4294901760, %v7532_v35  ;;  %v15613_v51 = vld [vmem:[#allocation6_spill] sm:$0xff] }
 0x4c1   :  { %11907 = vmatpush3.bf16.msra.mxu1 %v11906_v43  ;;  %v7540_v13 = vand.u32 4294901760, %v7539_v23  ;;  %v11984_v43 = vpack.c.bf16 %v7526_v48, %v7519_v24  ;;  %v15347_v19 = vand.u32 4294901760, %v14241_v3  ;;  %v15348_v15 = vand.u32 4294901760, %v14246_v5 }
 0x4c2   :  { %11979 = vmatpush3.bf16.msra.mxu0 %v11978_v21  ;;  %11941 = vmatprep.subr.bf16.mxu1 %v14458_v37  ;;  %v15614_v1 = vand.u32 4294901760, %v15613_v51  ;;  %v15616_v2 = vand.u32 4294901760, %v15615_v12  ;;  %v15617_v21 = vld [vmem:[#allocation29_spill] sm:$0xff]  ;;  %v15620_v34 = vand.u32 4294901760, %v15619_v36  ;;  %v7421_v23 = vand.u32 4294901760, %v7420_v7  ;;  %v15625_v36 = vld [vmem:[#allocation31_spill] sm:$0xff] }
 0x4c3   :  { %11981 = vmatprep.subr.bf16.mxu0 %v11980_v45  ;;  %v15618_v63 = vand.u32 4294901760, %v15617_v21  ;;  %v7428_v48 = vand.u32 4294901760, %v7427_v31  ;;  %v7547_v45 = vand.u32 4294901760, %v7546_v18  ;;  %v7554_v24 = vand.u32 4294901760, %v7553_v6  ;;  %v15629_v31 = vld [vmem:[#allocation35_spill] sm:$0xff] }
 0x4c4   :  { %7139 = vmatmul.mubr.f32.vlgmr.msra.gmra.mrb[10].mxu1 %v15596_v22  ;;  %v14522_v9 = vpack.c.bf16 %v15616_v2, %v15614_v1  ;;  %v15621_v22 = vand.u32 4294901760, %v15611_v58  ;;  %v15622_v12 = vand.u32 4294901760, %v15612_v53  ;;  %v11986_v1 = vpack.c.bf16 %v7414_v20, %v7407_v27 }
 0x4c5   :  { %v14528_v35 = vpack.c.bf16 %v15620_v34, %v15618_v63  ;;  %11943 = vmatpush3.bf16.msra.mxu1 %v14492_v28  ;;  %v11988_v63 = vpack.c.bf16 %v7540_v13, %v7533_v0  ;;  %v7560_v18 = vsub.f32 %v14241_v3, %v15347_v19  ;;  %v7567_v6 = vsub.f32 %v14246_v5, %v15348_v15  ;;  %v15623_v0 = vld [vmem:[#allocation7_spill] sm:$0xff] }
 0x4c6   :  { %v7434_v51 = vsub.f32 %v15611_v58, %v15621_v22  ;;  %v7441_v2 = vsub.f32 %v15612_v53, %v15622_v12  ;;  %11983 = vmatpush3.bf16.msra.mxu0 %v11982_v29  ;;  %11945 = vmatprep.subr.bf16.mxu1 %v14498_v33  ;;  %v15624_v13 = vand.u32 4294901760, %v15623_v0  ;;  %v15626_v34 = vand.u32 4294901760, %v15625_v36  ;;  %v15627_v12 = vld [vmem:[#allocation34_spill] sm:$0xff] }
 0x4c7   :  { %v14540_v21 = vpop.f32.mrb[14].mxu0  ;;  %11985 = vmatprep.subr.bf16.mxu0 %v11984_v43  ;;  %v11990_v43 = vpack.c.bf16 %v7428_v48, %v7421_v23  ;;  %v15628_v19 = vand.u32 4294901760, %v15627_v12  ;;  %v15630_v7 = vand.u32 4294901760, %v15629_v31  ;;  %v11992_v29 = vpack.c.bf16 %v7554_v24, %v7547_v45  ;;  %v15637_v12 = vld [vmem:[#allocation38_spill] sm:$0xff] }
 0x4c8   :  { %v14550_v20 = vpop.f32.mrb[15].mxu0  ;;  %v14556_v22 = vpack.c.bf16 %v15626_v34, %v15624_v13  ;;  %v7435_v3 = vand.u32 4294901760, %v7434_v51  ;;  %v7442_v27 = vand.u32 4294901760, %v7441_v2  ;;  %v15631_v0 = vand.u32 4294901760, %v14277_v56 }
 0x4c9   :  { %11947 = vmatpush3.bf16.msra.mxu1 %v14522_v9  ;;  %v14563_v15 = vpack.c.bf16 %v15630_v7, %v15628_v19  ;;  %v15632_v23 = vand.u32 4294901760, %v14282_v17  ;;  %v7561_v19 = vand.u32 4294901760, %v7560_v18  ;;  %v7568_v45 = vand.u32 4294901760, %v7567_v6  ;;  %v15635_v7 = vld [vmem:[#allocation37_spill] sm:$0xff]  ;;  %v15641_v6 = vld [vmem:[#allocation43_spill] sm:$0xff] }
 0x4ca   :  { %11987 = vmatpush3.bf16.msra.mxu0 %v11986_v1  ;;  %11949 = vmatprep.subr.bf16.mxu1 %v14528_v35  ;;  %v7448_v13 = vsub.f32 %v14277_v56, %v15631_v0  ;;  %v15633_v24 = vand.u32 4294901760, %v14292_v30  ;;  %v15634_v2 = vand.u32 4294901760, %v14297_v10  ;;  %v15636_v34 = vand.u32 4294901760, %v15635_v7 }
 0x4cb   :  { %v7455_v48 = vsub.f32 %v14282_v17, %v15632_v23  ;;  %11989 = vmatprep.subr.bf16.mxu0 %v11988_v63  ;;  %v15638_v0 = vand.u32 4294901760, %v15637_v12  ;;  %v11994_v31 = vpack.c.bf16 %v7442_v27, %v7435_v3  ;;  %v15639_v63 = vld [vmem:[#allocation42_spill] sm:$0xff]  ;;  %v15642_v36 = vand.u32 4294901760, %v15641_v6 }
 0x4cc   :  { %v7574_v51 = vsub.f32 %v14292_v30, %v15633_v24  ;;  %v7581_v1 = vsub.f32 %v14297_v10, %v15634_v2  ;;  %v15640_v18 = vand.u32 4294901760, %v15639_v63  ;;  %v7449_v24 = vand.u32 4294901760, %v7448_v13  ;;  %v15647_v63 = vld [vmem:[#allocation44_spill] sm:$0xff] }
 0x4cd   :  { %11951 = vmatpush3.bf16.msra.mxu1 %v14556_v22  ;;  %v14585_v23 = vpack.c.bf16 %v15638_v0, %v15636_v34  ;;  %v7456_v2 = vand.u32 4294901760, %v7455_v48  ;;  %v15643_v30 = vand.u32 4294901760, %v14312_v47  ;;  %v15644_v12 = vand.u32 4294901760, %v14317_v16  ;;  %v15649_v48 = vld [vmem:[#allocation49_spill] sm:$0xff] }
 0x4ce   :  { %v14591_v56 = vpack.c.bf16 %v15642_v36, %v15640_v18  ;;  %11991 = vmatpush3.bf16.msra.mxu0 %v11990_v43  ;;  %11953 = vmatprep.subr.bf16.mxu1 %v14563_v15  ;;  %v11996_v3 = vpack.c.bf16 %v7568_v45, %v7561_v19  ;;  %v7575_v27 = vand.u32 4294901760, %v7574_v51  ;;  %v7582_v0 = vand.u32 4294901760, %v7581_v1  ;;  %v15645_v36 = vld [vmem:[#allocation12_spill] sm:$0xff]  ;;  %v15653_v1 = vld [vmem:[#allocation51_spill] sm:$0xff] }
 0x4cf   :  { %v7462_v7 = vsub.f32 %v14312_v47, %v15643_v30  ;;  %v7469_v34 = vsub.f32 %v14317_v16, %v15644_v12  ;;  %11993 = vmatprep.subr.bf16.mxu0 %v11992_v29  ;;  %v15646_v43 = vand.u32 4294901760, %v15645_v36  ;;  %v15648_v18 = vand.u32 4294901760, %v15647_v63  ;;  %v15651_v47 = vld [vmem:[#allocation50_spill] sm:$0xff] }
 0x4d0   :  { %v11998_v30 = vpack.c.bf16 %v7456_v2, %v7449_v24  ;;  %v15650_v6 = vand.u32 4294901760, %v15649_v48  ;;  %v15652_v12 = vand.u32 4294901760, %v15651_v47  ;;  %v12000_v51 = vpack.c.bf16 %v7582_v0, %v7575_v27 }
 0x4d1   :  { %11955 = vmatpush3.bf16.msra.mxu1 %v14585_v23  ;;  %v14605_v13 = vpack.c.bf16 %v15648_v18, %v15646_v43  ;;  %v7463_v19 = vand.u32 4294901760, %v7462_v7  ;;  %v7470_v45 = vand.u32 4294901760, %v7469_v34  ;;  %v15654_v36 = vand.u32 4294901760, %v15653_v1  ;;  %v15655_v43 = vld [vmem:[#allocation52_spill] sm:$0xff] }
 0x4d2   :  { %11995 = vmatpush3.bf16.msra.mxu0 %v11994_v31  ;;  %11957 = vmatprep.subr.bf16.mxu1 %v14591_v56  ;;  %v14612_v29 = vpack.c.bf16 %v15652_v12, %v15650_v6  ;;  %v15656_v63 = vand.u32 4294901760, %v15655_v43  ;;  %v15657_v47 = vand.u32 4294901760, %v14174_v14  ;;  %v15658_v2 = vand.u32 4294901760, %v14176_v54  ;;  %v15662_v18 = vld [vmem:[#allocation60_spill] sm:$0xff] }
 0x4d3   :  { %11997 = vmatprep.subr.bf16.mxu0 %v11996_v3  ;;  %v12002_v24 = vpack.c.bf16 %v7470_v45, %v7463_v19  ;;  %v15659_v34 = vand.u32 4294901760, %v14202_v32  ;;  %v15660_v3 = vld [vmem:[#allocation57_spill] sm:$0xff]  ;;  %v15664_v14 = vand.u32 4294901760, %v14222_v55  ;;  %v15665_v54 = vand.u32 4294901760, %v14232_v57  ;;  %v15668_v57 = vld [vmem:[#allocation22_spill] sm:$0xff] }
 0x4d4   :  { %v14619_v31 = vpack.c.bf16 %v15656_v63, %v15654_v36  ;;  %v14626_v7 = vpack.c.bf16 %v15658_v2, %v15657_v47  ;;  %v15661_v27 = vand.u32 4294901760, %v15660_v3  ;;  %v15666_v32 = vand.u32 4294901760, %v14234_v26  ;;  %v15667_v55 = vld [vmem:[#allocation5_spill] sm:$0xff]  ;;  %v15670_v2 = vld [vmem:[#allocation63_spill] sm:$0xff] }
 0x4d5   :  { %11959 = vmatpush3.bf16.msra.mxu1 %v14605_v13  ;;  %v12004_v12 = vpack.c.bf16 %v14349_v44, %v14344_v46  ;;  %v6299_v19 = vsub.s32 2, %v15667_v55  ;;  %v6303_v45 = vsub.s32 3, %v15667_v55 }
 0x4d6   :  { %11999 = vmatpush3.bf16.msra.mxu0 %v11998_v30  ;;  %11961 = vmatprep.subr.bf16.mxu1 %v14612_v29  ;;  %v14633_v0 = vpack.c.bf16 %v15661_v27, %v15659_v34  ;;  %v15663_v30 = vand.u32 4294901760, %v15662_v18  ;;  %v14648_v6 = vpack.c.bf16 %v15666_v32, %v15665_v54 }
 0x4d7   :  { %12001 = vmatprep.subr.bf16.mxu0 %v12000_v51  ;;  %v6300_v36 = vrot.slane %v15668_v57, %v6299_v19  ;;  %v6304_v63 = vrot.slane %v15668_v57, %v6303_v45  ;;  %v15672_v57 = vpack.c.bf16 %v15562_v25, %v15561_v39 }
 0x4d8   :  { %v14640_v48 = vpack.c.bf16 %v15664_v14, %v15663_v30 }
 0x4d9   :  { %11963 = vmatpush3.bf16.msra.mxu1 %v14619_v31 }
 0x4da   :  { %12003 = vmatpush3.bf16.msra.mxu0 %v12002_v24  ;;  %11965 = vmatprep.subr.bf16.mxu1 %v14626_v7  ;;  %v15669_v24 = vld [vmem:[#allocation62_spill] sm:$0xff] }
 0x4db   :  { %12037 = vmatprep.subr.bf16.mxu0 %v14458_v37 }
 0x4dd   :  { %11967 = vmatpush3.bf16.msra.mxu1 %v14633_v0 }
 0x4de   :  { %11969 = vmatprep.subr.bf16.mxu1 %v14640_v48 }
 0x4e1   :  { %11971 = vmatpush3.bf16.msra.mxu1 %v14648_v6 }
 0x4e2   :  { %12005 = vmatprep.subr.bf16.mxu1 %v12004_v12 }
 0x4f3   :  { %v6273_v51 = vpop.f32.mrb[16].mxu0 }
 0x4f4   :  { %v6280_v1 = vmul.f32 %v6273_v51, %v14540_v21  ;;  %v6275_v26 = vpop.f32.mrb[17].mxu0 }
 0x4f5   :  { %v6281_v43 = vmul.f32 %v6275_v26, %v14550_v20  ;;  %v15674_v26 = vpack.c.bf16 %v15574_v61, %v15573_v38 }
 0x4f6   :  { %v6284_v47 = vadd.f32 %v6280_v1, %v15669_v24  ;;  %v15671_v1 = vpack.c.bf16 %v15560_v41, %v14008_v49  ;;  %v15677_v24 = vld [vmem:[#allocation48_spill] sm:$0xff] }
 0x4f7   :  { %v6285_v34 = vadd.f32 %v6281_v43, %v15670_v2  ;;  %v15675_v43 = vpack.c.bf16 %v15578_v52, %v15577_v60 }
 0x4f8   :  { %v6311_v3 = vadd.f32 %v6300_v36, %v6284_v47  ;;  %v15673_v36 = vpack.c.bf16 %v15569_v4, %v15566_v62  ;;  %v15678_v47 = vld [vmem:[#allocation47_spill] sm:$0xff] }
 0x4f9   :  { %v6312_v27 = vadd.f32 %v6304_v63, %v6285_v34  ;;  %v15676_v63 = vpack.c.bf16 %v15586_v42, %v15585_v59  ;;  %v15679_v2 = vpack.c.bf16 %v15677_v24, %v15678_v47  ;;  %v15680_v34 = vld [vmem:[#allocation15_spill] sm:$0xff] }
 0x4fa   :  { %v6315_v18 = vmax.f32 %v6311_v3, 0.0  ;;  %v15681_v3 = vpack.c.bf16 %v15593_v8, %v15680_v34 }
 0x4fb   :  { %v6316_v30 = vmax.f32 %v6312_v27, 0.0  ;;  %v15682_v27 = vpack.c.bf16 %v15595_v11, %v15594_v40 }
 0x4fc   :  { %v14662_v14 = vand.u32 4294901760, %v6315_v18 }
 0x4fd   :  { %v7344_v54 = vand.u32 4294901760, %v6316_v30 }
 0x4fe   :  { %v7351_v21 = vsub.f32 %v6315_v18, %v14662_v14  ;;  %v15683_v18 = vld [vmem:[#allocation21_spill] sm:$0xff] }
 0x4ff   :  { %v7345_v32 = vsub.f32 %v6316_v30, %v7344_v54  ;;  %7585 = vmatprep.mubr.f32.mxu0 %v7344_v54  ;;  %v15684_v30 = vpack.c.bf16 %v15598_v50, %v15683_v18 }
 0x500   :  { %7587 = vmatmul.mubr.f32.vlgmr.msra.gmra.mrb[24].mxu0 %v14662_v14  ;;  %v7352_v20 = vand.u32 4294901760, %v7351_v21 }
 0x501   :  { %12039 = vmatpush3.bf16.msra.mxu0 %v14492_v28  ;;  %v7346_v12 = vand.u32 4294901760, %v7345_v32 }
 0x502   :  { %12041 = vmatprep.subr.bf16.mxu0 %v14498_v33  ;;  %v7353_v55 = vsub.f32 %v7351_v21, %v7352_v20 }
 0x503   :  { %7829 = vmatprep.mubr.f32.mxu0 %v7346_v12  ;;  %v7347_v19 = vsub.f32 %v7345_v32, %v7346_v12  ;;  %v15686_v12 = vld [vmem:[#allocation61_spill] sm:$0xff] }
 0x504   :  { %v7354_v51 = vand.u32 4294901760, %v7353_v55  ;;  %v15687_v55 = vpack.c.bf16 %v14246_v5, %v15686_v12 }
 0x505   :  { %12043 = vmatpush3.bf16.msra.mxu0 %v14522_v9  ;;  %v7348_v45 = vand.u32 4294901760, %v7347_v19  ;;  %v15688_v19 = vld [vmem:[#allocation19_spill] sm:$0xff] }
 0x506   :  { %12045 = vmatprep.subr.bf16.mxu0 %v14528_v35 }
 0x507   :  { %7349 = vmatprep.mubr.f32.mxu1 %v7348_v45  ;;  %v15689_v45 = vpack.c.bf16 %v14282_v17, %v15688_v19 }
 0x508   :  { %7355 = vmatmul.mubr.f32.vlgmr.msra.gmra.mrb[12].mxu1 %v7354_v51  ;;  %v15690_v51 = vld [vmem:[#allocation20_spill] sm:$0xff] }
 0x509   :  { %12007 = vmatpush3.bf16.msra.mxu1 %v15671_v1  ;;  %12047 = vmatpush3.bf16.msra.mxu0 %v14556_v22  ;;  %v15691_v1 = vpack.c.bf16 %v14297_v10, %v15690_v51 }
 0x50a   :  { %7722 = vmatprep.mubr.f32.mxu1 %v7345_v32  ;;  %12009 = vmatprep.subr.bf16.mxu1 %v15672_v57  ;;  %v15685_v32 = vpack.c.bf16 %v15612_v53, %v15611_v58  ;;  %v15692_v57 = vand.u32 4294901760, %v14344_v46  ;;  %v15698_v46 = vand.u32 4294901760, %v15561_v39  ;;  %v15704_v39 = vand.u32 4294901760, %v15577_v60 }
 0x50b   :  { %12049 = vmatprep.subr.bf16.mxu0 %v14563_v15  ;;  %v15711_v60 = vand.u32 4294901760, %v15593_v8  ;;  %v15716_v8 = vand.u32 4294901760, %v15611_v58  ;;  %v15722_v58 = vand.u32 4294901760, %v15690_v51 }
 0x50d   :  { %12011 = vmatpush3.bf16.msra.mxu1 %v15673_v36  ;;  %12051 = vmatpush3.bf16.msra.mxu0 %v14585_v23  ;;  %v15693_v36 = vand.u32 4294901760, %v14349_v44  ;;  %v15699_v44 = vand.u32 4294901760, %v15562_v25  ;;  %v15705_v25 = vand.u32 4294901760, %v15578_v52  ;;  %v15710_v52 = vand.u32 4294901760, %v15680_v34 }
 0x50e   :  { %12013 = vmatprep.subr.bf16.mxu1 %v15674_v26  ;;  %12053 = vmatprep.subr.bf16.mxu0 %v14591_v56 }
 0x50f   :  { %v12068_v26 = vpack.c.bf16 %v15693_v36, %v15692_v57 }
 0x511   :  { %12015 = vmatpush3.bf16.msra.mxu1 %v15675_v43  ;;  %12055 = vmatpush3.bf16.msra.mxu0 %v14605_v13  ;;  %v15697_v43 = vand.u32 4294901760, %v15560_v41  ;;  %v15703_v41 = vand.u32 4294901760, %v15574_v61  ;;  %v15709_v61 = vand.u32 4294901760, %v15677_v24 }
 0x512   :  { %12017 = vmatprep.subr.bf16.mxu1 %v15676_v63  ;;  %12057 = vmatprep.subr.bf16.mxu0 %v14612_v29 }
 0x515   :  { %12019 = vmatpush3.bf16.msra.mxu1 %v15679_v2  ;;  %12059 = vmatpush3.bf16.msra.mxu0 %v14619_v31  ;;  %v12072_v2 = vpack.c.bf16 %v15699_v44, %v15698_v46 }
 0x516   :  { %12021 = vmatprep.subr.bf16.mxu1 %v15681_v3  ;;  %12061 = vmatprep.subr.bf16.mxu0 %v14626_v7 }
 0x519   :  { %12023 = vmatpush3.bf16.msra.mxu1 %v15682_v27  ;;  %12063 = vmatpush3.bf16.msra.mxu0 %v14633_v0  ;;  %v15724_v27 = vmov 0.0|0.0  }
 0x51a   :  { %12025 = vmatprep.subr.bf16.mxu1 %v15684_v30  ;;  %12065 = vmatprep.subr.bf16.mxu0 %v14640_v48 }
 0x51d   :  { %12027 = vmatpush3.bf16.msra.mxu1 %v15685_v32  ;;  %12067 = vmatpush3.bf16.msra.mxu0 %v14648_v6 }
 0x51e   :  { %12029 = vmatprep.subr.bf16.mxu1 %v15687_v55  ;;  %12101 = vmatprep.subr.bf16.mxu0 %v14458_v37  ;;  %v15694_v37 = vld [vmem:[#allocation64_spill] sm:$0xff] }
 0x520   :  { %7833 = vmatmul.mubr.f32.vlgmr.msra.gmra.mrb[26].mxu0 %v7352_v20  ;;  %v15695_v20 = vpack.c.bf16 %v14317_v16, %v15694_v37 }
 0x521   :  { %12031 = vmatpush3.bf16.msra.mxu1 %v15689_v45  ;;  %12103 = vmatpush3.bf16.msra.mxu0 %v14492_v28  ;;  %v15696_v28 = vand.u32 4294901760, %v14008_v49  ;;  %v15702_v49 = vand.u32 4294901760, %v15573_v38  ;;  %v15708_v38 = vand.u32 4294901760, %v15678_v47 }
 0x522   :  { %8103 = vmatprep.mubr.f32.mxu0 %v7344_v54  ;;  %12033 = vmatprep.subr.bf16.mxu1 %v15691_v1 }
 0x523   :  { %12105 = vmatprep.subr.bf16.mxu0 %v14498_v33  ;;  %v12070_v63 = vpack.c.bf16 %v15697_v43, %v15696_v28  ;;  %v15700_v33 = vand.u32 4294901760, %v15566_v62  ;;  %v15706_v62 = vand.u32 4294901760, %v15585_v59  ;;  %v15712_v59 = vand.u32 4294901760, %v15594_v40  ;;  %v8111_v28 = vld [vmem:[#allocation2 + $0x2e8] sm:$0xff]  ;;  %v8112_v43 = vld [vmem:[#allocation2 + $0x2f0] sm:$0xff] }
 0x524   :  { %v15718_v40 = vand.u32 4294901760, %v15686_v12  ;;  %v10190_v12 = vld [vmem:[#allocation2 + $0x2e0] ss:$0 sm:$0xff]  ;;  %v8136_v46 = vand.u32 4294901760, %v8112_v43 }
 0x525   :  { %12035 = vmatpush3.bf16.msra.mxu1 %v15695_v20  ;;  %12107 = vmatpush3.bf16.msra.mxu0 %v14522_v9  ;;  %v15701_v9 = vand.u32 4294901760, %v15569_v4  ;;  %v15707_v4 = vand.u32 4294901760, %v15586_v42 }
 0x526   :  { %12069 = vmatprep.subr.bf16.mxu1 %v12068_v26  ;;  %12109 = vmatprep.subr.bf16.mxu0 %v14528_v35  ;;  %v12076_v35 = vpack.c.bf16 %v15703_v41, %v15702_v49 }
 0x527   :  { %v12074_v3 = vpack.c.bf16 %v15701_v9, %v15700_v33  ;;  %v14818_v33 = vsub.f32 %v8112_v43, %v8136_v46  ;;  %v8113_v9 = vld [vmem:[#allocation2 + $0x2f8] sm:$0xff] }
 0x528   :  { %7725 = vmatmul.mubr.f32.vlgmr.msra.gmra.mrb[14].mxu1 %v7351_v21  ;;  %v15714_v21 = vand.u32 4294901760, %v15683_v18  ;;  %v8139_v41 = vand.u32 4294901760, %v8113_v9 }
 0x529   :  { %12071 = vmatpush3.bf16.msra.mxu1 %v12070_v63  ;;  %7999 = vmatprep.mubr.f32.mxu1 %v7344_v54  ;;  %v12078_v54 = vpack.c.bf16 %v15705_v25, %v15704_v39  ;;  %v8133_v63 = vand.u32 4294901760, %v8111_v28 }
 0x52a   :  { %12111 = vmatpush3.bf16.msra.mxu0 %v14556_v22  ;;  %12073 = vmatprep.subr.bf16.mxu1 %v12072_v2  ;;  %v12080_v22 = vpack.c.bf16 %v15707_v4, %v15706_v62  ;;  %v8115_v62 = vld [vmem:[#allocation2 + $0x308] sm:$0xff]  ;;  %v8116_v4 = vld [vmem:[#allocation2 + $0x310] sm:$0xff] }
 0x52b   :  { %12113 = vmatprep.subr.bf16.mxu0 %v14563_v15  ;;  %v12082_v15 = vpack.c.bf16 %v15709_v61, %v15708_v38  ;;  %v14814_v44 = vpack.c.bf16 %v8136_v46, %v8133_v63  ;;  %v14816_v2 = vsub.f32 %v8111_v28, %v8133_v63  ;;  %v8145_v61 = vand.u32 4294901760, %v8115_v62 }
 0x52c   :  { %v15371_v28 = vand.u32 4294901760, %v14818_v33 }
 0x52d   :  { %12075 = vmatpush3.bf16.msra.mxu1 %v12074_v3  ;;  %v8114_v3 = vld [vmem:[#allocation2 + $0x300] sm:$0xff] }
 0x52e   :  { %12115 = vmatpush3.bf16.msra.mxu0 %v14585_v23  ;;  %12077 = vmatprep.subr.bf16.mxu1 %v12076_v35  ;;  %v12084_v23 = vpack.c.bf16 %v15711_v60, %v15710_v52  ;;  %v8142_v35 = vand.u32 4294901760, %v8114_v3  ;;  %v14832_v60 = vsub.f32 %v8115_v62, %v8145_v61 }
 0x52f   :  { %12117 = vmatprep.subr.bf16.mxu0 %v14591_v56  ;;  %v15713_v56 = vand.u32 4294901760, %v15595_v11  ;;  %v15719_v11 = vand.u32 4294901760, %v14246_v5  ;;  %v15725_v5 = vand.u32 4294901760, %v15694_v37 }
 0x530   :  { %v14827_v38 = vsub.f32 %v8114_v3, %v8142_v35  ;;  %v8234_v3 = vsub.f32 %v14818_v33, %v15371_v28 }
 0x531   :  { %12079 = vmatpush3.bf16.msra.mxu1 %v12078_v54  ;;  %v12086_v42 = vpack.c.bf16 %v15713_v56, %v15712_v59  ;;  %v14822_v54 = vpack.c.bf16 %v8142_v35, %v8139_v41  ;;  %v8117_v56 = vld [vmem:[#allocation2 + $0x318] sm:$0xff] }
 0x532   :  { %12119 = vmatpush3.bf16.msra.mxu0 %v14605_v13  ;;  %12081 = vmatprep.subr.bf16.mxu1 %v12080_v22  ;;  %v15715_v13 = vand.u32 4294901760, %v15598_v50  ;;  %v15720_v50 = vand.u32 4294901760, %v15688_v19  ;;  %v14825_v22 = vsub.f32 %v8113_v9, %v8139_v41  ;;  %v15369_v41 = vand.u32 4294901760, %v14827_v38 }
 0x533   :  { %12121 = vmatprep.subr.bf16.mxu0 %v14612_v29  ;;  %v15717_v29 = vand.u32 4294901760, %v15612_v53  ;;  %v15723_v53 = vand.u32 4294901760, %v14297_v10 }
 0x534   :  { %v12088_v24 = vpack.c.bf16 %v15715_v13, %v15714_v21  ;;  %v8151_v13 = vand.u32 4294901760, %v8117_v56  ;;  %v8248_v62 = vsub.f32 %v14827_v38, %v15369_v41 }
 0x535   :  { %12083 = vmatpush3.bf16.msra.mxu1 %v12082_v15  ;;  %v12090_v47 = vpack.c.bf16 %v15717_v29, %v15716_v8  ;;  %v8148_v15 = vand.u32 4294901760, %v8116_v4 }
 0x536   :  { %12123 = vmatpush3.bf16.msra.mxu0 %v14619_v31  ;;  %12085 = vmatprep.subr.bf16.mxu1 %v12084_v23  ;;  %v12092_v31 = vpack.c.bf16 %v15719_v11, %v15718_v40  ;;  %v14840_v40 = vsub.f32 %v8117_v56, %v8151_v13 }
 0x537   :  { %12125 = vmatprep.subr.bf16.mxu0 %v14626_v7  ;;  %v15721_v7 = vand.u32 4294901760, %v14282_v17  ;;  %v15727_v17 = vmov 0.0   ;;  %v14830_v52 = vpack.c.bf16 %v8148_v15, %v8145_v61  ;;  %v14834_v23 = vsub.f32 %v8116_v4, %v8148_v15 }
 0x538   :  { %v8249_v15 = vand.u32 4294901760, %v8248_v62 }
 0x539   :  { %12087 = vmatpush3.bf16.msra.mxu1 %v12086_v42  ;;  %v12094_v34 = vpack.c.bf16 %v15721_v7, %v15720_v50  ;;  %v8118_v42 = vld [vmem:[#allocation2 + $0x320] sm:$0xff]  ;;  %v8120_v50 = vld [vmem:[#allocation2 + $0x330] sm:$0xff]  ;;  %v15367_v56 = vand.u32 4294901760, %v14834_v23 }
 0x53a   :  { %12127 = vmatpush3.bf16.msra.mxu0 %v14633_v0  ;;  %12089 = vmatprep.subr.bf16.mxu1 %v12088_v24  ;;  %v12096_v0 = vpack.c.bf16 %v15723_v53, %v15722_v58  ;;  %v8154_v24 = vand.u32 4294901760, %v8118_v42 }
 0x53b   :  { %12129 = vmatprep.subr.bf16.mxu0 %v14640_v48  ;;  %v15726_v48 = vand.u32 4294901760, %v14317_v16 }
 0x53c   :  { %v14838_v29 = vpack.c.bf16 %v8154_v24, %v8151_v13  ;;  %v14842_v11 = vsub.f32 %v8118_v42, %v8154_v24  ;;  %v8262_v13 = vsub.f32 %v14834_v23, %v15367_v56 }
 0x53d   :  { %12091 = vmatpush3.bf16.msra.mxu1 %v12090_v47  ;;  %v12098_v18 = vpack.c.bf16 %v15726_v48, %v15725_v5  ;;  %v8122_v5 = vld [vmem:[#allocation2 + $0x340] sm:$0xff] }
 0x53e   :  { %12131 = vmatpush3.bf16.msra.mxu0 %v14648_v6  ;;  %12093 = vmatprep.subr.bf16.mxu1 %v12092_v31  ;;  %v8119_v31 = vld [vmem:[#allocation2 + $0x328] sm:$0xff] }
 0x53f   :  { %12276 = vmatprep.subr.bf16.mxu0 %v15724_v27  ;;  %v8157_v7 = vand.u32 4294901760, %v8119_v31 }
 0x541   :  { %8105 = vmatmul.mubr.f32.vlgmr.msra.gmra.mrb[28].mxu0 %v14662_v14  ;;  %12095 = vmatpush3.bf16.msra.mxu1 %v12094_v34  ;;  %v8160_v34 = vand.u32 4294901760, %v8120_v50 }
 0x542   :  { %12097 = vmatprep.subr.bf16.mxu1 %v12096_v0  ;;  %11156 = vmatprep.mubr.msk.f32.mxu0 %vm12492_vm1, %v15727_v17  ;;  %v8121_v0 = vld [vmem:[#allocation2 + $0x338] sm:$0xff] }
 0x543   :  { %v14848_v53 = vpack.c.bf16 %v8160_v34, %v8157_v7  ;;  %v8163_v48 = vand.u32 4294901760, %v8121_v0 }
 0x545   :  { %12099 = vmatpush3.bf16.msra.mxu1 %v12098_v18  ;;  %v8166_v18 = vand.u32 4294901760, %v8122_v5 }
 0x546   :  { %12132 = vmatprep.subr.bf16.mxu1 %v15724_v27 }
 0x548   :  { %8001 = vmatmul.mubr.f32.vlgmr.msra.gmra.mrb[16].mxu1 %v14662_v14 }
 0x549   :  { %10970 = vmatprep.mubr.msk.f32.mxu1 %vm12492_vm1, %v15727_v17  ;;  %12134 = vmatpush3.bf16.msra.mxu1 %v14814_v44 }
 0x54a   :  { %12135 = vmatprep.subr.bf16.mxu1 %v15724_v27 }
 0x54d   :  { %12137 = vmatpush3.bf16.msra.mxu1 %v14822_v54 }
 0x54e   :  { %12138 = vmatprep.subr.bf16.mxu1 %v15724_v27 }
 0x54f   :  { %v10315_v10 = vpop.f32.mrb[18].mxu0 }
 0x550   :  { %v10316_v6 = vpop.f32.mrb[19].mxu0 }
 0x551   :  { %v10317_v30 = vadd.f32 %v10316_v6, %v10315_v10  ;;  %12140 = vmatpush3.bf16.msra.mxu1 %v14830_v52  ;;  %v14852_v10 = vpack.c.bf16 %v8166_v18, %v8163_v48  ;;  %v8123_v6 = vld [vmem:[#allocation2 + $0x348] sm:$0xff] }
 0x552   :  { %12141 = vmatprep.subr.bf16.mxu1 %v15724_v27 }
 0x555   :  { %12143 = vmatpush3.bf16.msra.mxu1 %v14838_v29 }
 0x556   :  { %12144 = vmatprep.subr.bf16.mxu1 %v15724_v27 }
 0x557   :  { %v10280_v32 = vpop.f32.mrb[6].mxu1 }
 0x558   :  { %v10281_v55 = vpop.f32.mrb[7].mxu1 }
 0x559   :  { %v10282_v16 = vadd.f32 %v10281_v55, %v10280_v32  ;;  %12146 = vmatpush3.bf16.msra.mxu1 %v14848_v53  ;;  %v8169_v32 = vand.u32 4294901760, %v8123_v6 }
 0x55a   :  { %12147 = vmatprep.subr.bf16.mxu1 %v15724_v27 }
 0x55b   :  { %v6495_v19 = vadd.f32 %v10282_v16, %v10190_v12  ;;  %v14858_v16 = vsub.f32 %v8119_v31, %v8157_v7  ;;  %v15365_v31 = vand.u32 4294901760, %v14842_v11 }
 0x55d   :  { %v6727_v45 = vadd.f32 %v10317_v30, %v6495_v19  ;;  %v8124_v30 = vld [vmem:[#allocation2 + $0x350] sm:$0xff]  ;;  %12149 = vmatpush3.bf16.msra.mxu1 %v14852_v10  ;;  %v14860_v19 = vsub.f32 %v8120_v50, %v8160_v34  ;;  %v8276_v34 = vsub.f32 %v14842_v11, %v15365_v31 }
 0x55e   :  { %v8172_v12 = vand.u32 4294901760, %v8124_v30  ;;  %12150 = vmatprep.subr.bf16.mxu1 %v15724_v27 }
 0x560   :  { %v14856_v55 = vpack.c.bf16 %v8172_v12, %v8169_v32 }
 0x562   :  { %12152 = vmatpush3.bf16.msra.mxu1 %v14856_v55 }
 0x563   :  { %12153 = vmatprep.subr.bf16.mxu1 %v15724_v27 }
 0x56f   :  { %v10385_v51 = vpop.f32.mrb[20].mxu0 }
 0x570   :  { %v10386_v1 = vpop.f32.mrb[21].mxu0 }
 0x571   :  { %v10387_v57 = vadd.f32 %v10386_v1, %v10385_v51  ;;  %v14864_v51 = vsub.f32 %v8122_v5, %v8166_v18  ;;  %v8125_v1 = vld [vmem:[#allocation2 + $0x358] sm:$0xff]  ;;  %v8277_v5 = vand.u32 4294901760, %v8276_v34  ;;  %v15363_v18 = vand.u32 4294901760, %v14860_v19 }
 0x577   :  { %v10350_v36 = vpop.f32.mrb[8].mxu1 }
 0x578   :  { %v10351_v26 = vpop.f32.mrb[9].mxu1 }
 0x579   :  { %v10352_v37 = vadd.f32 %v10351_v26, %v10350_v36  ;;  %v14867_v36 = vsub.f32 %v8123_v6, %v8169_v32  ;;  %v14869_v26 = vsub.f32 %v8124_v30, %v8172_v12  ;;  %v8290_v32 = vsub.f32 %v14860_v19, %v15363_v18 }
 0x57b   :  { %v6865_v20 = vadd.f32 %v10352_v37, %v6727_v45  ;;  %v14862_v45 = vsub.f32 %v8121_v0, %v8163_v48  ;;  %v8175_v37 = vand.u32 4294901760, %v8125_v1  ;;  %v15364_v48 = vand.u32 4294901760, %v14858_v16 }
 0x57c   :  { %v15359_v62 = vand.u32 4294901760, %v14869_v26 }
 0x57d   :  { %v6973_v14 = vadd.f32 %v10387_v57, %v6865_v20  ;;  %v8126_v57 = vld [vmem:[#allocation2 + $0x360] sm:$0xff]  ;;  %v14876_v63 = vsub.f32 %v8125_v1, %v8175_v37  ;;  %v8283_v30 = vsub.f32 %v14858_v16, %v15364_v48  ;;  %v8291_v1 = vand.u32 4294901760, %v8290_v32 }
 0x57e   :  { %v8178_v20 = vand.u32 4294901760, %v8126_v57 }
 0x57f   :  { %v8284_v12 = vand.u32 4294901760, %v8283_v30 }
 0x580   :  { %v14874_v43 = vpack.c.bf16 %v8178_v20, %v8175_v37  ;;  %v14878_v46 = vsub.f32 %v8126_v57, %v8178_v20  ;;  %v15362_v57 = vand.u32 4294901760, %v14862_v45  ;;  %v15361_v37 = vand.u32 4294901760, %v14864_v51 }
 0x581   :  { %v14930_v20 = vpack.c.bf16 %v8291_v1, %v8284_v12  ;;  %v12181_v1 = vpack.c.bf16 %v14818_v33, %v14816_v2 }
 0x582   :  { %12155 = vmatpush3.bf16.msra.mxu1 %v14874_v43 }
 0x583   :  { %12156 = vmatprep.subr.bf16.mxu1 %v15724_v27 }
 0x590   :  { %v10455_v49 = vpop.f32.mrb[22].mxu0 }
 0x591   :  { %v10456_v39 = vpop.f32.mrb[23].mxu0 }
 0x592   :  { %v10457_v25 = vadd.f32 %v10456_v39, %v10455_v49  ;;  %v15370_v49 = vand.u32 4294901760, %v14825_v22  ;;  %v8235_v39 = vand.u32 4294901760, %v8234_v3  ;;  %v8304_v3 = vsub.f32 %v14864_v51, %v15361_v37 }
 0x597   :  { %v10420_v59 = vpop.f32.mrb[10].mxu1 }
 0x598   :  { %v10421_v21 = vpop.f32.mrb[11].mxu1 }
 0x599   :  { %v10422_v8 = vadd.f32 %v10421_v21, %v10420_v59  ;;  %v15368_v59 = vand.u32 4294901760, %v14832_v60 }
 0x59b   :  { %v7141_v47 = vadd.f32 %v10422_v8, %v6973_v14  ;;  %v8226_v14 = vand.u32 4294901760, %v14816_v2  ;;  %v8255_v21 = vsub.f32 %v14832_v60, %v15368_v59  ;;  %v8263_v8 = vand.u32 4294901760, %v8262_v13 }
 0x59d   :  { %v14845_v58 = vadd.f32 %v10457_v25, %v7141_v47  ;;  %v8227_v9 = vsub.f32 %v14816_v2, %v8226_v14  ;;  %v8241_v25 = vsub.f32 %v14825_v22, %v15370_v49  ;;  %v8256_v24 = vand.u32 4294901760, %v8255_v21 }
 0x59e   :  { %v15366_v47 = vand.u32 4294901760, %v14840_v40  ;;  %v8318_v21 = vsub.f32 %v14869_v26, %v15359_v62  ;;  %v15731_v2 = vand.u32 4294901760, %v14832_v60 }
 0x59f   :  { %v8228_v35 = vand.u32 4294901760, %v8227_v9  ;;  %v8242_v61 = vand.u32 4294901760, %v8241_v25  ;;  %v14910_v50 = vpack.c.bf16 %v8263_v8, %v8256_v24  ;;  %v8297_v9 = vsub.f32 %v14862_v45, %v15362_v57 }
 0x5a0   :  { %v8269_v7 = vsub.f32 %v14840_v40, %v15366_v47  ;;  %v15360_v25 = vand.u32 4294901760, %v14867_v36  ;;  %v8319_v24 = vand.u32 4294901760, %v8318_v21  ;;  %v15358_v8 = vand.u32 4294901760, %v14876_v63 }
 0x5a1   :  { %v14896_v4 = vpack.c.bf16 %v8235_v39, %v8228_v35  ;;  %v14900_v42 = vpack.c.bf16 %v8249_v15, %v8242_v61  ;;  %v8298_v35 = vand.u32 4294901760, %v8297_v9  ;;  %v8305_v39 = vand.u32 4294901760, %v8304_v3 }
 0x5a2   :  { %v8270_v0 = vand.u32 4294901760, %v8269_v7  ;;  %v8311_v15 = vsub.f32 %v14867_v36, %v15360_v25  ;;  %v15357_v7 = vand.u32 4294901760, %v14878_v46  ;;  %v12184_v9 = vpack.c.bf16 %v14827_v38, %v14825_v22 }
 0x5a3   :  { %v12172_v61 = vpack.c.bf16 %v8305_v39, %v8298_v35  ;;  %v12190_v21 = vpack.c.bf16 %v14842_v11, %v14840_v40 }
 0x5a4   :  { %v14920_v6 = vpack.c.bf16 %v8277_v5, %v8270_v0  ;;  %v8312_v13 = vand.u32 4294901760, %v8311_v15  ;;  %v8325_v0 = vsub.f32 %v14876_v63, %v15358_v8  ;;  %v8332_v5 = vsub.f32 %v14878_v46, %v15357_v7 }
 0x5a5   :  { %v12187_v15 = vpack.c.bf16 %v14834_v23, %v14832_v60  ;;  %v12196_v7 = vpack.c.bf16 %v14864_v51, %v14862_v45  ;;  %v15737_v60 = vand.u32 4294901760, %v14862_v45 }
 0x5a6   :  { %v12175_v34 = vpack.c.bf16 %v8319_v24, %v8312_v13  ;;  %v8326_v30 = vand.u32 4294901760, %v8325_v0  ;;  %v8333_v32 = vand.u32 4294901760, %v8332_v5  ;;  %v12193_v5 = vpack.c.bf16 %v14860_v19, %v14858_v16 }
 0x5a8   :  { %v12178_v12 = vpack.c.bf16 %v8333_v32, %v8326_v30 }
 0x5d3   :  { %v10525_v3 = vpop.f32.mrb[24].mxu0 }
 0x5d4   :  { %v10526_v35 = vpop.f32.mrb[25].mxu0 }
 0x5d5   :  { %v10527_v39 = vadd.f32 %v10526_v35, %v10525_v3  ;;  %v12199_v3 = vpack.c.bf16 %v14869_v26, %v14867_v36  ;;  %v12202_v35 = vpack.c.bf16 %v14878_v46, %v14876_v63 }
 0x5db   :  { %v10490_v13 = vpop.f32.mrb[12].mxu1 }
 0x5dc   :  { %v10491_v24 = vpop.f32.mrb[13].mxu1 }
 0x5dd   :  { %v10492_v0 = vadd.f32 %v10491_v24, %v10490_v13 }
 0x5df   :  { %v7357_v30 = vadd.f32 %v10492_v0, %v14845_v58 }
 0x5e1   :  { %v7589_v32 = vadd.f32 %v10527_v39, %v7357_v30 }
 0x5f3   :  { %v10595_v8 = vpop.f32.mrb[26].mxu0 }
 0x5f4   :  { %v10596_v62 = vpop.f32.mrb[27].mxu0 }
 0x5f5   :  { %v10597_v25 = vadd.f32 %v10596_v62, %v10595_v8 }
 0x5fb   :  { %v10560_v37 = vpop.f32.mrb[14].mxu1 }
 0x5fc   :  { %v10561_v13 = vpop.f32.mrb[15].mxu1 }
 0x5fd   :  { %v10562_v24 = vadd.f32 %v10561_v13, %v10560_v37 }
 0x5ff   :  { %v7727_v57 = vadd.f32 %v10562_v24, %v7589_v32  ;;  %v10191_v24 = vld [vmem:[#allocation2 + $0x368] ss:$0 sm:$0xff] }
 0x601   :  { %v7835_v18 = vadd.f32 %v10597_v25, %v7727_v57 }
 0x614   :  { %v10665_v48 = vpop.f32.mrb[28].mxu0 }
 0x615   :  { %v10666_v58 = vpop.f32.mrb[29].mxu0 }
 0x616   :  { %v10667_v39 = vadd.f32 %v10666_v58, %v10665_v48 }
 0x61b   :  { %v10630_v0 = vpop.f32.mrb[16].mxu1 }
 0x61c   :  { %v10631_v30 = vpop.f32.mrb[17].mxu1 }
 0x61d   :  { %v10632_v31 = vadd.f32 %v10631_v30, %v10630_v0 }
 0x61f   :  { %v8003_v47 = vadd.f32 %v10632_v31, %v7835_v18  ;;  %v15736_v31 = vand.u32 4294901760, %v14860_v19  ;;  %v15742_v19 = vand.u32 4294901760, %v14878_v46 }
 0x621   :  { %v8107_v56 = vadd.f32 %v10667_v39, %v8003_v47  ;;  %v15735_v47 = vand.u32 4294901760, %v14858_v16  ;;  %v15741_v16 = vand.u32 4294901760, %v14876_v63 }
 0x623   :  { %v8110_v59 = vmax.f32 %v8107_v56, 0.0  ;;  %v15730_v56 = vand.u32 4294901760, %v14827_v38 }
 0x625   :  { %v14971_v41 = vand.u32 4294901760, %v8110_v59 }
 0x627   :  { %v8214_v49 = vsub.f32 %v8110_v59, %v14971_v41  ;;  %v15729_v59 = vand.u32 4294901760, %v14825_v22  ;;  %v15734_v22 = vand.u32 4294901760, %v14842_v11  ;;  %v15740_v11 = vand.u32 4294901760, %v14869_v26 }
 0x629   :  { %v8215_v28 = vand.u32 4294901760, %v8214_v49 }
 0x62b   :  { %v8216_v62 = vsub.f32 %v8214_v49, %v8215_v28 }
 0x62d   :  { %v8217_v8 = vand.u32 4294901760, %v8216_v62 }
 0x62f   :  { %10971 = vmatmul.mubr.f32.vlgmr.msra.gmra.mrb[18].mxu1 %v8217_v8 }
 0x630   :  { %12158 = vmatpush3.bf16.msra.mxu1 %v14896_v4  ;;  %11005 = vmatprep.mubr.msk.f32.mxu1 %vm12492_vm1, %v15727_v17 }
 0x631   :  { %12159 = vmatprep.subr.bf16.mxu1 %v15724_v27 }
 0x634   :  { %12161 = vmatpush3.bf16.msra.mxu1 %v14900_v42  ;;  %v12232_v42 = vpack.c.bf16 %v15730_v56, %v15729_v59 }
 0x635   :  { %12162 = vmatprep.subr.bf16.mxu1 %v15724_v27 }
 0x638   :  { %12164 = vmatpush3.bf16.msra.mxu1 %v14910_v50  ;;  %v12241_v50 = vpack.c.bf16 %v15736_v31, %v15735_v47 }
 0x639   :  { %12165 = vmatprep.subr.bf16.mxu1 %v15724_v27 }
 0x63c   :  { %12167 = vmatpush3.bf16.msra.mxu1 %v14920_v6  ;;  %v12250_v6 = vpack.c.bf16 %v15742_v19, %v15741_v16 }
 0x63d   :  { %12168 = vmatprep.subr.bf16.mxu1 %v15724_v27 }
 0x640   :  { %12170 = vmatpush3.bf16.msra.mxu1 %v14930_v20 }
 0x641   :  { %12171 = vmatprep.subr.bf16.mxu1 %v15724_v27 }
 0x644   :  { %12173 = vmatpush3.bf16.msra.mxu1 %v12172_v61 }
 0x645   :  { %12174 = vmatprep.subr.bf16.mxu1 %v15724_v27 }
 0x648   :  { %12176 = vmatpush3.bf16.msra.mxu1 %v12175_v34 }
 0x649   :  { %12177 = vmatprep.subr.bf16.mxu1 %v15724_v27 }
 0x64c   :  { %12179 = vmatpush3.bf16.msra.mxu1 %v12178_v12 }
 0x64d   :  { %12180 = vmatprep.subr.bf16.mxu1 %v15724_v27 }
 0x64f   :  { %11006 = vmatmul.mubr.f32.vlgmr.msra.gmra.mrb[18].mxu1 %v14971_v41 }
 0x650   :  { %12182 = vmatpush3.bf16.msra.mxu1 %v12181_v1  ;;  %11040 = vmatprep.mubr.msk.f32.mxu1 %vm12492_vm1, %v15727_v17 }
 0x651   :  { %12183 = vmatprep.subr.bf16.mxu1 %v15724_v27 }
 0x654   :  { %12185 = vmatpush3.bf16.msra.mxu1 %v12184_v9 }
 0x655   :  { %12186 = vmatprep.subr.bf16.mxu1 %v15724_v27 }
 0x658   :  { %12188 = vmatpush3.bf16.msra.mxu1 %v12187_v15 }
 0x659   :  { %12189 = vmatprep.subr.bf16.mxu1 %v15724_v27 }
 0x65c   :  { %12191 = vmatpush3.bf16.msra.mxu1 %v12190_v21 }
 0x65d   :  { %12192 = vmatprep.subr.bf16.mxu1 %v15724_v27 }
 0x660   :  { %12194 = vmatpush3.bf16.msra.mxu1 %v12193_v5 }
 0x661   :  { %12195 = vmatprep.subr.bf16.mxu1 %v15724_v27 }
 0x664   :  { %12197 = vmatpush3.bf16.msra.mxu1 %v12196_v7 }
 0x665   :  { %12198 = vmatprep.subr.bf16.mxu1 %v15724_v27 }
 0x668   :  { %12200 = vmatpush3.bf16.msra.mxu1 %v12199_v3 }
 0x669   :  { %12201 = vmatprep.subr.bf16.mxu1 %v15724_v27 }
 0x66c   :  { %12203 = vmatpush3.bf16.msra.mxu1 %v12202_v35 }
 0x66d   :  { %12204 = vmatprep.subr.bf16.mxu1 %v15724_v27 }
 0x66f   :  { %11041 = vmatmul.mubr.f32.vlgmr.msra.gmra.mrb[18].mxu1 %v8214_v49  ;;  %v15728_v49 = vand.u32 4294901760, %v14818_v33  ;;  %v15732_v33 = vand.u32 4294901760, %v14834_v23  ;;  %v15738_v23 = vand.u32 4294901760, %v14864_v51 }
 0x670   :  { %12206 = vmatpush3.bf16.msra.mxu1 %v14814_v44  ;;  %11075 = vmatprep.mubr.msk.f32.mxu1 %vm12492_vm1, %v15727_v17 }
 0x671   :  { %12207 = vmatprep.subr.bf16.mxu1 %v15724_v27  ;;  %v12229_v4 = vpack.c.bf16 %v15728_v49, %v8226_v14  ;;  %v12235_v14 = vpack.c.bf16 %v15732_v33, %v15731_v2  ;;  %v12244_v48 = vpack.c.bf16 %v15738_v23, %v15737_v60  ;;  %v10192_v33 = vld [vmem:[#allocation2 + $0x390] ss:$0 sm:$0xff]  ;;  %v10188_v60 = vld [vmem:[#allocation2 + $0xd8] ss:$0 sm:$0xff] }
 0x674   :  { %12209 = vmatpush3.bf16.msra.mxu1 %v14822_v54 }
 0x675   :  { %12210 = vmatprep.subr.bf16.mxu1 %v15724_v27 }
 0x678   :  { %12212 = vmatpush3.bf16.msra.mxu1 %v14830_v52 }
 0x679   :  { %12213 = vmatprep.subr.bf16.mxu1 %v15724_v27 }
 0x67c   :  { %12215 = vmatpush3.bf16.msra.mxu1 %v14838_v29 }
 0x67d   :  { %12216 = vmatprep.subr.bf16.mxu1 %v15724_v27 }
 0x680   :  { %12218 = vmatpush3.bf16.msra.mxu1 %v14848_v53 }
 0x681   :  { %12219 = vmatprep.subr.bf16.mxu1 %v15724_v27 }
 0x684   :  { %12221 = vmatpush3.bf16.msra.mxu1 %v14852_v10 }
 0x685   :  { %12222 = vmatprep.subr.bf16.mxu1 %v15724_v27 }
 0x688   :  { %12224 = vmatpush3.bf16.msra.mxu1 %v14856_v55 }
 0x689   :  { %12225 = vmatprep.subr.bf16.mxu1 %v15724_v27 }
 0x68c   :  { %12227 = vmatpush3.bf16.msra.mxu1 %v14874_v43 }
 0x68d   :  { %12228 = vmatprep.subr.bf16.mxu1 %v15724_v27 }
 0x68f   :  { %11076 = vmatmul.mubr.f32.vlgmr.msra.gmra.mrb[18].mxu1 %v8215_v28  ;;  %v15733_v28 = vand.u32 4294901760, %v14840_v40  ;;  %v15739_v40 = vand.u32 4294901760, %v14867_v36  ;;  %v8776_v36 = vld [vmem:[#allocation2 + $0x380] sm:$0xff] }
 0x690   :  { %12230 = vmatpush3.bf16.msra.mxu1 %v12229_v4  ;;  %11110 = vmatprep.mubr.msk.f32.mxu1 %vm12492_vm1, %v15727_v17  ;;  %v8794_v26 = vand.u32 4294901760, %v8776_v36 }
 0x691   :  { %12231 = vmatprep.subr.bf16.mxu1 %v15724_v27  ;;  %v12238_v38 = vpack.c.bf16 %v15734_v22, %v15733_v28  ;;  %v12247_v18 = vpack.c.bf16 %v15740_v11, %v15739_v40  ;;  %v15743_v11 = vld [vmem:[#allocation8_spill] sm:$0xff] }
 0x694   :  { %12233 = vmatpush3.bf16.msra.mxu1 %v12232_v42  ;;  %v9274_v42 = vld [vmem:[#allocation2 + $0x3a0] sm:$0xff] }
 0x695   :  { %12234 = vmatprep.subr.bf16.mxu1 %v15724_v27  ;;  %v9280_v2 = vand.u32 4294901760, %v9274_v42 }
 0x698   :  { %12236 = vmatpush3.bf16.msra.mxu1 %v12235_v14 }
 0x699   :  { %12237 = vmatprep.subr.bf16.mxu1 %v15724_v27 }
 0x69c   :  { %12239 = vmatpush3.bf16.msra.mxu1 %v12238_v38  ;;  %v9357_v38 = vsub.f32 %v9274_v42, %v9280_v2 }
 0x69d   :  { %12240 = vmatprep.subr.bf16.mxu1 %v15724_v27 }
 0x69e   :  { %v9358_v31 = vand.u32 4294901760, %v9357_v38 }
 0x6a0   :  { %12242 = vmatpush3.bf16.msra.mxu1 %v12241_v50 }
 0x6a1   :  { %12243 = vmatprep.subr.bf16.mxu1 %v15724_v27 }
 0x6a4   :  { %12245 = vmatpush3.bf16.msra.mxu1 %v12244_v48  ;;  %v9359_v48 = vsub.f32 %v9357_v38, %v9358_v31 }
 0x6a5   :  { %12246 = vmatprep.subr.bf16.mxu1 %v15724_v27 }
 0x6a6   :  { %v9360_v19 = vand.u32 4294901760, %v9359_v48 }
 0x6a8   :  { %12248 = vmatpush3.bf16.msra.mxu1 %v12247_v18  ;;  %v12314_v18 = vadd.f32 %v10188_v60, %v15743_v11 }
 0x6a9   :  { %12249 = vmatprep.subr.bf16.mxu1 %v15724_v27 }
 0x6ac   :  { %12251 = vmatpush3.bf16.msra.mxu1 %v12250_v6 }
 0x6ad   :  { %12252 = vmatprep.subr.bf16.mxu1 %v15724_v27 }
 0x6af   :  { %11111 = vmatmul.mubr.f32.vlgmr.msra.gmra.mrb[18].mxu1 %v14971_v41 }
 0x6b0   :  { %12254 = vmatpush3.bf16.msra.mxu1 %v14814_v44  ;;  %11145 = vmatprep.mubr.msk.f32.mxu1 %vm12492_vm1, %v15727_v17  ;;  %v8774_v44 = vld [vmem:[#allocation2 + $0x370] sm:$0xff] }
 0x6b1   :  { %12255 = vmatprep.subr.bf16.mxu1 %v15724_v27 }
 0x6b4   :  { %12257 = vmatpush3.bf16.msra.mxu1 %v14822_v54  ;;  %v8775_v54 = vld [vmem:[#allocation2 + $0x378] sm:$0xff] }
 0x6b5   :  { %12258 = vmatprep.subr.bf16.mxu1 %v15724_v27 }
 0x6b8   :  { %12260 = vmatpush3.bf16.msra.mxu1 %v14830_v52  ;;  %v8788_v52 = vand.u32 4294901760, %v8774_v44 }
 0x6b9   :  { %12261 = vmatprep.subr.bf16.mxu1 %v15724_v27 }
 0x6bc   :  { %12263 = vmatpush3.bf16.msra.mxu1 %v14838_v29  ;;  %v8791_v29 = vand.u32 4294901760, %v8775_v54 }
 0x6bd   :  { %12264 = vmatprep.subr.bf16.mxu1 %v15724_v27 }
 0x6be   :  { %v15079_v45 = vpack.c.bf16 %v8791_v29, %v8788_v52  ;;  %v8875_v51 = vsub.f32 %v8775_v54, %v8791_v29  ;;  %v9273_v54 = vld [vmem:[#allocation2 + $0x398] sm:$0xff] }
 0x6bf   :  { %v9729_v29 = vand.u32 4294901760, %v9273_v54 }
 0x6c0   :  { %12266 = vmatpush3.bf16.msra.mxu1 %v14848_v53  ;;  %v8868_v53 = vsub.f32 %v8774_v44, %v8788_v52  ;;  %12278 = vmatpush3.bf16.msra.mxu0 %v15079_v45  ;;  %v8876_v46 = vand.u32 4294901760, %v8875_v51  ;;  %v2307_v44 = vmax.f32 %v12314_v18, 0.0 }
 0x6c1   :  { %12267 = vmatprep.subr.bf16.mxu1 %v15724_v27  ;;  %12279 = vmatprep.subr.bf16.mxu0 %v15724_v27 }
 0x6c2   :  { %v8869_v63 = vand.u32 4294901760, %v8868_v53  ;;  %v8877_v20 = vsub.f32 %v8875_v51, %v8876_v46  ;;  %v12289_v32 = vpack.c.bf16 %v8875_v51, %v8868_v53  ;;  %v9726_v52 = vsel %vm9275_vm4, %v2307_v44, 0 }
 0x6c4   :  { %12269 = vmatpush3.bf16.msra.mxu1 %v14852_v10  ;;  %v8777_v10 = vld [vmem:[#allocation2 + $0x388] sm:$0xff]  ;;  %v8870_v37 = vsub.f32 %v8868_v53, %v8869_v63  ;;  %v8878_v34 = vand.u32 4294901760, %v8877_v20  ;;  %v12301_v35 = vpack.c.bf16 %v8876_v46, %v8869_v63  ;;  %v9806_v53 = vsub.f32 %v9273_v54, %v9729_v29 }
 0x6c5   :  { %12270 = vmatprep.subr.bf16.mxu1 %v15724_v27 }
 0x6c6   :  { %v8871_v25 = vand.u32 4294901760, %v8870_v37 }
 0x6c8   :  { %12272 = vmatpush3.bf16.msra.mxu1 %v14856_v55  ;;  %v8797_v55 = vand.u32 4294901760, %v8777_v10  ;;  %v12283_v9 = vpack.c.bf16 %v8878_v34, %v8871_v25 }
 0x6c9   :  { %12273 = vmatprep.subr.bf16.mxu1 %v15724_v27 }
 0x6ca   :  { %v8889_v57 = vsub.f32 %v8777_v10, %v8797_v55 }
 0x6cc   :  { %12275 = vmatpush3.bf16.msra.mxu1 %v14874_v43  ;;  %v12280_v43 = vpack.c.bf16 %v8797_v55, %v8794_v26  ;;  %v8890_v7 = vand.u32 4294901760, %v8889_v57 }
 0x6ce   :  { %12281 = vmatpush3.bf16.msra.mxu0 %v12280_v43  ;;  %v8891_v1 = vsub.f32 %v8889_v57, %v8890_v7 }
 0x6cf   :  { %11146 = vmatmul.mubr.f32.vlgmr.msra.gmra.mrb[18].mxu1 %v14971_v41  ;;  %v8882_v41 = vsub.f32 %v8776_v36, %v8794_v26  ;;  %12282 = vmatprep.subr.bf16.mxu0 %v15724_v27  ;;  %v9807_v36 = vand.u32 4294901760, %v9806_v53 }
 0x6d0   :  { %v8892_v21 = vand.u32 4294901760, %v8891_v1 }
 0x6d1   :  { %v8883_v61 = vand.u32 4294901760, %v8882_v41  ;;  %v12292_v3 = vpack.c.bf16 %v8889_v57, %v8882_v41  ;;  %v9808_v26 = vsub.f32 %v9806_v53, %v9807_v36 }
 0x6d3   :  { %v8884_v12 = vsub.f32 %v8882_v41, %v8883_v61  ;;  %v12304_v13 = vpack.c.bf16 %v8890_v7, %v8883_v61  ;;  %v9809_v63 = vand.u32 4294901760, %v9808_v26 }
 0x6d5   :  { %v8885_v15 = vand.u32 4294901760, %v8884_v12 }
 0x6d7   :  { %v12286_v5 = vpack.c.bf16 %v8892_v21, %v8885_v15 }
 0x7a2   :  { %v8769_v58 = vpop.f32.mrb[18].mxu1 }
 0x7a3   :  { %v12315_v39 = vadd.f32 %v10191_v24, %v8769_v58  ;;  %v11147_v0 = vpop.f32.mrb[19].mxu1 }
 0x7a5   :  { %v8773_v30 = vmax.f32 %v12315_v39, 0.0 }
 0x7a7   :  { %v8785_v62 = vsel %vm8783_vm3, %v8773_v30, 0 }
 0x7a8   :  { %v8856_v8 = vand.u32 4294901760, %v8785_v62 }
 0x7aa   :  { %v8857_v49 = vsub.f32 %v8785_v62, %v8856_v8 }
 0x7ac   :  { %v8858_v4 = vand.u32 4294901760, %v8857_v49 }
 0x7ae   :  { %v8859_v59 = vsub.f32 %v8857_v49, %v8858_v4 }
 0x7b0   :  { %v8860_v56 = vand.u32 4294901760, %v8859_v59 }
 0x7b2   :  { %11157 = vmatmul.mubr.f32.vlgmr.msra.gmra.mrb[30].mxu0 %v8860_v56 }
 0x7b3   :  { %12284 = vmatpush3.bf16.msra.mxu0 %v12283_v9  ;;  %11167 = vmatprep.mubr.msk.f32.mxu0 %vm12492_vm1, %v15727_v17 }
 0x7b4   :  { %12285 = vmatprep.subr.bf16.mxu0 %v15724_v27 }
 0x7b7   :  { %12287 = vmatpush3.bf16.msra.mxu0 %v12286_v5 }
 0x7b8   :  { %12288 = vmatprep.subr.bf16.mxu0 %v15724_v27 }
 0x7ba   :  { %11168 = vmatmul.mubr.f32.vlgmr.msra.gmra.mrb[30].mxu0 %v8856_v8 }
 0x7bb   :  { %12290 = vmatpush3.bf16.msra.mxu0 %v12289_v32  ;;  %11178 = vmatprep.mubr.msk.f32.mxu0 %vm12492_vm1, %v15727_v17 }
 0x7bc   :  { %12291 = vmatprep.subr.bf16.mxu0 %v15724_v27 }
 0x7bf   :  { %12293 = vmatpush3.bf16.msra.mxu0 %v12292_v3 }
 0x7c0   :  { %12294 = vmatprep.subr.bf16.mxu0 %v15724_v27 }
 0x7c2   :  { %11179 = vmatmul.mubr.f32.vlgmr.msra.gmra.mrb[30].mxu0 %v8857_v49 }
 0x7c3   :  { %12296 = vmatpush3.bf16.msra.mxu0 %v15079_v45  ;;  %11189 = vmatprep.mubr.msk.f32.mxu0 %vm12492_vm1, %v15727_v17 }
 0x7c4   :  { %12297 = vmatprep.subr.bf16.mxu0 %v15724_v27 }
 0x7c7   :  { %12299 = vmatpush3.bf16.msra.mxu0 %v12280_v43 }
 0x7c8   :  { %12300 = vmatprep.subr.bf16.mxu0 %v15724_v27 }
 0x7ca   :  { %11190 = vmatmul.mubr.f32.vlgmr.msra.gmra.mrb[30].mxu0 %v8858_v4 }
 0x7cb   :  { %12302 = vmatpush3.bf16.msra.mxu0 %v12301_v35  ;;  %11200 = vmatprep.mubr.msk.f32.mxu0 %vm12492_vm1, %v15727_v17 }
 0x7cc   :  { %12303 = vmatprep.subr.bf16.mxu0 %v15724_v27 }
 0x7cf   :  { %12305 = vmatpush3.bf16.msra.mxu0 %v12304_v13 }
 0x7d0   :  { %12306 = vmatprep.subr.bf16.mxu0 %v15724_v27 }
 0x7d2   :  { %11201 = vmatmul.mubr.f32.vlgmr.msra.gmra.mrb[30].mxu0 %v8856_v8 }
 0x7d3   :  { %12308 = vmatpush3.bf16.msra.mxu0 %v15079_v45  ;;  %11211 = vmatprep.mubr.msk.f32.mxu0 %vm12492_vm1, %v15727_v17  ;;  %v9794_v45 = vand.u32 4294901760, %v9726_v52 }
 0x7d4   :  { %12309 = vmatprep.subr.bf16.mxu0 %v15724_v27 }
 0x7d5   :  { %v9795_v51 = vsub.f32 %v9726_v52, %v9794_v45 }
 0x7d7   :  { %12311 = vmatpush3.bf16.msra.mxu0 %v12280_v43  ;;  %v9796_v10 = vand.u32 4294901760, %v9795_v51 }
 0x7d8   :  { %11214 = vmatprep.subr.mxu0 %v15727_v17 }
 0x7d9   :  { %v9797_v55 = vsub.f32 %v9795_v51, %v9796_v10 }
 0x7da   :  { %11212 = vmatmul.mubr.f32.vlgmr.msra.gmra.mrb[30].mxu0 %v8856_v8 }
 0x7db   :  { %11216 = vmatprep.mubr.msk.f32.mxu0 %vm12492_vm1, %v15727_v17  ;;  %11215 = vmatpush3.msra.mxu0 %v9280_v2  ;;  %v9798_v46 = vand.u32 4294901760, %v9797_v55 }
 0x7dc   :  { %11219 = vmatprep.subr.mxu0 %v15727_v17 }
 0x8ad   :  { %v9268_v14 = vpop.f32.mrb[30].mxu0 }
 0x8ae   :  { %v12316_v28 = vadd.f32 %v10192_v33, %v9268_v14  ;;  %v11213_v22 = vpop.f32.mrb[31].mxu0  ;;  %v10193_v33 = vld [vmem:[#allocation2 + $0x3a8] ss:$0 sm:$0xff] }
 0x8b0   :  { %v9272_v47 = vmax.f32 %v12316_v28, 0.0 }
 0x8b2   :  { %v9277_v27 = vsel %vm9275_vm4, %v9272_v47, 0 }
 0x8b3   :  { %v9345_v50 = vand.u32 4294901760, %v9277_v27 }
 0x8b5   :  { %v9346_v23 = vsub.f32 %v9277_v27, %v9345_v50 }
 0x8b7   :  { %v9347_v40 = vand.u32 4294901760, %v9346_v23 }
 0x8b9   :  { %v9348_v16 = vsub.f32 %v9346_v23, %v9347_v40 }
 0x8bb   :  { %v9349_v6 = vand.u32 4294901760, %v9348_v16 }
 0x8bd   :  { %11217 = vmatmul.mubr.f32.vlgmr.msra.gmra.mrb[32].mxu0 %v9349_v6 }
 0x8be   :  { %11220 = vmatpush3.msra.mxu0 %v9360_v19  ;;  %11221 = vmatprep.mubr.msk.f32.mxu0 %vm12492_vm1, %v15727_v17 }
 0x8bf   :  { %11224 = vmatprep.subr.mxu0 %v15727_v17 }
 0x8c1   :  { %11222 = vmatmul.mubr.f32.vlgmr.msra.gmra.mrb[34].mxu0 %v9345_v50 }
 0x8c2   :  { %11225 = vmatpush3.msra.mxu0 %v9357_v38  ;;  %11226 = vmatprep.mubr.msk.f32.mxu0 %vm12492_vm1, %v15727_v17 }
 0x8c3   :  { %11229 = vmatprep.subr.mxu0 %v15727_v17 }
 0x8c5   :  { %11227 = vmatmul.mubr.f32.vlgmr.msra.gmra.mrb[36].mxu0 %v9346_v23 }
 0x8c6   :  { %11230 = vmatpush3.msra.mxu0 %v9280_v2  ;;  %11231 = vmatprep.mubr.msk.f32.mxu0 %vm12492_vm1, %v15727_v17 }
 0x8c7   :  { %11234 = vmatprep.subr.mxu0 %v15727_v17 }
 0x8c9   :  { %11232 = vmatmul.mubr.f32.vlgmr.msra.gmra.mrb[38].mxu0 %v9347_v40 }
 0x8ca   :  { %11235 = vmatpush3.msra.mxu0 %v9358_v31  ;;  %11236 = vmatprep.mubr.msk.f32.mxu0 %vm12492_vm1, %v15727_v17 }
 0x8cb   :  { %11239 = vmatprep.subr.mxu0 %v15727_v17 }
 0x8cd   :  { %11237 = vmatmul.mubr.f32.vlgmr.msra.gmra.mrb[40].mxu0 %v9345_v50 }
 0x8ce   :  { %11240 = vmatpush3.msra.mxu0 %v9280_v2  ;;  %11241 = vmatprep.mubr.msk.f32.mxu0 %vm12492_vm1, %v15727_v17 }
 0x8cf   :  { %11244 = vmatprep.subr.mxu0 %v15727_v17 }
 0x8d1   :  { %11242 = vmatmul.mubr.f32.vlgmr.msra.gmra.mrb[42].mxu0 %v9345_v50 }
 0x8d2   :  { %11245 = vmatpush3.msra.mxu0 %v9729_v29  ;;  %11246 = vmatprep.mubr.msk.f32.mxu0 %vm12492_vm1, %v15727_v17 }
 0x8d3   :  { %11249 = vmatprep.subr.mxu0 %v15727_v17 }
 0x8d5   :  { %11247 = vmatmul.mubr.f32.vlgmr.msra.gmra.mrb[44].mxu0 %v9798_v46 }
 0x8d6   :  { %11250 = vmatpush3.msra.mxu0 %v9809_v63  ;;  %11251 = vmatprep.mubr.msk.f32.mxu0 %vm12492_vm1, %v15727_v17 }
 0x8d7   :  { %11254 = vmatprep.subr.mxu0 %v15727_v17 }
 0x8d9   :  { %11252 = vmatmul.mubr.f32.vlgmr.msra.gmra.mrb[46].mxu0 %v9794_v45 }
 0x8da   :  { %11255 = vmatpush3.msra.mxu0 %v9806_v53  ;;  %11256 = vmatprep.mubr.msk.f32.mxu0 %vm12492_vm1, %v15727_v17 }
 0x8db   :  { %11259 = vmatprep.subr.mxu0 %v15727_v17 }
 0x8dd   :  { %11257 = vmatmul.mubr.f32.vlgmr.msra.gmra.mrb[48].mxu0 %v9795_v51 }
 0x8de   :  { %11260 = vmatpush3.msra.mxu0 %v9729_v29  ;;  %11261 = vmatprep.mubr.msk.f32.mxu0 %vm12492_vm1, %v15727_v17 }
 0x8df   :  { %11264 = vmatprep.subr.mxu0 %v15727_v17 }
 0x8e1   :  { %11262 = vmatmul.mubr.f32.vlgmr.msra.gmra.mrb[50].mxu0 %v9796_v10 }
 0x8e2   :  { %11265 = vmatpush3.msra.mxu0 %v9807_v36  ;;  %11266 = vmatprep.mubr.msk.f32.mxu0 %vm12492_vm1, %v15727_v17 }
 0x8e3   :  { %11269 = vmatprep.subr.mxu0 %v15727_v17 }
 0x8e5   :  { %11267 = vmatmul.mubr.f32.vlgmr.msra.gmra.mrb[52].mxu0 %v9794_v45 }
 0x8e6   :  { %11270 = vmatpush3.msra.mxu0 %v9729_v29  ;;  %11271 = vmatprep.mubr.msk.f32.mxu0 %vm12492_vm1, %v15727_v17 }
 0x8e9   :  { %11272 = vmatmul.mubr.f32.vlgmr.msra.gmra.mrb[54].mxu0 %v9794_v45 }
 0x990   :  { %v9351_v43 = vpop.f32.mrb[32].mxu0 }
 0x991   :  { %v11218_v41 = vpop.f32.mrb[33].mxu0 }
 0x994   :  { %v9427_v57 = vpop.f32.mrb[34].mxu0 }
 0x995   :  { %v9428_v37 = vadd.f32 %v9427_v57, %v9351_v43  ;;  %v11223_v20 = vpop.f32.mrb[35].mxu0 }
 0x998   :  { %v9501_v25 = vpop.f32.mrb[36].mxu0 }
 0x999   :  { %v9502_v61 = vadd.f32 %v9501_v25, %v9428_v37  ;;  %v11228_v7 = vpop.f32.mrb[37].mxu0 }
 0x99c   :  { %v9575_v34 = vpop.f32.mrb[38].mxu0 }
 0x99d   :  { %v9576_v12 = vadd.f32 %v9575_v34, %v9502_v61  ;;  %v11233_v1 = vpop.f32.mrb[39].mxu0 }
 0x9a0   :  { %v9649_v9 = vpop.f32.mrb[40].mxu0 }
 0x9a1   :  { %v9650_v15 = vadd.f32 %v9649_v9, %v9576_v12  ;;  %v11238_v21 = vpop.f32.mrb[41].mxu0 }
 0x9a4   :  { %v9721_v5 = vpop.f32.mrb[42].mxu0 }
 0x9a5   :  { %v9722_v32 = vadd.f32 %v9721_v5, %v9650_v15  ;;  %v11243_v3 = vpop.f32.mrb[43].mxu0 }
 0x9a8   :  { %v9800_v35 = vpop.f32.mrb[44].mxu0 }
 0x9a9   :  { %v9801_v17 = vadd.f32 %v9800_v35, %v9722_v32  ;;  %v11248_v13 = vpop.f32.mrb[45].mxu0 }
 0x9ac   :  { %v9876_v24 = vpop.f32.mrb[46].mxu0 }
 0x9ad   :  { %v9877_v58 = vadd.f32 %v9876_v24, %v9801_v17  ;;  %v11253_v39 = vpop.f32.mrb[47].mxu0 }
 0x9b0   :  { %v9950_v0 = vpop.f32.mrb[48].mxu0 }
 0x9b1   :  { %v9951_v30 = vadd.f32 %v9950_v0, %v9877_v58  ;;  %v11258_v62 = vpop.f32.mrb[49].mxu0 }
 0x9b4   :  { %v10024_v8 = vpop.f32.mrb[50].mxu0 }
 0x9b5   :  { %v10025_v49 = vadd.f32 %v10024_v8, %v9951_v30  ;;  %v11263_v4 = vpop.f32.mrb[51].mxu0 }
 0x9b8   :  { %v10098_v59 = vpop.f32.mrb[52].mxu0 }
 0x9b9   :  { %v10099_v56 = vadd.f32 %v10098_v59, %v10025_v49  ;;  %v11268_v42 = vpop.f32.mrb[53].mxu0 }
 0x9bc   :  { %v10170_v2 = vpop.f32.mrb[54].mxu0 }
 0x9bd   :  { %v10171_v14 = vadd.f32 %v10170_v2, %v10099_v56  ;;  %v11273_v28 = vpop.f32.mrb[55].mxu0 }
 0x9bf   :  { %v10179_v22 = vadd.f32 %v10193_v33, %v10171_v14 }
 0x9c1   :  { %10180 = vst [vmem:[%s15150_s3] sm:$0xff] %v10179_v22 }
 0x9c2   :  { %10185 = vsyncpa [#allocation3], 1 }

</bundles_post_ra>
